<compile_context>
chip_gen: v5e
topology: v5e:2x2
jax: 0.10.0
libtpu: 0.0.40
codegen_flags: <defaults>
</compile_context>

<pallas_src>
import functools

import jax
import jax.numpy as jnp
import numpy as np
from jax.experimental import pallas as pl
from jax.experimental.pallas import tpu as pltpu

LANE = 128          # channel padding granularity (lane width)
EPS = 1e-5          # nn.InstanceNorm2d default


def _round_up(x, m):
    return ((x + m - 1) // m) * m


def _detect_tpu():
    """Generation-dependent MXU-N block width and scoped-VMEM budget."""
    try:
        kind = jax.devices()[0].device_kind.lower()
    except Exception:  # pragma: no cover
        kind = ""
    if "v7" in kind:          # 64 MiB VMEM, 256-wide MXU
        return 256, 48 * 1024 * 1024
    if "v6" in kind:          # 128 MiB VMEM, 256-wide MXU
        return 256, 64 * 1024 * 1024
    if "v5" in kind:          # 128-wide MXU, 128 MiB VMEM
        return 128, 64 * 1024 * 1024
    return 128, 32 * 1024 * 1024


NB_MAX, VMEM_LIMIT = _detect_tpu()


def _cbw(c_pad):
    """Per-layer output channel-block width."""
    return NB_MAX if c_pad % NB_MAX == 0 else LANE


# Tap table for space-to-depth layers (layers >= 1).
#   (shift_kind, parity_slice, di, dj)
#   shift_kind: 0 -> row shift 0, 1 -> +1, 2 -> +wp, 3 -> +wp+1
#   parity_slice p = 2*row_parity + col_parity selects lanes [p*C, (p+1)*C).
_S2D_TAPS = (
    (0, 3, 0, 0),
    (1, 2, 0, 1), (1, 3, 0, 2),
    (2, 1, 1, 0), (2, 3, 2, 0),
    (3, 0, 1, 1), (3, 1, 1, 2), (3, 2, 2, 1), (3, 3, 2, 2),
)


# ------------------------------ Pallas kernels ------------------------------

def _conv_block_compute(f_ref, w_ref, b_ref, ws_ref, bs_ref, g_ref, bt_ref, *,
                        ho, wo, c_in, im2col, normalization, residual):
    """conv3x3/s2 + bias + ReLU (+ 1x1/s2 skip) (+ InstanceNorm2d).

    Returns (y [m_out, CB] f32, valid [m_out, 1] bool or None).  For the
    space-to-depth layout, rows with column index == wo are stride-padding
    artifacts and are excluded from the statistics / pool via `valid`.
    """
    cbw = w_ref.shape[2]

    if im2col:
        # Layer 0: single matmul over the full (zero-padded) K = 9*C_in tile.
        m_out = ho * wo
        x = f_ref[0, :m_out, :]
        acc = jnp.dot(x, w_ref[0], preferred_element_type=jnp.float32)
        skip_src = x                       # skip weights are zero-embedded
        valid = None
    else:
        assert f_ref.shape[2] == 4 * c_in
        wp = wo + 1
        m_out = ho * wp
        shifts = (0, 1, wp, wp + 1)
        acc = jnp.zeros((m_out, cbw), jnp.float32)
        skip_src = None
        # 9 exact-K matmuls over lane-aligned parity slices (no structural 0s).
        # NOTE: the +1 / +wp+1 sublane offsets may relayout under bf16 packing;
        # cost is small relative to the MXU work (see review item 7).
        for t, (sk, p, _di, _dj) in enumerate(_S2D_TAPS):
            d = shifts[sk]
            v = f_ref[0, d:d + m_out, p * c_in:(p + 1) * c_in]
            acc = acc + jnp.dot(v, w_ref[t], preferred_element_type=jnp.float32)
            if sk == 3 and p == 0:         # parity (0,0) of block (i, j)
                skip_src = v
        rows = jax.lax.broadcasted_iota(jnp.int32, (m_out, 1), 0)
        valid = (rows % wp) != wo

    y = jnp.maximum(acc + b_ref[...], 0.0)                 # conv bias + ReLU
    if residual:                                           # 1x1/s2 projection
        y = y + jnp.dot(skip_src, ws_ref[...],
                        preferred_element_type=jnp.float32) + bs_ref[...]

    if normalization:                                      # InstanceNorm2d
        inv_n = 1.0 / float(ho * wo)
        ym = y if valid is None else y * valid.astype(jnp.float32)
        s1 = jnp.sum(ym, axis=0, keepdims=True)            # masked sum
        s2 = jnp.sum(ym * y, axis=0, keepdims=True)        # masked sum of sq.
        mean = s1 * inv_n
        var = s2 * inv_n - mean * mean                     # biased variance
        scale = g_ref[...] * jax.lax.rsqrt(var + EPS)
        y = y * scale + (bt_ref[...] - mean * scale)       # affine=True
    return y, valid


def _down_block_kernel(f_ref, w_ref, b_ref, ws_ref, bs_ref, g_ref, bt_ref,
                       o_ref, *, ho, wo, c_in, im2col, normalization, residual):
    y, _ = _conv_block_compute(f_ref, w_ref, b_ref, ws_ref, bs_ref, g_ref,
                               bt_ref, ho=ho, wo=wo, c_in=c_in, im2col=im2col,
                               normalization=normalization, residual=residual)
    o_ref[0] = y.astype(o_ref.dtype)


def _down_block_head_kernel(f_ref, w_ref, b_ref, ws_ref, bs_ref, g_ref, bt_ref,
                            fcw_ref, fcb_ref, o_ref, acc_ref, *, ho, wo, c_in,
                            im2col, normalization, residual):
    """Last layer fused with AdaptiveMaxPool2d((1,1)) + ReLU + Linear.

    grid = (B, n_cb); the channel-block axis is the (inner, "arbitrary")
    reduction, accumulated in an f32 VMEM scratch and stored once per sample
    into a lane-dense, zero-padded (1, 1, out_pad) output block.
    """
    y, valid = _conv_block_compute(f_ref, w_ref, b_ref, ws_ref, bs_ref, g_ref,
                                   bt_ref, ho=ho, wo=wo, c_in=c_in,
                                   im2col=im2col, normalization=normalization,
                                   residual=residual)
    if valid is None:
        pooled = jnp.max(y, axis=0, keepdims=True)
    else:
        pooled = jnp.max(jnp.where(valid, y, -1e30), axis=0, keepdims=True)
    pooled = jnp.maximum(pooled, 0.0)                       # F.relu(pool(out))
    part = jnp.dot(pooled.astype(fcw_ref.dtype), fcw_ref[...],
                   preferred_element_type=jnp.float32)      # (1, out_pad)

    cb = pl.program_id(1)

    @pl.when(cb == 0)
    def _init():
        acc_ref[...] = fcb_ref[...]                         # init with fc bias

    acc_ref[...] += part

    @pl.when(cb == pl.num_programs(1) - 1)
    def _store():
        o_ref[0] = acc_ref[...]


# -------------------------------- JAX glue ----------------------------------

def _prep_im2col(x):
    """Layer-0 input: NHWC -> 3x3/s2 im2col, K = 9*C padded to one lane tile."""
    B, H, W, C = x.shape
    if H % 2 or W % 2:
        raise ValueError("even spatial dims required")  # TODO(synk): odd sizes
    ho, wo = H // 2, W // 2
    xpad = jnp.pad(x, ((0, 0), (1, 1), (1, 1), (0, 0)))
    cols = [xpad[:, di:di + H:2, dj:dj + W:2, :]
            for di in range(3) for dj in range(3)]          # (di*3+dj, c) order
    flat = jnp.concatenate(cols, axis=-1).reshape(B, ho * wo, 9 * C)
    k_pad = _round_up(9 * C, LANE)
    flat = jnp.pad(flat, ((0, 0), (0, 0), (0, k_pad - 9 * C)))
    return flat, ho, wo


def _prep_s2d(x):
    """Layers >= 1: NHWC -> flattened, zero-padded space-to-depth tensor.

    Rows are the (Ho+1)x(Wo+1) top/left-zero-padded 2x2-pixel-block grid in
    row-major order (stride Wp = Wo+1); channels ordered (row-parity,
    col-parity, c) so parity slices are C-wide and 128-aligned.
    """
    B, H, W, C = x.shape
    if H % 2 or W % 2:
        raise ValueError("even spatial dims required")  # TODO(synk): odd sizes
    ho, wo = H // 2, W // 2
    hp, wp = ho + 1, wo + 1
    s2d = x.reshape(B, ho, 2, wo, 2, C).transpose(0, 1, 3, 2, 4, 5)
    s2d = s2d.reshape(B, ho, wo, 4 * C)
    s2d = jnp.pad(s2d, ((0, 0), (1, 0), (1, 0), (0, 0)))
    flat = s2d.reshape(B, hp * wp, 4 * C)
    m_in = _round_up(hp * wp + wp + 2, 8)
    flat = jnp.pad(flat, ((0, 0), (0, m_in - hp * wp), (0, 0)))
    return flat, ho, wo


def _layer_specs(m_in, k_full, ntaps, k_w, cbw, imap):
    return [
        pl.BlockSpec((1, m_in, k_full), lambda *a, _m=imap: (_m(*a), 0, 0)),
        pl.BlockSpec((ntaps, k_w, cbw), lambda *a, _m=imap: (0, 0, _cb(*a))),
    ]


def _layer_call(flat, lp, ho, wo, *, im2col, normalization, residual):
    B, m_in, k_full = flat.shape
    ntaps, k_w, c_pad = lp["w_eff"].shape
    cbw = _cbw(c_pad)
    n_cb = c_pad // cbw
    m_out = ho * (wo if im2col else wo + 1)
    kern = functools.partial(_down_block_kernel, ho=ho, wo=wo, c_in=k_w,
                             im2col=im2col, normalization=normalization,
                             residual=residual)
    # grid = (n_cb, B): the weight blocks keep the same block index across the
    # inner batch axis -> DMA'd once per channel block (review item 2).
    out = pl.pallas_call(
        kern,
        out_shape=jax.ShapeDtypeStruct((B, m_out, c_pad), jnp.bfloat16),
        grid=(n_cb, B),
        in_specs=[
            pl.BlockSpec((1, m_in, k_full), lambda cb, b: (b, 0, 0)),
            pl.BlockSpec((ntaps, k_w, cbw), lambda cb, b: (0, 0, cb)),
            pl.BlockSpec((1, cbw), lambda cb, b: (0, cb)),      # conv bias
            pl.BlockSpec((k_w, cbw), lambda cb, b: (0, cb)),    # skip weights
            pl.BlockSpec((1, cbw), lambda cb, b: (0, cb)),      # skip bias
            pl.BlockSpec((1, cbw), lambda cb, b: (0, cb)),      # gamma
            pl.BlockSpec((1, cbw), lambda cb, b: (0, cb)),      # beta
        ],
        out_specs=pl.BlockSpec((1, m_out, cbw), lambda cb, b: (b, 0, cb)),
        compiler_params=pltpu.CompilerParams(
            dimension_semantics=("parallel", "parallel"),
            vmem_limit_bytes=VMEM_LIMIT),
    )(flat, lp["w_eff"], lp["b"], lp["ws_eff"], lp["bs"], lp["gamma"],
      lp["beta"])
    if im2col:
        return out.reshape(B, ho, wo, c_pad)
    # Drop the stride-padding column -> channels-last [B, Ho, Wo, C_pad].
    return out.reshape(B, ho, wo + 1, c_pad)[:, :, :wo, :]


def _head_call(flat, lp, fc_w, fc_b, ho, wo, *, im2col, normalization,
               residual):
    B, m_in, k_full = flat.shape
    ntaps, k_w, c_pad = lp["w_eff"].shape
    cbw = _cbw(c_pad)
    n_cb = c_pad // cbw
    out_pad = fc_w.shape[-1]
    kern = functools.partial(_down_block_head_kernel, ho=ho, wo=wo, c_in=k_w,
                             im2col=im2col, normalization=normalization,
                             residual=residual)
    out = pl.pallas_call(
        kern,
        out_shape=jax.ShapeDtypeStruct((B, 1, out_pad), jnp.float32),
        grid=(B, n_cb),
        in_specs=[
            pl.BlockSpec((1, m_in, k_full), lambda b, cb: (b, 0, 0)),
            pl.BlockSpec((ntaps, k_w, cbw), lambda b, cb: (0, 0, cb)),
            pl.BlockSpec((1, cbw), lambda b, cb: (0, cb)),
            pl.BlockSpec((k_w, cbw), lambda b, cb: (0, cb)),
            pl.BlockSpec((1, cbw), lambda b, cb: (0, cb)),
            pl.BlockSpec((1, cbw), lambda b, cb: (0, cb)),
            pl.BlockSpec((1, cbw), lambda b, cb: (0, cb)),
            pl.BlockSpec((cbw, out_pad), lambda b, cb: (cb, 0)),   # fc weights
            pl.BlockSpec((1, out_pad), lambda b, cb: (0, 0)),      # fc bias
        ],
        out_specs=pl.BlockSpec((1, 1, out_pad), lambda b, cb: (b, 0, 0)),
        scratch_shapes=[pltpu.VMEM((1, out_pad), jnp.float32)],
        compiler_params=pltpu.CompilerParams(
            dimension_semantics=("parallel", "arbitrary"),
            vmem_limit_bytes=VMEM_LIMIT),
    )(flat, lp["w_eff"], lp["b"], lp["ws_eff"], lp["bs"], lp["gamma"],
      lp["beta"], fc_w, fc_b)
    return out.reshape(B, out_pad)


# ---------------------------- parameters / forward ---------------------------

def init_raw_params(key, in_channels, dims, output_dim):
    """Unpadded f32 parameters (used both for packing and by the reference)."""
    layers = []
    c_in = in_channels
    for c_out in dims:
        key, k1, k2, k3, k4, k5, k6 = jax.random.split(key, 7)
        layers.append(dict(
            w3=jax.random.normal(k1, (3, 3, c_in, c_out), jnp.float32)
               / np.sqrt(9.0 * c_in),
            b=0.01 * jax.random.normal(k2, (c_out,), jnp.float32),
            ws=jax.random.normal(k3, (c_in, c_out), jnp.float32)
               / np.sqrt(float(c_in)),
            bs=0.01 * jax.random.normal(k4, (c_out,), jnp.float32),
            gamma=1.0 + 0.1 * jax.random.normal(k5, (c_out,), jnp.float32),
            beta=0.05 * jax.random.normal(k6, (c_out,), jnp.float32),
        ))
        c_in = c_out
    raw = dict(layers=layers)
    if output_dim is not None:
        key, kf1, kf2 = jax.random.split(key, 3)
        raw["fc_w"] = (jax.random.normal(kf1, (dims[-1], output_dim),
                                         jnp.float32) / np.sqrt(dims[-1]))
        raw["fc_b"] = 0.01 * jax.random.normal(kf2, (output_dim,), jnp.float32)
    return raw


def pack_params(raw, in_channels, dims, output_dim):
    """Pad channels to multiples of 128 (zero weights -> mathematically inert),
    fold conv kernels into the kernel's tap layout, cast matmul weights bf16."""
    layers = []
    c_in_real, c_in_pad = in_channels, in_channels
    for idx, (lp, c_out_real) in enumerate(zip(raw["layers"], dims)):
        c_out_pad = _round_up(c_out_real, LANE)
        w3 = np.asarray(lp["w3"], np.float32)
        ws = np.asarray(lp["ws"], np.float32)
        if idx == 0:
            # Layer 0: im2col layout, K = 9*C_in padded to one lane tile.
            k_pad = _round_up(9 * c_in_real, LANE)
            w_eff = np.zeros((1, k_pad, c_out_pad), np.float32)
            w_eff[0, :9 * c_in_real, :c_out_real] = \
                w3.reshape(9 * c_in_real, c_out_real)
            ws_eff = np.zeros((k_pad, c_out_pad), np.float32)
            ws_eff[4 * c_in_real:5 * c_in_real, :c_out_real] = ws
        else:
            # Space-to-depth layout: 9 exact-K tap matrices (no structural 0s)
            # + a [C_in_pad, C_out_pad] skip matrix (parity (0,0) slice only).
            w_eff = np.zeros((9, c_in_pad, c_out_pad), np.float32)
            for t, (_sk, _p, di, dj) in enumerate(_S2D_TAPS):
                w_eff[t, :c_in_real, :c_out_real] = w3[di, dj]
            ws_eff = np.zeros((c_in_pad, c_out_pad), np.float32)
            ws_eff[:c_in_real, :c_out_real] = ws

        def pad_vec(v, fill=0.0):
            out = np.full((1, c_out_pad), fill, np.float32)
            out[0, :c_out_real] = np.asarray(v, np.float32)
            return out

        layers.append(dict(
            w_eff=jnp.asarray(w_eff, jnp.bfloat16),
            ws_eff=jnp.asarray(ws_eff, jnp.bfloat16),
            b=jnp.asarray(pad_vec(lp["b"])),
            bs=jnp.asarray(pad_vec(lp["bs"])),
            gamma=jnp.asarray(pad_vec(lp["gamma"], fill=1.0)),
            beta=jnp.asarray(pad_vec(lp["beta"], fill=0.0)),
        ))
        c_in_real, c_in_pad = c_out_real, c_out_pad

    packed = dict(layers=layers)
    if output_dim is not None:
        out_pad = _round_up(output_dim, LANE)     # lane-dense head output
        fcw = np.zeros((c_in_pad, out_pad), np.float32)
        fcw[:c_in_real, :output_dim] = np.asarray(raw["fc_w"], np.float32)
        fcb = np.zeros((1, out_pad), np.float32)
        fcb[0, :output_dim] = np.asarray(raw["fc_b"], np.float32)
        packed["fc_w"] = jnp.asarray(fcw, jnp.bfloat16)
        packed["fc_b"] = jnp.asarray(fcb)
    return packed


def encoder_forward(x_nchw, params, *, dims, normalization=True, residual=True,
                    output_dim=None):
    # Single NCHW -> NHWC transpose at the boundary; bf16 activations after.
    x = jnp.transpose(x_nchw, (0, 2, 3, 1)).astype(jnp.bfloat16)
    n = len(params["layers"])
    for idx, lp in enumerate(params["layers"]):
        im2col = (idx == 0)
        flat, ho, wo = _prep_im2col(x) if im2col else _prep_s2d(x)
        if output_dim is not None and idx == n - 1:
            z = _head_call(flat, lp, params["fc_w"], params["fc_b"], ho, wo,
                           im2col=im2col, normalization=normalization,
                           residual=residual)
            return z[:, :output_dim]
        x = _layer_call(flat, lp, ho, wo, im2col=im2col,
                        normalization=normalization, residual=residual)
    # output_dim is None: NCHW feature map with the real channels.
    c_real = dims[-1]
    return jnp.transpose(x[..., :c_real].astype(jnp.float32), (0, 3, 1, 2))


# ------------------------- pure-JAX reference (check) ------------------------

def ref_forward(x_nchw, raw, *, normalization=True, residual=True,
                output_dim=None):
    """Mirrors the kernel's dtype handling (bf16 weights/activations, f32
    accumulation / statistics) using lax.conv_general_dilated."""
    hi = jax.lax.Precision.HIGHEST
    x = jnp.transpose(x_nchw, (0, 2, 3, 1)).astype(jnp.bfloat16)
    y = None
    for lp in raw["layers"]:
        xb = x.astype(jnp.float32)
        w3 = lp["w3"].astype(jnp.bfloat16).astype(jnp.float32)
        ws = lp["ws"].astype(jnp.bfloat16).astype(jnp.float32)
        y = jax.lax.conv_general_dilated(
            xb, w3, window_strides=(2, 2), padding=((1, 1), (1, 1)),
            dimension_numbers=("NHWC", "HWIO", "NHWC"), precision=hi)
        y = jnp.maximum(y + lp["b"], 0.0)
        if residual:
            y = y + jnp.einsum("bhwc,cd->bhwd", xb[:, ::2, ::2, :], ws,
                               precision=hi) + lp["bs"]
        if normalization:
            mean = jnp.mean(y, axis=(1, 2), keepdims=True)
            var = jnp.mean(jnp.square(y - mean), axis=(1, 2), keepdims=True)
            y = (y - mean) * jax.lax.rsqrt(var + EPS) * lp["gamma"] + lp["beta"]
        x = y.astype(jnp.bfloat16)
    if output_dim is None:
        return jnp.transpose(x.astype(jnp.float32), (0, 3, 1, 2))
    pooled = jnp.maximum(jnp.max(y, axis=(1, 2)), 0.0)
    fc_w = raw["fc_w"].astype(jnp.bfloat16)
    z = jnp.dot(pooled.astype(jnp.bfloat16), fc_w,
                preferred_element_type=jnp.float32) + raw["fc_b"]
    return z


# ----------------------------------- main ------------------------------------

if __name__ == "__main__":
    key = jax.random.PRNGKey(0)
    kx, kp = jax.random.split(key)

    B, C_in, H, W = 2, 3, 16, 16
    num_down_convolutions = 3            # small example (16 -> 8 -> 4 -> 2)
    output_dim = 32
    dims = [min(512, 64 * 2 ** i) for i in range(num_down_convolutions)]

    x = jax.random.normal(kx, (B, C_in, H, W), jnp.float32)
    raw = init_raw_params(kp, C_in, dims, output_dim)
    params = pack_params(raw, C_in, dims, output_dim)

    # Embedding path (output_dim = 32).
    fwd = jax.jit(functools.partial(encoder_forward, dims=tuple(dims),
                                    normalization=True, residual=True,
                                    output_dim=output_dim))
    z = jax.block_until_ready(fwd(x, params))
    assert z.shape == (B, output_dim), z.shape
    assert bool(jnp.all(jnp.isfinite(z)))

    ref = jax.jit(functools.partial(ref_forward, normalization=True,
                                    residual=True, output_dim=output_dim))
    z_ref = jax.block_until_ready(ref(x, raw))
    np.testing.assert_allclose(np.asarray(z, np.float32),
                               np.asarray(z_ref, np.float32),
                               rtol=3e-2, atol=3e-2)

    # Feature-map path (output_dim = None).
    fwd_fm = jax.jit(functools.partial(encoder_forward, dims=tuple(dims),
                                       normalization=True, residual=True,
                                       output_dim=None))
    fm = jax.block_until_ready(fwd_fm(x, params))
    assert fm.shape == (B, dims[-1], H // 2 ** num_down_convolutions,
                        W // 2 ** num_down_convolutions), fm.shape
    ref_fm = jax.jit(functools.partial(ref_forward, normalization=True,
                                       residual=True, output_dim=None))
    fm_ref = jax.block_until_ready(ref_fm(x, raw))
    np.testing.assert_allclose(np.asarray(fm, np.float32),
                               np.asarray(fm_ref, np.float32),
                               rtol=3e-2, atol=3e-2)

    print("KERNEL_OK")
</pallas_src>

<mosaic_0001>
module attributes {stable_mosaic.version = 11 : i64} {
  func.func @_down_block_kernel(%arg0: i32, %arg1: i32, %arg2: memref<1x64x128xbf16, #tpu.memory_space<vmem>>, %arg3: memref<1x128x128xbf16, #tpu.memory_space<vmem>>, %arg4: memref<1x128xf32, #tpu.memory_space<vmem>>, %arg5: memref<128x128xbf16, #tpu.memory_space<vmem>>, %arg6: memref<1x128xf32, #tpu.memory_space<vmem>>, %arg7: memref<1x128xf32, #tpu.memory_space<vmem>>, %arg8: memref<1x128xf32, #tpu.memory_space<vmem>>, %arg9: memref<1x64x128xbf16, #tpu.memory_space<vmem>>) attributes {dimension_semantics = [#tpu.dimension_semantics<parallel>, #tpu.dimension_semantics<parallel>], iteration_bounds = array<i64: 1, 2>, scalar_prefetch = 0 : i64, scratch_operands = 0 : i64, tpu.core_type = #tpu.core_type<tc>, window_params = [{transform_indices = @transform_0, window_bounds = array<i64: 1, 64, 128>}, {transform_indices = @transform_1, window_bounds = array<i64: 1, 128, 128>}, {transform_indices = @transform_2, window_bounds = array<i64: 1, 128>}, {transform_indices = @transform_3, window_bounds = array<i64: 128, 128>}, {transform_indices = @transform_4, window_bounds = array<i64: 1, 128>}, {transform_indices = @transform_5, window_bounds = array<i64: 1, 128>}, {transform_indices = @transform_6, window_bounds = array<i64: 1, 128>}, {transform_indices = @transform_7, window_bounds = array<i64: 1, 64, 128>}]} {
    %c0 = arith.constant 0 : index
    %c0_0 = arith.constant 0 : index
    %c0_1 = arith.constant 0 : index
    %0 = vector.load %arg2[%c0, %c0_0, %c0_1] : memref<1x64x128xbf16, #tpu.memory_space<vmem>>, vector<1x64x128xbf16>
    %1 = vector.shape_cast %0 : vector<1x64x128xbf16> to vector<64x128xbf16>
    %c0_2 = arith.constant 0 : index
    %c0_3 = arith.constant 0 : index
    %c0_4 = arith.constant 0 : index
    %2 = vector.load %arg3[%c0_2, %c0_3, %c0_4] : memref<1x128x128xbf16, #tpu.memory_space<vmem>>, vector<1x128x128xbf16>
    %3 = vector.shape_cast %2 : vector<1x128x128xbf16> to vector<128x128xbf16>
    %cst = arith.constant dense<0.000000e+00> : vector<64x128xf32>
    %4 = tpu.matmul %1, %3, %cst {dimension_numbers = #tpu.dot_dimension_numbers<[1], [0], [0], [1], [0, 0, 1, 1], [], []>} : vector<64x128xbf16>, vector<128x128xbf16>, vector<64x128xf32> -> vector<64x128xf32>
    %c0_5 = arith.constant 0 : index
    %c0_6 = arith.constant 0 : index
    %5 = vector.load %arg4[%c0_5, %c0_6] : memref<1x128xf32, #tpu.memory_space<vmem>>, vector<1x128xf32>
    %6 = vector.broadcast %5 : vector<1x128xf32> to vector<64x128xf32>
    %7 = arith.addf %4, %6 : vector<64x128xf32>
    %cst_7 = arith.constant 0.000000e+00 : f32
    %8 = vector.broadcast %cst_7 : f32 to vector<64x128xf32>
    %9 = arith.maximumf %7, %8 : vector<64x128xf32>
    %c0_8 = arith.constant 0 : index
    %c0_9 = arith.constant 0 : index
    %10 = vector.load %arg5[%c0_8, %c0_9] : memref<128x128xbf16, #tpu.memory_space<vmem>>, vector<128x128xbf16>
    %cst_10 = arith.constant dense<0.000000e+00> : vector<64x128xf32>
    %11 = tpu.matmul %1, %10, %cst_10 {dimension_numbers = #tpu.dot_dimension_numbers<[1], [0], [0], [1], [0, 0, 1, 1], [], []>} : vector<64x128xbf16>, vector<128x128xbf16>, vector<64x128xf32> -> vector<64x128xf32>
    %12 = arith.addf %9, %11 : vector<64x128xf32>
    %c0_11 = arith.constant 0 : index
    %c0_12 = arith.constant 0 : index
    %13 = vector.load %arg6[%c0_11, %c0_12] : memref<1x128xf32, #tpu.memory_space<vmem>>, vector<1x128xf32>
    %14 = vector.broadcast %13 : vector<1x128xf32> to vector<64x128xf32>
    %15 = arith.addf %12, %14 : vector<64x128xf32>
    %cst_13 = arith.constant dense<0.000000e+00> : vector<128xf32>
    %16 = vector.multi_reduction <add>, %15, %cst_13 [0] : vector<64x128xf32> to vector<128xf32>
    %17 = vector.shape_cast %16 : vector<128xf32> to vector<1x128xf32>
    %18 = arith.mulf %15, %15 : vector<64x128xf32>
    %cst_14 = arith.constant dense<0.000000e+00> : vector<128xf32>
    %19 = vector.multi_reduction <add>, %18, %cst_14 [0] : vector<64x128xf32> to vector<128xf32>
    %20 = vector.shape_cast %19 : vector<128xf32> to vector<1x128xf32>
    %cst_15 = arith.constant 1.562500e-02 : f32
    %21 = vector.broadcast %cst_15 : f32 to vector<1x128xf32>
    %22 = arith.mulf %17, %21 : vector<1x128xf32>
    %cst_16 = arith.constant 1.562500e-02 : f32
    %23 = vector.broadcast %cst_16 : f32 to vector<1x128xf32>
    %24 = arith.mulf %20, %23 : vector<1x128xf32>
    %25 = arith.mulf %22, %22 : vector<1x128xf32>
    %26 = arith.subf %24, %25 : vector<1x128xf32>
    %c0_17 = arith.constant 0 : index
    %c0_18 = arith.constant 0 : index
    %27 = vector.load %arg7[%c0_17, %c0_18] : memref<1x128xf32, #tpu.memory_space<vmem>>, vector<1x128xf32>
    %cst_19 = arith.constant 9.99999974E-6 : f32
    %28 = vector.broadcast %cst_19 : f32 to vector<1x128xf32>
    %29 = arith.addf %26, %28 : vector<1x128xf32>
    %30 = math.rsqrt %29 : vector<1x128xf32>
    %31 = arith.mulf %27, %30 : vector<1x128xf32>
    %32 = vector.broadcast %31 : vector<1x128xf32> to vector<64x128xf32>
    %33 = arith.mulf %15, %32 : vector<64x128xf32>
    %c0_20 = arith.constant 0 : index
    %c0_21 = arith.constant 0 : index
    %34 = vector.load %arg8[%c0_20, %c0_21] : memref<1x128xf32, #tpu.memory_space<vmem>>, vector<1x128xf32>
    %35 = arith.mulf %22, %31 : vector<1x128xf32>
    %36 = arith.subf %34, %35 : vector<1x128xf32>
    %37 = vector.broadcast %36 : vector<1x128xf32> to vector<64x128xf32>
    %38 = arith.addf %33, %37 : vector<64x128xf32>
    %39 = arith.truncf %38 : vector<64x128xf32> to vector<64x128xbf16>
    %c0_22 = arith.constant 0 : index
    %c0_23 = arith.constant 0 : index
    %c0_24 = arith.constant 0 : index
    %40 = vector.load %arg9[%c0_22, %c0_23, %c0_24] : memref<1x64x128xbf16, #tpu.memory_space<vmem>>, vector<1x64x128xbf16>
    %41 = vector.shape_cast %40 : vector<1x64x128xbf16> to vector<64x128xbf16>
    %42 = vector.shape_cast %39 : vector<64x128xbf16> to vector<1x64x128xbf16>
    tpu.vector_store %arg9[%c0_22, %c0_23, %c0_24], %42 {strides = array<i32>} : memref<1x64x128xbf16, #tpu.memory_space<vmem>>, vector<1x64x128xbf16>,
    return
  }
  func.func @transform_0(%arg0: i32, %arg1: i32) -> (i32, i32, i32) {
    %c0_i32 = arith.constant 0 : i32
    %c0_i32_0 = arith.constant 0 : i32
    %c0_i32_1 = arith.constant 0 : i32
    return %arg1, %c0_i32, %c0_i32_0 : i32, i32, i32
  }
  func.func @transform_1(%arg0: i32, %arg1: i32) -> (i32, i32, i32) {
    %c0_i32 = arith.constant 0 : i32
    %c0_i32_0 = arith.constant 0 : i32
    %c0_i32_1 = arith.constant 0 : i32
    return %c0_i32, %c0_i32_0, %arg0 : i32, i32, i32
  }
  func.func @transform_2(%arg0: i32, %arg1: i32) -> (i32, i32) {
    %c0_i32 = arith.constant 0 : i32
    %c0_i32_0 = arith.constant 0 : i32
    return %c0_i32, %arg0 : i32, i32
  }
  func.func @transform_3(%arg0: i32, %arg1: i32) -> (i32, i32) {
    %c0_i32 = arith.constant 0 : i32
    %c0_i32_0 = arith.constant 0 : i32
    return %c0_i32, %arg0 : i32, i32
  }
  func.func @transform_4(%arg0: i32, %arg1: i32) -> (i32, i32) {
    %c0_i32 = arith.constant 0 : i32
    %c0_i32_0 = arith.constant 0 : i32
    return %c0_i32, %arg0 : i32, i32
  }
  func.func @transform_5(%arg0: i32, %arg1: i32) -> (i32, i32) {
    %c0_i32 = arith.constant 0 : i32
    %c0_i32_0 = arith.constant 0 : i32
    return %c0_i32, %arg0 : i32, i32
  }
  func.func @transform_6(%arg0: i32, %arg1: i32) -> (i32, i32) {
    %c0_i32 = arith.constant 0 : i32
    %c0_i32_0 = arith.constant 0 : i32
    return %c0_i32, %arg0 : i32, i32
  }
  func.func @transform_7(%arg0: i32, %arg1: i32) -> (i32, i32, i32) {
    %c0_i32 = arith.constant 0 : i32
    %c0_i32_0 = arith.constant 0 : i32
    return %arg1, %c0_i32, %arg0 : i32, i32, i32
  }
}

module attributes {stable_mosaic.version = 11 : i64} {
  func.func @_down_block_kernel(%arg0: i32, %arg1: i32, %arg2: memref<1x32x512xbf16, #tpu.memory_space<vmem>>, %arg3: memref<9x128x128xbf16, #tpu.memory_space<vmem>>, %arg4: memref<1x128xf32, #tpu.memory_space<vmem>>, %arg5: memref<128x128xbf16, #tpu.memory_space<vmem>>, %arg6: memref<1x128xf32, #tpu.memory_space<vmem>>, %arg7: memref<1x128xf32, #tpu.memory_space<vmem>>, %arg8: memref<1x128xf32, #tpu.memory_space<vmem>>, %arg9: memref<1x20x128xbf16, #tpu.memory_space<vmem>>) attributes {dimension_semantics = [#tpu.dimension_semantics<parallel>, #tpu.dimension_semantics<parallel>], iteration_bounds = array<i64: 1, 2>, scalar_prefetch = 0 : i64, scratch_operands = 0 : i64, tpu.core_type = #tpu.core_type<tc>, window_params = [{transform_indices = @transform_0, window_bounds = array<i64: 1, 32, 512>}, {transform_indices = @transform_1, window_bounds = array<i64: 9, 128, 128>}, {transform_indices = @transform_2, window_bounds = array<i64: 1, 128>}, {transform_indices = @transform_3, window_bounds = array<i64: 128, 128>}, {transform_indices = @transform_4, window_bounds = array<i64: 1, 128>}, {transform_indices = @transform_5, window_bounds = array<i64: 1, 128>}, {transform_indices = @transform_6, window_bounds = array<i64: 1, 128>}, {transform_indices = @transform_7, window_bounds = array<i64: 1, 20, 128>}]} {
    %cst = arith.constant 0.000000e+00 : f32
    %0 = vector.broadcast %cst : f32 to vector<20x128xf32>
    %c0 = arith.constant 0 : index
    %c0_0 = arith.constant 0 : index
    %c384 = arith.constant 384 : index
    %1 = vector.load %arg2[%c0, %c0_0, %c384] : memref<1x32x512xbf16, #tpu.memory_space<vmem>>, vector<1x20x128xbf16>
    %2 = vector.shape_cast %1 : vector<1x20x128xbf16> to vector<20x128xbf16>
    %c0_1 = arith.constant 0 : index
    %c0_2 = arith.constant 0 : index
    %c0_3 = arith.constant 0 : index
    %3 = vector.load %arg3[%c0_1, %c0_2, %c0_3] : memref<9x128x128xbf16, #tpu.memory_space<vmem>>, vector<1x128x128xbf16>
    %4 = vector.shape_cast %3 : vector<1x128x128xbf16> to vector<128x128xbf16>
    %cst_4 = arith.constant dense<0.000000e+00> : vector<20x128xf32>
    %5 = tpu.matmul %2, %4, %cst_4 {dimension_numbers = #tpu.dot_dimension_numbers<[1], [0], [0], [1], [0, 0, 1, 1], [], []>} : vector<20x128xbf16>, vector<128x128xbf16>, vector<20x128xf32> -> vector<20x128xf32>
    %6 = arith.addf %0, %5 : vector<20x128xf32>
    %c0_5 = arith.constant 0 : index
    %c1 = arith.constant 1 : index
    %c256 = arith.constant 256 : index
    %7 = vector.load %arg2[%c0_5, %c1, %c256] : memref<1x32x512xbf16, #tpu.memory_space<vmem>>, vector<1x20x128xbf16>
    %8 = vector.shape_cast %7 : vector<1x20x128xbf16> to vector<20x128xbf16>
    %c1_6 = arith.constant 1 : index
    %c0_7 = arith.constant 0 : index
    %c0_8 = arith.constant 0 : index
    %9 = vector.load %arg3[%c1_6, %c0_7, %c0_8] : memref<9x128x128xbf16, #tpu.memory_space<vmem>>, vector<1x128x128xbf16>
    %10 = vector.shape_cast %9 : vector<1x128x128xbf16> to vector<128x128xbf16>
    %cst_9 = arith.constant dense<0.000000e+00> : vector<20x128xf32>
    %11 = tpu.matmul %8, %10, %cst_9 {dimension_numbers = #tpu.dot_dimension_numbers<[1], [0], [0], [1], [0, 0, 1, 1], [], []>} : vector<20x128xbf16>, vector<128x128xbf16>, vector<20x128xf32> -> vector<20x128xf32>
    %12 = arith.addf %6, %11 : vector<20x128xf32>
    %c0_10 = arith.constant 0 : index
    %c1_11 = arith.constant 1 : index
    %c384_12 = arith.constant 384 : index
    %13 = vector.load %arg2[%c0_10, %c1_11, %c384_12] : memref<1x32x512xbf16, #tpu.memory_space<vmem>>, vector<1x20x128xbf16>
    %14 = vector.shape_cast %13 : vector<1x20x128xbf16> to vector<20x128xbf16>
    %c2 = arith.constant 2 : index
    %c0_13 = arith.constant 0 : index
    %c0_14 = arith.constant 0 : index
    %15 = vector.load %arg3[%c2, %c0_13, %c0_14] : memref<9x128x128xbf16, #tpu.memory_space<vmem>>, vector<1x128x128xbf16>
    %16 = vector.shape_cast %15 : vector<1x128x128xbf16> to vector<128x128xbf16>
    %cst_15 = arith.constant dense<0.000000e+00> : vector<20x128xf32>
    %17 = tpu.matmul %14, %16, %cst_15 {dimension_numbers = #tpu.dot_dimension_numbers<[1], [0], [0], [1], [0, 0, 1, 1], [], []>} : vector<20x128xbf16>, vector<128x128xbf16>, vector<20x128xf32> -> vector<20x128xf32>
    %18 = arith.addf %12, %17 : vector<20x128xf32>
    %c0_16 = arith.constant 0 : index
    %c5 = arith.constant 5 : index
    %c128 = arith.constant 128 : index
    %19 = vector.load %arg2[%c0_16, %c5, %c128] : memref<1x32x512xbf16, #tpu.memory_space<vmem>>, vector<1x20x128xbf16>
    %20 = vector.shape_cast %19 : vector<1x20x128xbf16> to vector<20x128xbf16>
    %c3 = arith.constant 3 : index
    %c0_17 = arith.constant 0 : index
    %c0_18 = arith.constant 0 : index
    %21 = vector.load %arg3[%c3, %c0_17, %c0_18] : memref<9x128x128xbf16, #tpu.memory_space<vmem>>, vector<1x128x128xbf16>
    %22 = vector.shape_cast %21 : vector<1x128x128xbf16> to vector<128x128xbf16>
    %cst_19 = arith.constant dense<0.000000e+00> : vector<20x128xf32>
    %23 = tpu.matmul %20, %22, %cst_19 {dimension_numbers = #tpu.dot_dimension_numbers<[1], [0], [0], [1], [0, 0, 1, 1], [], []>} : vector<20x128xbf16>, vector<128x128xbf16>, vector<20x128xf32> -> vector<20x128xf32>
    %24 = arith.addf %18, %23 : vector<20x128xf32>
    %c0_20 = arith.constant 0 : index
    %c5_21 = arith.constant 5 : index
    %c384_22 = arith.constant 384 : index
    %25 = vector.load %arg2[%c0_20, %c5_21, %c384_22] : memref<1x32x512xbf16, #tpu.memory_space<vmem>>, vector<1x20x128xbf16>
    %26 = vector.shape_cast %25 : vector<1x20x128xbf16> to vector<20x128xbf16>
    %c4 = arith.constant 4 : index
    %c0_23 = arith.constant 0 : index
    %c0_24 = arith.constant 0 : index
    %27 = vector.load %arg3[%c4, %c0_23, %c0_24] : memref<9x128x128xbf16, #tpu.memory_space<vmem>>, vector<1x128x128xbf16>
    %28 = vector.shape_cast %27 : vector<1x128x128xbf16> to vector<128x128xbf16>
    %cst_25 = arith.constant dense<0.000000e+00> : vector<20x128xf32>
    %29 = tpu.matmul %26, %28, %cst_25 {dimension_numbers = #tpu.dot_dimension_numbers<[1], [0], [0], [1], [0, 0, 1, 1], [], []>} : vector<20x128xbf16>, vector<128x128xbf16>, vector<20x128xf32> -> vector<20x128xf32>
    %30 = arith.addf %24, %29 : vector<20x128xf32>
    %c0_26 = arith.constant 0 : index
    %c6 = arith.constant 6 : index
    %c0_27 = arith.constant 0 : index
    %31 = vector.load %arg2[%c0_26, %c6, %c0_27] : memref<1x32x512xbf16, #tpu.memory_space<vmem>>, vector<1x20x128xbf16>
    %32 = vector.shape_cast %31 : vector<1x20x128xbf16> to vector<20x128xbf16>
    %c5_28 = arith.constant 5 : index
    %c0_29 = arith.constant 0 : index
    %c0_30 = arith.constant 0 : index
    %33 = vector.load %arg3[%c5_28, %c0_29, %c0_30] : memref<9x128x128xbf16, #tpu.memory_space<vmem>>, vector<1x128x128xbf16>
    %34 = vector.shape_cast %33 : vector<1x128x128xbf16> to vector<128x128xbf16>
    %cst_31 = arith.constant dense<0.000000e+00> : vector<20x128xf32>
    %35 = tpu.matmul %32, %34, %cst_31 {dimension_numbers = #tpu.dot_dimension_numbers<[1], [0], [0], [1], [0, 0, 1, 1], [], []>} : vector<20x128xbf16>, vector<128x128xbf16>, vector<20x128xf32> -> vector<20x128xf32>
    %36 = arith.addf %30, %35 : vector<20x128xf32>
    %c0_32 = arith.constant 0 : index
    %c6_33 = arith.constant 6 : index
    %c128_34 = arith.constant 128 : index
    %37 = vector.load %arg2[%c0_32, %c6_33, %c128_34] : memref<1x32x512xbf16, #tpu.memory_space<vmem>>, vector<1x20x128xbf16>
    %38 = vector.shape_cast %37 : vector<1x20x128xbf16> to vector<20x128xbf16>
    %c6_35 = arith.constant 6 : index
    %c0_36 = arith.constant 0 : index
    %c0_37 = arith.constant 0 : index
    %39 = vector.load %arg3[%c6_35, %c0_36, %c0_37] : memref<9x128x128xbf16, #tpu.memory_space<vmem>>, vector<1x128x128xbf16>
    %40 = vector.shape_cast %39 : vector<1x128x128xbf16> to vector<128x128xbf16>
    %cst_38 = arith.constant dense<0.000000e+00> : vector<20x128xf32>
    %41 = tpu.matmul %38, %40, %cst_38 {dimension_numbers = #tpu.dot_dimension_numbers<[1], [0], [0], [1], [0, 0, 1, 1], [], []>} : vector<20x128xbf16>, vector<128x128xbf16>, vector<20x128xf32> -> vector<20x128xf32>
    %42 = arith.addf %36, %41 : vector<20x128xf32>
    %c0_39 = arith.constant 0 : index
    %c6_40 = arith.constant 6 : index
    %c256_41 = arith.constant 256 : index
    %43 = vector.load %arg2[%c0_39, %c6_40, %c256_41] : memref<1x32x512xbf16, #tpu.memory_space<vmem>>, vector<1x20x128xbf16>
    %44 = vector.shape_cast %43 : vector<1x20x128xbf16> to vector<20x128xbf16>
    %c7 = arith.constant 7 : index
    %c0_42 = arith.constant 0 : index
    %c0_43 = arith.constant 0 : index
    %45 = vector.load %arg3[%c7, %c0_42, %c0_43] : memref<9x128x128xbf16, #tpu.memory_space<vmem>>, vector<1x128x128xbf16>
    %46 = vector.shape_cast %45 : vector<1x128x128xbf16> to vector<128x128xbf16>
    %cst_44 = arith.constant dense<0.000000e+00> : vector<20x128xf32>
    %47 = tpu.matmul %44, %46, %cst_44 {dimension_numbers = #tpu.dot_dimension_numbers<[1], [0], [0], [1], [0, 0, 1, 1], [], []>} : vector<20x128xbf16>, vector<128x128xbf16>, vector<20x128xf32> -> vector<20x128xf32>
    %48 = arith.addf %42, %47 : vector<20x128xf32>
    %c0_45 = arith.constant 0 : index
    %c6_46 = arith.constant 6 : index
    %c384_47 = arith.constant 384 : index
    %49 = vector.load %arg2[%c0_45, %c6_46, %c384_47] : memref<1x32x512xbf16, #tpu.memory_space<vmem>>, vector<1x20x128xbf16>
    %50 = vector.shape_cast %49 : vector<1x20x128xbf16> to vector<20x128xbf16>
    %c8 = arith.constant 8 : index
    %c0_48 = arith.constant 0 : index
    %c0_49 = arith.constant 0 : index
    %51 = vector.load %arg3[%c8, %c0_48, %c0_49] : memref<9x128x128xbf16, #tpu.memory_space<vmem>>, vector<1x128x128xbf16>
    %52 = vector.shape_cast %51 : vector<1x128x128xbf16> to vector<128x128xbf16>
    %cst_50 = arith.constant dense<0.000000e+00> : vector<20x128xf32>
    %53 = tpu.matmul %50, %52, %cst_50 {dimension_numbers = #tpu.dot_dimension_numbers<[1], [0], [0], [1], [0, 0, 1, 1], [], []>} : vector<20x128xbf16>, vector<128x128xbf16>, vector<20x128xf32> -> vector<20x128xf32>
    %54 = arith.addf %48, %53 : vector<20x128xf32>
    %55 = tpu.iota {dimensions = array<i32: 0>} : vector<20x1xi32>
    %c5_i32 = arith.constant 5 : i32
    %c0_i32 = arith.constant 0 : i32
    %56 = arith.cmpi eq, %c5_i32, %c0_i32 : i32
    %c1_i32 = arith.constant 1 : i32
    %57 = arith.select %56, %c1_i32, %c5_i32 : i32
    %58 = vector.broadcast %57 : i32 to vector<20x1xi32>
    %59 = arith.remsi %55, %58 : vector<20x1xi32>
    %c0_i32_51 = arith.constant 0 : i32
    %60 = vector.broadcast %c0_i32_51 : i32 to vector<20x1xi32>
    %61 = arith.cmpi ne, %59, %60 : vector<20x1xi32>
    %c0_i32_52 = arith.constant 0 : i32
    %62 = vector.broadcast %c0_i32_52 : i32 to vector<20x1xi32>
    %63 = arith.cmpi slt, %59, %62 : vector<20x1xi32>
    %c0_i32_53 = arith.constant 0 : i32
    %64 = arith.cmpi slt, %57, %c0_i32_53 : i32
    %65 = vector.broadcast %64 : i1 to vector<20x1xi1>
    %66 = vector.broadcast %65 : vector<20x1xi1> to vector<20x1xi1>
    %67 = arith.xori %63, %66 : vector<20x1xi1>
    %68 = arith.andi %67, %61 : vector<20x1xi1>
    %69 = vector.broadcast %57 : i32 to vector<20x1xi32>
    %70 = arith.addi %59, %69 : vector<20x1xi32>
    %71 = arith.select %68, %70, %59 : vector<20x1xi1>, vector<20x1xi32>
    %c4_i32 = arith.constant 4 : i32
    %72 = vector.broadcast %c4_i32 : i32 to vector<20x1xi32>
    %73 = arith.cmpi ne, %71, %72 : vector<20x1xi32>
    %c0_54 = arith.constant 0 : index
    %c0_55 = arith.constant 0 : index
    %74 = vector.load %arg4[%c0_54, %c0_55] : memref<1x128xf32, #tpu.memory_space<vmem>>, vector<1x128xf32>
    %75 = vector.broadcast %74 : vector<1x128xf32> to vector<20x128xf32>
    %76 = arith.addf %54, %75 : vector<20x128xf32>
    %cst_56 = arith.constant 0.000000e+00 : f32
    %77 = vector.broadcast %cst_56 : f32 to vector<20x128xf32>
    %78 = arith.maximumf %76, %77 : vector<20x128xf32>
    %c0_57 = arith.constant 0 : index
    %c0_58 = arith.constant 0 : index
    %79 = vector.load %arg5[%c0_57, %c0_58] : memref<128x128xbf16, #tpu.memory_space<vmem>>, vector<128x128xbf16>
    %cst_59 = arith.constant dense<0.000000e+00> : vector<20x128xf32>
    %80 = tpu.matmul %32, %79, %cst_59 {dimension_numbers = #tpu.dot_dimension_numbers<[1], [0], [0], [1], [0, 0, 1, 1], [], []>} : vector<20x128xbf16>, vector<128x128xbf16>, vector<20x128xf32> -> vector<20x128xf32>
    %81 = arith.addf %78, %80 : vector<20x128xf32>
    %c0_60 = arith.constant 0 : index
    %c0_61 = arith.constant 0 : index
    %82 = vector.load %arg6[%c0_60, %c0_61] : memref<1x128xf32, #tpu.memory_space<vmem>>, vector<1x128xf32>
    %83 = vector.broadcast %82 : vector<1x128xf32> to vector<20x128xf32>
    %84 = arith.addf %81, %83 : vector<20x128xf32>
    %85 = arith.extui %73 : vector<20x1xi1> to vector<20x1xi32>
    %86 = arith.sitofp %85 : vector<20x1xi32> to vector<20x1xf32>
    %87 = vector.broadcast %86 : vector<20x1xf32> to vector<20x128xf32>
    %88 = arith.mulf %84, %87 : vector<20x128xf32>
    %cst_62 = arith.constant dense<0.000000e+00> : vector<128xf32>
    %89 = vector.multi_reduction <add>, %88, %cst_62 [0] : vector<20x128xf32> to vector<128xf32>
    %90 = vector.shape_cast %89 : vector<128xf32> to vector<1x128xf32>
    %91 = arith.mulf %88, %84 : vector<20x128xf32>
    %cst_63 = arith.constant dense<0.000000e+00> : vector<128xf32>
    %92 = vector.multi_reduction <add>, %91, %cst_63 [0] : vector<20x128xf32> to vector<128xf32>
    %93 = vector.shape_cast %92 : vector<128xf32> to vector<1x128xf32>
    %cst_64 = arith.constant 6.250000e-02 : f32
    %94 = vector.broadcast %cst_64 : f32 to vector<1x128xf32>
    %95 = arith.mulf %90, %94 : vector<1x128xf32>
    %cst_65 = arith.constant 6.250000e-02 : f32
    %96 = vector.broadcast %cst_65 : f32 to vector<1x128xf32>
    %97 = arith.mulf %93, %96 : vector<1x128xf32>
    %98 = arith.mulf %95, %95 : vector<1x128xf32>
    %99 = arith.subf %97, %98 : vector<1x128xf32>
    %c0_66 = arith.constant 0 : index
    %c0_67 = arith.constant 0 : index
    %100 = vector.load %arg7[%c0_66, %c0_67] : memref<1x128xf32, #tpu.memory_space<vmem>>, vector<1x128xf32>
    %cst_68 = arith.constant 9.99999974E-6 : f32
    %101 = vector.broadcast %cst_68 : f32 to vector<1x128xf32>
    %102 = arith.addf %99, %101 : vector<1x128xf32>
    %103 = math.rsqrt %102 : vector<1x128xf32>
    %104 = arith.mulf %100, %103 : vector<1x128xf32>
    %105 = vector.broadcast %104 : vector<1x128xf32> to vector<20x128xf32>
    %106 = arith.mulf %84, %105 : vector<20x128xf32>
    %c0_69 = arith.constant 0 : index
    %c0_70 = arith.constant 0 : index
    %107 = vector.load %arg8[%c0_69, %c0_70] : memref<1x128xf32, #tpu.memory_space<vmem>>, vector<1x128xf32>
    %108 = arith.mulf %95, %104 : vector<1x128xf32>
    %109 = arith.subf %107, %108 : vector<1x128xf32>
    %110 = vector.broadcast %109 : vector<1x128xf32> to vector<20x128xf32>
    %111 = arith.addf %106, %110 : vector<20x128xf32>
    %112 = arith.truncf %111 : vector<20x128xf32> to vector<20x128xbf16>
    %c0_71 = arith.constant 0 : index
    %c0_72 = arith.constant 0 : index
    %c0_73 = arith.constant 0 : index
    %113 = vector.load %arg9[%c0_71, %c0_72, %c0_73] : memref<1x20x128xbf16, #tpu.memory_space<vmem>>, vector<1x20x128xbf16>
    %114 = vector.shape_cast %113 : vector<1x20x128xbf16> to vector<20x128xbf16>
    %115 = vector.shape_cast %112 : vector<20x128xbf16> to vector<1x20x128xbf16>
    tpu.vector_store %arg9[%c0_71, %c0_72, %c0_73], %115 {strides = array<i32>} : memref<1x20x128xbf16, #tpu.memory_space<vmem>>, vector<1x20x128xbf16>,
    return
  }
  func.func @transform_0(%arg0: i32, %arg1: i32) -> (i32, i32, i32) {
    %c0_i32 = arith.constant 0 : i32
    %c0_i32_0 = arith.constant 0 : i32
    %c0_i32_1 = arith.constant 0 : i32
    return %arg1, %c0_i32, %c0_i32_0 : i32, i32, i32
  }
  func.func @transform_1(%arg0: i32, %arg1: i32) -> (i32, i32, i32) {
    %c0_i32 = arith.constant 0 : i32
    %c0_i32_0 = arith.constant 0 : i32
    %c0_i32_1 = arith.constant 0 : i32
    return %c0_i32, %c0_i32_0, %arg0 : i32, i32, i32
  }
  func.func @transform_2(%arg0: i32, %arg1: i32) -> (i32, i32) {
    %c0_i32 = arith.constant 0 : i32
    %c0_i32_0 = arith.constant 0 : i32
    return %c0_i32, %arg0 : i32, i32
  }
  func.func @transform_3(%arg0: i32, %arg1: i32) -> (i32, i32) {
    %c0_i32 = arith.constant 0 : i32
    %c0_i32_0 = arith.constant 0 : i32
    return %c0_i32, %arg0 : i32, i32
  }
  func.func @transform_4(%arg0: i32, %arg1: i32) -> (i32, i32) {
    %c0_i32 = arith.constant 0 : i32
    %c0_i32_0 = arith.constant 0 : i32
    return %c0_i32, %arg0 : i32, i32
  }
  func.func @transform_5(%arg0: i32, %arg1: i32) -> (i32, i32) {
    %c0_i32 = arith.constant 0 : i32
    %c0_i32_0 = arith.constant 0 : i32
    return %c0_i32, %arg0 : i32, i32
  }
  func.func @transform_6(%arg0: i32, %arg1: i32) -> (i32, i32) {
    %c0_i32 = arith.constant 0 : i32
    %c0_i32_0 = arith.constant 0 : i32
    return %c0_i32, %arg0 : i32, i32
  }
  func.func @transform_7(%arg0: i32, %arg1: i32) -> (i32, i32, i32) {
    %c0_i32 = arith.constant 0 : i32
    %c0_i32_0 = arith.constant 0 : i32
    return %arg1, %c0_i32, %arg0 : i32, i32, i32
  }
}

module attributes {stable_mosaic.version = 11 : i64} {
  func.func @_down_block_head_kernel(%arg0: i32, %arg1: i32, %arg2: memref<1x16x512xbf16, #tpu.memory_space<vmem>>, %arg3: memref<9x128x128xbf16, #tpu.memory_space<vmem>>, %arg4: memref<1x128xf32, #tpu.memory_space<vmem>>, %arg5: memref<128x128xbf16, #tpu.memory_space<vmem>>, %arg6: memref<1x128xf32, #tpu.memory_space<vmem>>, %arg7: memref<1x128xf32, #tpu.memory_space<vmem>>, %arg8: memref<1x128xf32, #tpu.memory_space<vmem>>, %arg9: memref<128x128xbf16, #tpu.memory_space<vmem>>, %arg10: memref<1x128xf32, #tpu.memory_space<vmem>>, %arg11: memref<1x1x128xf32, #tpu.memory_space<vmem>>, %arg12: memref<1x128xf32, #tpu.memory_space<vmem>>) attributes {dimension_semantics = [#tpu.dimension_semantics<parallel>, #tpu.dimension_semantics<arbitrary>], iteration_bounds = array<i64: 2, 2>, scalar_prefetch = 0 : i64, scratch_operands = 1 : i64, tpu.core_type = #tpu.core_type<tc>, window_params = [{transform_indices = @transform_0, window_bounds = array<i64: 1, 16, 512>}, {transform_indices = @transform_1, window_bounds = array<i64: 9, 128, 128>}, {transform_indices = @transform_2, window_bounds = array<i64: 1, 128>}, {transform_indices = @transform_3, window_bounds = array<i64: 128, 128>}, {transform_indices = @transform_4, window_bounds = array<i64: 1, 128>}, {transform_indices = @transform_5, window_bounds = array<i64: 1, 128>}, {transform_indices = @transform_6, window_bounds = array<i64: 1, 128>}, {transform_indices = @transform_7, window_bounds = array<i64: 128, 128>}, {pipeline_mode = #tpu.pipeline_mode<synchronous>, transform_indices = @transform_8, window_bounds = array<i64: 1, 128>}, {transform_indices = @transform_9, window_bounds = array<i64: 1, 1, 128>}]} {
    %cst = arith.constant 0.000000e+00 : f32
    %0 = vector.broadcast %cst : f32 to vector<6x128xf32>
    %c0 = arith.constant 0 : index
    %c0_0 = arith.constant 0 : index
    %c384 = arith.constant 384 : index
    %1 = vector.load %arg2[%c0, %c0_0, %c384] : memref<1x16x512xbf16, #tpu.memory_space<vmem>>, vector<1x6x128xbf16>
    %2 = vector.shape_cast %1 : vector<1x6x128xbf16> to vector<6x128xbf16>
    %c0_1 = arith.constant 0 : index
    %c0_2 = arith.constant 0 : index
    %c0_3 = arith.constant 0 : index
    %3 = vector.load %arg3[%c0_1, %c0_2, %c0_3] : memref<9x128x128xbf16, #tpu.memory_space<vmem>>, vector<1x128x128xbf16>
    %4 = vector.shape_cast %3 : vector<1x128x128xbf16> to vector<128x128xbf16>
    %cst_4 = arith.constant dense<0.000000e+00> : vector<6x128xf32>
    %5 = tpu.matmul %2, %4, %cst_4 {dimension_numbers = #tpu.dot_dimension_numbers<[1], [0], [0], [1], [0, 0, 1, 1], [], []>} : vector<6x128xbf16>, vector<128x128xbf16>, vector<6x128xf32> -> vector<6x128xf32>
    %6 = arith.addf %0, %5 : vector<6x128xf32>
    %c0_5 = arith.constant 0 : index
    %c1 = arith.constant 1 : index
    %c256 = arith.constant 256 : index
    %7 = vector.load %arg2[%c0_5, %c1, %c256] : memref<1x16x512xbf16, #tpu.memory_space<vmem>>, vector<1x6x128xbf16>
    %8 = vector.shape_cast %7 : vector<1x6x128xbf16> to vector<6x128xbf16>
    %c1_6 = arith.constant 1 : index
    %c0_7 = arith.constant 0 : index
    %c0_8 = arith.constant 0 : index
    %9 = vector.load %arg3[%c1_6, %c0_7, %c0_8] : memref<9x128x128xbf16, #tpu.memory_space<vmem>>, vector<1x128x128xbf16>
    %10 = vector.shape_cast %9 : vector<1x128x128xbf16> to vector<128x128xbf16>
    %cst_9 = arith.constant dense<0.000000e+00> : vector<6x128xf32>
    %11 = tpu.matmul %8, %10, %cst_9 {dimension_numbers = #tpu.dot_dimension_numbers<[1], [0], [0], [1], [0, 0, 1, 1], [], []>} : vector<6x128xbf16>, vector<128x128xbf16>, vector<6x128xf32> -> vector<6x128xf32>
    %12 = arith.addf %6, %11 : vector<6x128xf32>
    %c0_10 = arith.constant 0 : index
    %c1_11 = arith.constant 1 : index
    %c384_12 = arith.constant 384 : index
    %13 = vector.load %arg2[%c0_10, %c1_11, %c384_12] : memref<1x16x512xbf16, #tpu.memory_space<vmem>>, vector<1x6x128xbf16>
    %14 = vector.shape_cast %13 : vector<1x6x128xbf16> to vector<6x128xbf16>
    %c2 = arith.constant 2 : index
    %c0_13 = arith.constant 0 : index
    %c0_14 = arith.constant 0 : index
    %15 = vector.load %arg3[%c2, %c0_13, %c0_14] : memref<9x128x128xbf16, #tpu.memory_space<vmem>>, vector<1x128x128xbf16>
    %16 = vector.shape_cast %15 : vector<1x128x128xbf16> to vector<128x128xbf16>
    %cst_15 = arith.constant dense<0.000000e+00> : vector<6x128xf32>
    %17 = tpu.matmul %14, %16, %cst_15 {dimension_numbers = #tpu.dot_dimension_numbers<[1], [0], [0], [1], [0, 0, 1, 1], [], []>} : vector<6x128xbf16>, vector<128x128xbf16>, vector<6x128xf32> -> vector<6x128xf32>
    %18 = arith.addf %12, %17 : vector<6x128xf32>
    %c0_16 = arith.constant 0 : index
    %c3 = arith.constant 3 : index
    %c128 = arith.constant 128 : index
    %19 = vector.load %arg2[%c0_16, %c3, %c128] : memref<1x16x512xbf16, #tpu.memory_space<vmem>>, vector<1x6x128xbf16>
    %20 = vector.shape_cast %19 : vector<1x6x128xbf16> to vector<6x128xbf16>
    %c3_17 = arith.constant 3 : index
    %c0_18 = arith.constant 0 : index
    %c0_19 = arith.constant 0 : index
    %21 = vector.load %arg3[%c3_17, %c0_18, %c0_19] : memref<9x128x128xbf16, #tpu.memory_space<vmem>>, vector<1x128x128xbf16>
    %22 = vector.shape_cast %21 : vector<1x128x128xbf16> to vector<128x128xbf16>
    %cst_20 = arith.constant dense<0.000000e+00> : vector<6x128xf32>
    %23 = tpu.matmul %20, %22, %cst_20 {dimension_numbers = #tpu.dot_dimension_numbers<[1], [0], [0], [1], [0, 0, 1, 1], [], []>} : vector<6x128xbf16>, vector<128x128xbf16>, vector<6x128xf32> -> vector<6x128xf32>
    %24 = arith.addf %18, %23 : vector<6x128xf32>
    %c0_21 = arith.constant 0 : index
    %c3_22 = arith.constant 3 : index
    %c384_23 = arith.constant 384 : index
    %25 = vector.load %arg2[%c0_21, %c3_22, %c384_23] : memref<1x16x512xbf16, #tpu.memory_space<vmem>>, vector<1x6x128xbf16>
    %26 = vector.shape_cast %25 : vector<1x6x128xbf16> to vector<6x128xbf16>
    %c4 = arith.constant 4 : index
    %c0_24 = arith.constant 0 : index
    %c0_25 = arith.constant 0 : index
    %27 = vector.load %arg3[%c4, %c0_24, %c0_25] : memref<9x128x128xbf16, #tpu.memory_space<vmem>>, vector<1x128x128xbf16>
    %28 = vector.shape_cast %27 : vector<1x128x128xbf16> to vector<128x128xbf16>
    %cst_26 = arith.constant dense<0.000000e+00> : vector<6x128xf32>
    %29 = tpu.matmul %26, %28, %cst_26 {dimension_numbers = #tpu.dot_dimension_numbers<[1], [0], [0], [1], [0, 0, 1, 1], [], []>} : vector<6x128xbf16>, vector<128x128xbf16>, vector<6x128xf32> -> vector<6x128xf32>
    %30 = arith.addf %24, %29 : vector<6x128xf32>
    %c0_27 = arith.constant 0 : index
    %c4_28 = arith.constant 4 : index
    %c0_29 = arith.constant 0 : index
    %31 = vector.load %arg2[%c0_27, %c4_28, %c0_29] : memref<1x16x512xbf16, #tpu.memory_space<vmem>>, vector<1x6x128xbf16>
    %32 = vector.shape_cast %31 : vector<1x6x128xbf16> to vector<6x128xbf16>
    %c5 = arith.constant 5 : index
    %c0_30 = arith.constant 0 : index
    %c0_31 = arith.constant 0 : index
    %33 = vector.load %arg3[%c5, %c0_30, %c0_31] : memref<9x128x128xbf16, #tpu.memory_space<vmem>>, vector<1x128x128xbf16>
    %34 = vector.shape_cast %33 : vector<1x128x128xbf16> to vector<128x128xbf16>
    %cst_32 = arith.constant dense<0.000000e+00> : vector<6x128xf32>
    %35 = tpu.matmul %32, %34, %cst_32 {dimension_numbers = #tpu.dot_dimension_numbers<[1], [0], [0], [1], [0, 0, 1, 1], [], []>} : vector<6x128xbf16>, vector<128x128xbf16>, vector<6x128xf32> -> vector<6x128xf32>
    %36 = arith.addf %30, %35 : vector<6x128xf32>
    %c0_33 = arith.constant 0 : index
    %c4_34 = arith.constant 4 : index
    %c128_35 = arith.constant 128 : index
    %37 = vector.load %arg2[%c0_33, %c4_34, %c128_35] : memref<1x16x512xbf16, #tpu.memory_space<vmem>>, vector<1x6x128xbf16>
    %38 = vector.shape_cast %37 : vector<1x6x128xbf16> to vector<6x128xbf16>
    %c6 = arith.constant 6 : index
    %c0_36 = arith.constant 0 : index
    %c0_37 = arith.constant 0 : index
    %39 = vector.load %arg3[%c6, %c0_36, %c0_37] : memref<9x128x128xbf16, #tpu.memory_space<vmem>>, vector<1x128x128xbf16>
    %40 = vector.shape_cast %39 : vector<1x128x128xbf16> to vector<128x128xbf16>
    %cst_38 = arith.constant dense<0.000000e+00> : vector<6x128xf32>
    %41 = tpu.matmul %38, %40, %cst_38 {dimension_numbers = #tpu.dot_dimension_numbers<[1], [0], [0], [1], [0, 0, 1, 1], [], []>} : vector<6x128xbf16>, vector<128x128xbf16>, vector<6x128xf32> -> vector<6x128xf32>
    %42 = arith.addf %36, %41 : vector<6x128xf32>
    %c0_39 = arith.constant 0 : index
    %c4_40 = arith.constant 4 : index
    %c256_41 = arith.constant 256 : index
    %43 = vector.load %arg2[%c0_39, %c4_40, %c256_41] : memref<1x16x512xbf16, #tpu.memory_space<vmem>>, vector<1x6x128xbf16>
    %44 = vector.shape_cast %43 : vector<1x6x128xbf16> to vector<6x128xbf16>
    %c7 = arith.constant 7 : index
    %c0_42 = arith.constant 0 : index
    %c0_43 = arith.constant 0 : index
    %45 = vector.load %arg3[%c7, %c0_42, %c0_43] : memref<9x128x128xbf16, #tpu.memory_space<vmem>>, vector<1x128x128xbf16>
    %46 = vector.shape_cast %45 : vector<1x128x128xbf16> to vector<128x128xbf16>
    %cst_44 = arith.constant dense<0.000000e+00> : vector<6x128xf32>
    %47 = tpu.matmul %44, %46, %cst_44 {dimension_numbers = #tpu.dot_dimension_numbers<[1], [0], [0], [1], [0, 0, 1, 1], [], []>} : vector<6x128xbf16>, vector<128x128xbf16>, vector<6x128xf32> -> vector<6x128xf32>
    %48 = arith.addf %42, %47 : vector<6x128xf32>
    %c0_45 = arith.constant 0 : index
    %c4_46 = arith.constant 4 : index
    %c384_47 = arith.constant 384 : index
    %49 = vector.load %arg2[%c0_45, %c4_46, %c384_47] : memref<1x16x512xbf16, #tpu.memory_space<vmem>>, vector<1x6x128xbf16>
    %50 = vector.shape_cast %49 : vector<1x6x128xbf16> to vector<6x128xbf16>
    %c8 = arith.constant 8 : index
    %c0_48 = arith.constant 0 : index
    %c0_49 = arith.constant 0 : index
    %51 = vector.load %arg3[%c8, %c0_48, %c0_49] : memref<9x128x128xbf16, #tpu.memory_space<vmem>>, vector<1x128x128xbf16>
    %52 = vector.shape_cast %51 : vector<1x128x128xbf16> to vector<128x128xbf16>
    %cst_50 = arith.constant dense<0.000000e+00> : vector<6x128xf32>
    %53 = tpu.matmul %50, %52, %cst_50 {dimension_numbers = #tpu.dot_dimension_numbers<[1], [0], [0], [1], [0, 0, 1, 1], [], []>} : vector<6x128xbf16>, vector<128x128xbf16>, vector<6x128xf32> -> vector<6x128xf32>
    %54 = arith.addf %48, %53 : vector<6x128xf32>
    %55 = tpu.iota {dimensions = array<i32: 0>} : vector<6x1xi32>
    %c3_i32 = arith.constant 3 : i32
    %c0_i32 = arith.constant 0 : i32
    %56 = arith.cmpi eq, %c3_i32, %c0_i32 : i32
    %c1_i32 = arith.constant 1 : i32
    %57 = arith.select %56, %c1_i32, %c3_i32 : i32
    %58 = vector.broadcast %57 : i32 to vector<6x1xi32>
    %59 = arith.remsi %55, %58 : vector<6x1xi32>
    %c0_i32_51 = arith.constant 0 : i32
    %60 = vector.broadcast %c0_i32_51 : i32 to vector<6x1xi32>
    %61 = arith.cmpi ne, %59, %60 : vector<6x1xi32>
    %c0_i32_52 = arith.constant 0 : i32
    %62 = vector.broadcast %c0_i32_52 : i32 to vector<6x1xi32>
    %63 = arith.cmpi slt, %59, %62 : vector<6x1xi32>
    %c0_i32_53 = arith.constant 0 : i32
    %64 = arith.cmpi slt, %57, %c0_i32_53 : i32
    %65 = vector.broadcast %64 : i1 to vector<6x1xi1>
    %66 = vector.broadcast %65 : vector<6x1xi1> to vector<6x1xi1>
    %67 = arith.xori %63, %66 : vector<6x1xi1>
    %68 = arith.andi %67, %61 : vector<6x1xi1>
    %69 = vector.broadcast %57 : i32 to vector<6x1xi32>
    %70 = arith.addi %59, %69 : vector<6x1xi32>
    %71 = arith.select %68, %70, %59 : vector<6x1xi1>, vector<6x1xi32>
    %c2_i32 = arith.constant 2 : i32
    %72 = vector.broadcast %c2_i32 : i32 to vector<6x1xi32>
    %73 = arith.cmpi ne, %71, %72 : vector<6x1xi32>
    %c0_54 = arith.constant 0 : index
    %c0_55 = arith.constant 0 : index
    %74 = vector.load %arg4[%c0_54, %c0_55] : memref<1x128xf32, #tpu.memory_space<vmem>>, vector<1x128xf32>
    %75 = vector.broadcast %74 : vector<1x128xf32> to vector<6x128xf32>
    %76 = arith.addf %54, %75 : vector<6x128xf32>
    %cst_56 = arith.constant 0.000000e+00 : f32
    %77 = vector.broadcast %cst_56 : f32 to vector<6x128xf32>
    %78 = arith.maximumf %76, %77 : vector<6x128xf32>
    %c0_57 = arith.constant 0 : index
    %c0_58 = arith.constant 0 : index
    %79 = vector.load %arg5[%c0_57, %c0_58] : memref<128x128xbf16, #tpu.memory_space<vmem>>, vector<128x128xbf16>
    %cst_59 = arith.constant dense<0.000000e+00> : vector<6x128xf32>
    %80 = tpu.matmul %32, %79, %cst_59 {dimension_numbers = #tpu.dot_dimension_numbers<[1], [0], [0], [1], [0, 0, 1, 1], [], []>} : vector<6x128xbf16>, vector<128x128xbf16>, vector<6x128xf32> -> vector<6x128xf32>
    %81 = arith.addf %78, %80 : vector<6x128xf32>
    %c0_60 = arith.constant 0 : index
    %c0_61 = arith.constant 0 : index
    %82 = vector.load %arg6[%c0_60, %c0_61] : memref<1x128xf32, #tpu.memory_space<vmem>>, vector<1x128xf32>
    %83 = vector.broadcast %82 : vector<1x128xf32> to vector<6x128xf32>
    %84 = arith.addf %81, %83 : vector<6x128xf32>
    %85 = arith.extui %73 : vector<6x1xi1> to vector<6x1xi32>
    %86 = arith.sitofp %85 : vector<6x1xi32> to vector<6x1xf32>
    %87 = vector.broadcast %86 : vector<6x1xf32> to vector<6x128xf32>
    %88 = arith.mulf %84, %87 : vector<6x128xf32>
    %cst_62 = arith.constant dense<0.000000e+00> : vector<128xf32>
    %89 = vector.multi_reduction <add>, %88, %cst_62 [0] : vector<6x128xf32> to vector<128xf32>
    %90 = vector.shape_cast %89 : vector<128xf32> to vector<1x128xf32>
    %91 = arith.mulf %88, %84 : vector<6x128xf32>
    %cst_63 = arith.constant dense<0.000000e+00> : vector<128xf32>
    %92 = vector.multi_reduction <add>, %91, %cst_63 [0] : vector<6x128xf32> to vector<128xf32>
    %93 = vector.shape_cast %92 : vector<128xf32> to vector<1x128xf32>
    %cst_64 = arith.constant 2.500000e-01 : f32
    %94 = vector.broadcast %cst_64 : f32 to vector<1x128xf32>
    %95 = arith.mulf %90, %94 : vector<1x128xf32>
    %cst_65 = arith.constant 2.500000e-01 : f32
    %96 = vector.broadcast %cst_65 : f32 to vector<1x128xf32>
    %97 = arith.mulf %93, %96 : vector<1x128xf32>
    %98 = arith.mulf %95, %95 : vector<1x128xf32>
    %99 = arith.subf %97, %98 : vector<1x128xf32>
    %c0_66 = arith.constant 0 : index
    %c0_67 = arith.constant 0 : index
    %100 = vector.load %arg7[%c0_66, %c0_67] : memref<1x128xf32, #tpu.memory_space<vmem>>, vector<1x128xf32>
    %cst_68 = arith.constant 9.99999974E-6 : f32
    %101 = vector.broadcast %cst_68 : f32 to vector<1x128xf32>
    %102 = arith.addf %99, %101 : vector<1x128xf32>
    %103 = math.rsqrt %102 : vector<1x128xf32>
    %104 = arith.mulf %100, %103 : vector<1x128xf32>
    %105 = vector.broadcast %104 : vector<1x128xf32> to vector<6x128xf32>
    %106 = arith.mulf %84, %105 : vector<6x128xf32>
    %c0_69 = arith.constant 0 : index
    %c0_70 = arith.constant 0 : index
    %107 = vector.load %arg8[%c0_69, %c0_70] : memref<1x128xf32, #tpu.memory_space<vmem>>, vector<1x128xf32>
    %108 = arith.mulf %95, %104 : vector<1x128xf32>
    %109 = arith.subf %107, %108 : vector<1x128xf32>
    %110 = vector.broadcast %109 : vector<1x128xf32> to vector<6x128xf32>
    %111 = arith.addf %106, %110 : vector<6x128xf32>
    %cst_71 = arith.constant -1.000000e+30 : f32
    %112 = vector.shape_cast %73 : vector<6x1xi1> to vector<6x1xi1>
    %113 = vector.broadcast %112 : vector<6x1xi1> to vector<6x128xi1>
    %114 = vector.broadcast %cst_71 : f32 to vector<6x128xf32>
    %115 = arith.select %113, %111, %114 : vector<6x128xi1>, vector<6x128xf32>
    %cst_72 = arith.constant dense<0xFF800000> : vector<128xf32>
    %116 = vector.multi_reduction <maximumf>, %115, %cst_72 [0] : vector<6x128xf32> to vector<128xf32>
    %117 = vector.shape_cast %116 : vector<128xf32> to vector<1x128xf32>
    %cst_73 = arith.constant 0.000000e+00 : f32
    %118 = vector.broadcast %cst_73 : f32 to vector<1x128xf32>
    %119 = arith.maximumf %117, %118 : vector<1x128xf32>
    %120 = arith.truncf %119 : vector<1x128xf32> to vector<1x128xbf16>
    %c0_74 = arith.constant 0 : index
    %c0_75 = arith.constant 0 : index
    %121 = vector.load %arg9[%c0_74, %c0_75] : memref<128x128xbf16, #tpu.memory_space<vmem>>, vector<128x128xbf16>
    %cst_76 = arith.constant dense<0.000000e+00> : vector<1x128xf32>
    %122 = tpu.matmul %120, %121, %cst_76 {dimension_numbers = #tpu.dot_dimension_numbers<[1], [0], [0], [1], [0, 0, 1, 1], [], []>} : vector<1x128xbf16>, vector<128x128xbf16>, vector<1x128xf32> -> vector<1x128xf32>
    %c0_i32_77 = arith.constant 0 : i32
    %123 = arith.cmpi eq, %arg1, %c0_i32_77 : i32
    %124 = arith.extui %123 : i1 to i32
    %c0_i32_78 = arith.constant 0 : i32
    %125 = arith.cmpi ne, %124, %c0_i32_78 : i32
    scf.if %125 {
      %c0_85 = arith.constant 0 : index
      %c0_86 = arith.constant 0 : index
      %132 = vector.load %arg10[%c0_85, %c0_86] : memref<1x128xf32, #tpu.memory_space<vmem>>, vector<1x128xf32>
      %c0_87 = arith.constant 0 : index
      %c0_88 = arith.constant 0 : index
      %133 = vector.load %arg12[%c0_87, %c0_88] : memref<1x128xf32, #tpu.memory_space<vmem>>, vector<1x128xf32>
      tpu.vector_store %arg12[%c0_87, %c0_88], %132 {strides = array<i32>} : memref<1x128xf32, #tpu.memory_space<vmem>>, vector<1x128xf32>,
    } else {
    }
    %c0_79 = arith.constant 0 : index
    %c0_80 = arith.constant 0 : index
    %126 = vector.load %arg12[%c0_79, %c0_80] : memref<1x128xf32, #tpu.memory_space<vmem>>, vector<1x128xf32>
    %127 = arith.addf %126, %122 : vector<1x128xf32>
    %c0_81 = arith.constant 0 : index
    %c0_82 = arith.constant 0 : index
    %128 = vector.load %arg12[%c0_81, %c0_82] : memref<1x128xf32, #tpu.memory_space<vmem>>, vector<1x128xf32>
    tpu.vector_store %arg12[%c0_81, %c0_82], %127 {strides = array<i32>} : memref<1x128xf32, #tpu.memory_space<vmem>>, vector<1x128xf32>,
    %c1_i32_83 = arith.constant 1 : i32
    %129 = arith.cmpi eq, %arg1, %c1_i32_83 : i32
    %130 = arith.extui %129 : i1 to i32
    %c0_i32_84 = arith.constant 0 : i32
    %131 = arith.cmpi ne, %130, %c0_i32_84 : i32
    scf.if %131 {
      %c0_85 = arith.constant 0 : index
      %c0_86 = arith.constant 0 : index
      %132 = vector.load %arg12[%c0_85, %c0_86] : memref<1x128xf32, #tpu.memory_space<vmem>>, vector<1x128xf32>
      %c0_87 = arith.constant 0 : index
      %c0_88 = arith.constant 0 : index
      %c0_89 = arith.constant 0 : index
      %133 = vector.load %arg11[%c0_87, %c0_88, %c0_89] : memref<1x1x128xf32, #tpu.memory_space<vmem>>, vector<1x1x128xf32>
      %134 = vector.shape_cast %133 : vector<1x1x128xf32> to vector<1x128xf32>
      %135 = vector.shape_cast %132 : vector<1x128xf32> to vector<1x1x128xf32>
      tpu.vector_store %arg11[%c0_87, %c0_88, %c0_89], %135 {strides = array<i32>} : memref<1x1x128xf32, #tpu.memory_space<vmem>>, vector<1x1x128xf32>,
    } else {
    }
    return
  }
  func.func @transform_0(%arg0: i32, %arg1: i32) -> (i32, i32, i32) {
    %c0_i32 = arith.constant 0 : i32
    %c0_i32_0 = arith.constant 0 : i32
    %c0_i32_1 = arith.constant 0 : i32
    return %arg0, %c0_i32, %c0_i32_0 : i32, i32, i32
  }
  func.func @transform_1(%arg0: i32, %arg1: i32) -> (i32, i32, i32) {
    %c0_i32 = arith.constant 0 : i32
    %c0_i32_0 = arith.constant 0 : i32
    %c0_i32_1 = arith.constant 0 : i32
    return %c0_i32, %c0_i32_0, %arg1 : i32, i32, i32
  }
  func.func @transform_2(%arg0: i32, %arg1: i32) -> (i32, i32) {
    %c0_i32 = arith.constant 0 : i32
    %c0_i32_0 = arith.constant 0 : i32
    return %c0_i32, %arg1 : i32, i32
  }
  func.func @transform_3(%arg0: i32, %arg1: i32) -> (i32, i32) {
    %c0_i32 = arith.constant 0 : i32
    %c0_i32_0 = arith.constant 0 : i32
    return %c0_i32, %arg1 : i32, i32
  }
  func.func @transform_4(%arg0: i32, %arg1: i32) -> (i32, i32) {
    %c0_i32 = arith.constant 0 : i32
    %c0_i32_0 = arith.constant 0 : i32
    return %c0_i32, %arg1 : i32, i32
  }
  func.func @transform_5(%arg0: i32, %arg1: i32) -> (i32, i32) {
    %c0_i32 = arith.constant 0 : i32
    %c0_i32_0 = arith.constant 0 : i32
    return %c0_i32, %arg1 : i32, i32
  }
  func.func @transform_6(%arg0: i32, %arg1: i32) -> (i32, i32) {
    %c0_i32 = arith.constant 0 : i32
    %c0_i32_0 = arith.constant 0 : i32
    return %c0_i32, %arg1 : i32, i32
  }
  func.func @transform_7(%arg0: i32, %arg1: i32) -> (i32, i32) {
    %c0_i32 = arith.constant 0 : i32
    %c0_i32_0 = arith.constant 0 : i32
    return %arg1, %c0_i32 : i32, i32
  }
  func.func @transform_8(%arg0: i32, %arg1: i32) -> (i32, i32) {
    %c0_i32 = arith.constant 0 : i32
    %c0_i32_0 = arith.constant 0 : i32
    %c0_i32_1 = arith.constant 0 : i32
    return %c0_i32, %c0_i32_0 : i32, i32
  }
  func.func @transform_9(%arg0: i32, %arg1: i32) -> (i32, i32, i32) {
    %c0_i32 = arith.constant 0 : i32
    %c0_i32_0 = arith.constant 0 : i32
    %c0_i32_1 = arith.constant 0 : i32
    return %arg0, %c0_i32, %c0_i32_0 : i32, i32, i32
  }
}

</mosaic_0001>

<bundles_post_ra>
// kernel: encoder_forward.3
= control target key start
LH: loop header
LB: loop body
LE: loop exit
PB: predicated region body
PF: predicated region fallthrough
CT: control target
= control target key end

     0   :  { %s1137_s24 = smov 0   ;;  %s1139_s25 = smov 0   ;;  %s1265_s0 = inlined_call_operand.vmem [shape: bf16[2,64,128], index: 0, kind: input, shape index: {}]   ;;  %s1266_s1 = inlined_call_operand.vmem [shape: bf16[1,128,128], index: 1, kind: input, shape index: {}]   ;;  %s1267_s2 = inlined_call_operand.vmem [shape: f32[1,128], index: 2, kind: input, shape index: {}]   ;;  %s1268_s3 = inlined_call_operand.vmem [shape: bf16[128,128], index: 3, kind: input, shape index: {}]   ;;  %s1269_s4 = inlined_call_operand.vmem [shape: f32[1,128], index: 4, kind: input, shape index: {}]   ;;  %s1270_s5 = inlined_call_operand.vmem [shape: f32[1,128], index: 5, kind: input, shape index: {}]   ;;  %s1271_s6 = inlined_call_operand.vmem [shape: f32[1,128], index: 6, kind: input, shape index: {}]   ;;  %s1272_s7 = inlined_call_operand.vmem [shape: bf16[2,64,128], index: 7, kind: output, shape index: {}]  }
   0x1   :  { %s1141_s26 = smov 0  }
   0x2 LB: > { %s26_s27 = sadd.s32 1, %s1091_s25  ;;  %p897_p0 = scmp.ge.s32.totalorder %s1095_s26, 1  ;;  %s1095_s26 = sphi %s1141_s26, %s17_s26   ;;  %s1091_s25 = sphi %s1139_s25, %s1274_s25   ;;  %s1087_s24 = sphi %s1137_s24, %s1273_s24  }
   0x3   : > { %p27_p1 = scmp.ge.s32.totalorder %s26_s27, 2  ;;  %p301_p2 = scmp.lt.s32.totalorder %s1095_s26, 3 }
   0x5   : > { %s1276_s27 = smov (%p27_p1, %s26_s27), 0  ;;  %p302_p3 = pnand %p897_p0, %p301_p2 }
   0x6   : > { %p356_p4 = scmp.lt.s32.totalorder (!%p302_p3), %s1087_s24, 1 }
   0x7   : > { %305 = sbr.rel (%p302_p3) target bundleno = 266 (0x10a), region = 48 }
   0xc   : > { %v997_v0 = vld [vmem:[%s1266_s1 + $0x38] sm:$0xff]  ;;  %v996_v2 = vld [vmem:[%s1266_s1 + $0x30] sm:$0xff]  ;;  %v995_v4 = vld [vmem:[%s1266_s1 + $0x28] sm:$0xff]  ;;  %s1278_s24 = smov (!%p356_p4, %s1087_s24), 1 }
   0xd   : > { %v1005_v1 = vld [vmem:[%s1268_s3 + $0x38] sm:$0xff]  ;;  %489 = vmatpush.bf16.msra.mxu0 %v997_v0  ;;  %1029 = vmatpush.bf16.msra.mxu2 %v997_v0  ;;  %v1004_v3 = vld [vmem:[%s1268_s3 + $0x30] sm:$0xff]  ;;  %v1003_v5 = vld [vmem:[%s1268_s3 + $0x28] sm:$0xff]  ;;  %s984_s14 = sshll.u32 %s1278_s24, 5 }
   0xe   : > { %590 = vmatpush.bf16.msra.mxu1 %v1005_v1  ;;  %1037 = vmatpush.bf16.msra.mxu3 %v1005_v1  ;;  %v994_v6 = vld [vmem:[%s1266_s1 + $0x20] sm:$0xff]  ;;  %v993_v8 = vld [vmem:[%s1266_s1 + $0x18] sm:$0xff]  ;;  %v992_v10 = vld [vmem:[%s1266_s1 + $0x10] sm:$0xff]  ;;  %s360_s19 = scalar_lea.vmem %s1265_s0, %s984_s14  ;;  %s388_s13 = scalar_lea.vmem %s1272_s7, %s984_s14 }
   0xf   : > { %v1002_v7 = vld [vmem:[%s1268_s3 + $0x20] sm:$0xff]  ;;  %v1001_v9 = vld [vmem:[%s1268_s3 + $0x18] sm:$0xff]  ;;  %v1000_v11 = vld [vmem:[%s1268_s3 + $0x10] sm:$0xff] }
  0x10   : > { %v991_v12 = vld [vmem:[%s1266_s1 + $0x8] sm:$0xff]  ;;  %v990_v14 = vld [vmem:[%s1266_s1] sm:$0xff]  ;;  %v988_v17 = vld [vmem:[%s360_s19 + $0x10] sm:$0xff] }
  0x11   : > { %490 = vmatpush.bf16.msra.mxu0 %v996_v2  ;;  %1030 = vmatpush.bf16.msra.mxu2 %v996_v2  ;;  %v999_v13 = vld [vmem:[%s1268_s3 + $0x8] sm:$0xff]  ;;  %v998_v15 = vld [vmem:[%s1268_s3] sm:$0xff]  ;;  %v989_v19 = vld [vmem:[%s360_s19 + $0x18] sm:$0xff] }
  0x12   : > { %591 = vmatpush.bf16.msra.mxu1 %v1004_v3  ;;  %1038 = vmatpush.bf16.msra.mxu3 %v1004_v3  ;;  %v986_v16 = vld [vmem:[%s360_s19] sm:$0xff]  ;;  %v987_v18 = vld [vmem:[%s360_s19 + $0x8] sm:$0xff] }
  0x13   : > { %v1069_v24 = vld [vmem:[%s1267_s2] ss:$0 sm:$0xff] }
  0x14   : > { %v1070_v40 = vld [vmem:[%s1269_s4] ss:$0 sm:$0xff] }
  0x15   : > { %491 = vmatpush.bf16.msra.mxu0 %v995_v4  ;;  %1031 = vmatpush.bf16.msra.mxu2 %v995_v4 }
  0x16   : > { %592 = vmatpush.bf16.msra.mxu1 %v1003_v5  ;;  %1039 = vmatpush.bf16.msra.mxu3 %v1003_v5 }
  0x19   : > { %492 = vmatpush.bf16.msra.mxu0 %v994_v6  ;;  %1032 = vmatpush.bf16.msra.mxu2 %v994_v6 }
  0x1a   : > { %593 = vmatpush.bf16.msra.mxu1 %v1002_v7  ;;  %1040 = vmatpush.bf16.msra.mxu3 %v1002_v7 }
  0x1d   : > { %493 = vmatpush.bf16.msra.mxu0 %v993_v8  ;;  %1033 = vmatpush.bf16.msra.mxu2 %v993_v8 }
  0x1e   : > { %594 = vmatpush.bf16.msra.mxu1 %v1001_v9  ;;  %1041 = vmatpush.bf16.msra.mxu3 %v1001_v9 }
  0x21   : > { %494 = vmatpush.bf16.msra.mxu0 %v992_v10  ;;  %1034 = vmatpush.bf16.msra.mxu2 %v992_v10 }
  0x22   : > { %595 = vmatpush.bf16.msra.mxu1 %v1000_v11  ;;  %1042 = vmatpush.bf16.msra.mxu3 %v1000_v11 }
  0x25   : > { %495 = vmatpush.bf16.msra.mxu0 %v991_v12  ;;  %1035 = vmatpush.bf16.msra.mxu2 %v991_v12 }
  0x26   : > { %596 = vmatpush.bf16.msra.mxu1 %v999_v13  ;;  %1043 = vmatpush.bf16.msra.mxu3 %v999_v13 }
  0x29   : > { %496 = vmatpush.bf16.msra.mxu0 %v990_v14  ;;  %1036 = vmatpush.bf16.msra.mxu2 %v990_v14 }
  0x2a   : > { %597 = vmatpush.bf16.msra.mxu1 %v998_v15  ;;  %1044 = vmatpush.bf16.msra.mxu3 %v998_v15 }
  0x2c   : > { %497 = vmatmul.bf16.vlgmr.msra.gmra.mxu0 %v986_v16  ;;  %507 = vmatmul.bf16.vlgmr.msra.gmra.mxu2 %v988_v17 }
  0x2d   : > { %598 = vmatmul.bf16.vlgmr.msra.gmra.mxu1 %v986_v16  ;;  %608 = vmatmul.bf16.vlgmr.msra.gmra.mxu3 %v988_v17 }
  0x3c   : > { %502 = vmatmul.bf16.gmra.mxu0 %v987_v18  ;;  %512 = vmatmul.bf16.gmra.mxu2 %v989_v19 }
  0x3d   : > { %603 = vmatmul.bf16.gmra.mxu1 %v987_v18  ;;  %613 = vmatmul.bf16.gmra.mxu3 %v989_v19 }
  0xa9   : > { %v498_v20 = vpop.f32.mrf.mxu0 }
  0xaa   : > { %v599_v21 = vpop.f32.mrf.mxu1  ;;  %v499_v28 = vadd.f32 %v1069_v24, %v498_v20 }
  0xac   : > { %v518_v32 = vmax.f32 %v499_v28, 0.0 }
  0xae   : > { %v619_v39 = vadd.f32 %v599_v21, %v518_v32 }
  0xaf   : > { %v508_v22 = vpop.f32.mrf.mxu2 }
  0xb0   : > { %v609_v23 = vpop.f32.mrf.mxu3  ;;  %v509_v35 = vadd.f32 %v1069_v24, %v508_v22  ;;  %v1223_v47 = vadd.f32 %v1070_v40, %v619_v39 }
  0xb1   : > { %v500_v25 = vpop.f32.mrf.mxu0 }
  0xb2   : > { %v601_v26 = vpop.f32.mrf.mxu1  ;;  %v501_v27 = vadd.f32 %v1069_v24, %v500_v25  ;;  %v522_v43 = vmax.f32 %v509_v35, 0.0  ;;  %v652_v57 = vmul.f32 %v1223_v47, %v1223_v47 }
  0xb4   : > { %v519_v29 = vmax.f32 %v501_v27, 0.0  ;;  %v623_v53 = vadd.f32 %v609_v23, %v522_v43 }
  0xb6   : > { %v620_v36 = vadd.f32 %v601_v26, %v519_v29  ;;  %v1235_v63 = vadd.f32 %v1070_v40, %v623_v53  ;;  %v677_v53 = vld [vmem:[%s1270_s5] sm:$0x1] }
  0xb7   : > { %v510_v30 = vpop.f32.mrf.mxu2 }
  0xb8   : > { %v611_v31 = vpop.f32.mrf.mxu3  ;;  %v511_v41 = vadd.f32 %v1069_v24, %v510_v30  ;;  %v1221_v44 = vadd.f32 %v1070_v40, %v620_v36  ;;  %v656_v11 = vmul.f32 %v1235_v63, %v1235_v63 }
  0xb9   : > { %v503_v33 = vpop.f32.mrf.mxu0 }
  0xba   : > { %v504_v34 = vadd.f32 %v1069_v24, %v503_v33  ;;  %v604_v37 = vpop.f32.mrf.mxu1  ;;  %v523_v48 = vmax.f32 %v511_v41, 0.0  ;;  %v653_v54 = vmul.f32 %v1221_v44, %v1221_v44  ;;  %v639_v60 = vadd.f32 %v1221_v44, %v1223_v47 }
  0xbc   : > { %v520_v38 = vmax.f32 %v504_v34, 0.0  ;;  %v624_v58 = vadd.f32 %v611_v31, %v523_v48  ;;  %v660_v0 = vadd.f32 %v653_v54, %v652_v57 }
  0xbe   : > { %v621_v42 = vadd.f32 %v604_v37, %v520_v38  ;;  %v636_v6 = vadd.f32 %v1070_v40, %v624_v58 }
  0xbf   : > { %v513_v45 = vpop.f32.mrf.mxu2 }
  0xc0   : > { %v514_v46 = vadd.f32 %v1069_v24, %v513_v45  ;;  %v614_v49 = vpop.f32.mrf.mxu3  ;;  %v1225_v51 = vadd.f32 %v1070_v40, %v621_v42  ;;  %v657_v17 = vmul.f32 %v636_v6, %v636_v6 }
  0xc1   : > { %v505_v50 = vpop.f32.mrf.mxu0 }
  0xc2   : > { %v506_v52 = vadd.f32 %v1069_v24, %v505_v50  ;;  %v524_v55 = vmax.f32 %v514_v46, 0.0  ;;  %v606_v59 = vpop.f32.mrf.mxu1  ;;  %v654_v61 = vmul.f32 %v1225_v51, %v1225_v51  ;;  %v640_v2 = vadd.f32 %v639_v60, %v1225_v51 }
  0xc4   : > { %v521_v56 = vmax.f32 %v506_v52, 0.0  ;;  %v625_v3 = vadd.f32 %v614_v49, %v524_v55  ;;  %v661_v7 = vadd.f32 %v660_v0, %v654_v61 }
  0xc6   : > { %v622_v62 = vadd.f32 %v606_v59, %v521_v56  ;;  %v637_v13 = vadd.f32 %v1070_v40, %v625_v3  ;;  %v701_v59 = vld [vmem:[%s1271_s6] sm:$0x1] }
  0xc7   : > { %v515_v1 = vpop.f32.mrf.mxu2 }
  0xc8   : > { %v634_v4 = vadd.f32 %v1070_v40, %v622_v62  ;;  %v516_v5 = vadd.f32 %v1069_v24, %v515_v1  ;;  %v616_v12 = vpop.f32.mrf.mxu3  ;;  %v658_v21 = vmul.f32 %v637_v13, %v637_v13 }
  0xca   : > { %v641_v8 = vadd.f32 %v640_v2, %v634_v4  ;;  %v655_v9 = vmul.f32 %v634_v4, %v634_v4  ;;  %v525_v10 = vmax.f32 %v516_v5, 0.0 }
  0xcc   : > { %v642_v14 = vadd.f32 %v641_v8, %v1235_v63  ;;  %v662_v15 = vadd.f32 %v661_v7, %v655_v9  ;;  %v626_v16 = vadd.f32 %v616_v12, %v525_v10 }
  0xce   : > { %v663_v18 = vadd.f32 %v662_v15, %v656_v11  ;;  %v638_v19 = vadd.f32 %v1070_v40, %v626_v16  ;;  %v643_v20 = vadd.f32 %v642_v14, %v636_v6 }
  0xd0   : > { %v644_v22 = vadd.f32 %v643_v20, %v637_v13  ;;  %v664_v23 = vadd.f32 %v663_v18, %v657_v17  ;;  %v659_v25 = vmul.f32 %v638_v19, %v638_v19 }
  0xd2   : > { %v645_v24 = vadd.f32 %v644_v22, %v638_v19  ;;  %v665_v26 = vadd.f32 %v664_v23, %v658_v21 }
  0xd4   : > { %v646_v27 = vrot.slane %v645_v24, 4  ;;  %v666_v28 = vadd.f32 %v665_v26, %v659_v25 }
  0xd6   : > { %v647_v29 = vadd.f32 %v646_v27, %v645_v24  ;;  %v667_v30 = vrot.slane %v666_v28, 4 }
  0xd8   : > { %v648_v31 = vrot.slane %v647_v29, 2  ;;  %v668_v32 = vadd.f32 %v667_v30, %v666_v28 }
  0xda   : > { %v649_v33 = vadd.f32 %v648_v31, %v647_v29  ;;  %v669_v34 = vrot.slane %v668_v32, 2 }
  0xdc   : > { %v650_v35 = vrot.slane %v649_v33, 1  ;;  %v670_v36 = vadd.f32 %v669_v34, %v668_v32 }
  0xde   : > { %v651_v37 = vadd.f32 %v650_v35, %v649_v33  ;;  %v671_v38 = vrot.slane %v670_v36, 1 }
  0xe0   : > { %v672_v39 = vadd.f32 %v671_v38, %v670_v36  ;;  %v673_v40 = vmul.f32 0.015625, %v651_v37 }
  0xe2   : > { %v674_v41 = vmul.f32 0.015625, %v672_v39  ;;  %v675_v42 = vmul.f32 %v673_v40, %v673_v40 }
  0xe4   : > { %v676_v43 = vsub.f32 %v674_v41, %v675_v42 }
  0xe6   : > { %v678_v45 = vadd.f32 1e-05, %v676_v43 }
  0xe8   : > { %1071 = vrsqrt.f32 %v678_v45  ;;  %vm685_vm1 = vweird.f32 %v678_v45 }
  0xee   : > { %v1072_v46 = vpop.eup %1071 }
  0xef   : > { %v680_v48 = vmul.f32 %v1072_v46, %v678_v45  ;;  %vm686_vm0 = vweird.f32 %v1072_v46 }
  0xf0   : > { %vm687_vm2 = vmor %vm685_vm1, %vm686_vm0 }
  0xf1   : > { %v681_v49 = vmul.f32 %v1072_v46, %v680_v48 }
  0xf3   : > { %v682_v50 = vmul.f32 0.5, %v681_v49 }
  0xf5   : > { %v683_v52 = vsub.f32 1.5, %v682_v50 }
  0xf7   : > { %v684_v54 = vmul.f32 %v1072_v46, %v683_v52 }
  0xf9   : > { %v688_v55 = vsel %vm687_vm2, %v1072_v46, %v684_v54 }
  0xfa   : > { %v689_v56 = vmul.f32 %v688_v55, %v677_v53 }
  0xfc   : > { %v702_v57 = vmul.f32 %v689_v56, %v673_v40  ;;  %v691_v58 = vperm.slane %v689_v56, 0 }
  0xfe   : > { %v703_v60 = vsub.f32 %v701_v59, %v702_v57  ;;  %v693_v61 = vmul.f32 %v691_v58, %v1223_v47  ;;  %v694_v62 = vmul.f32 %v691_v58, %v1221_v44  ;;  %v695_v0 = vmul.f32 %v691_v58, %v1225_v51 }
  0xff   : > { %v696_v1 = vmul.f32 %v691_v58, %v634_v4  ;;  %v697_v3 = vmul.f32 %v691_v58, %v1235_v63  ;;  %v698_v5 = vmul.f32 %v691_v58, %v636_v6  ;;  %v699_v7 = vmul.f32 %v691_v58, %v637_v13 }
 0x100   : > { %v705_v2 = vperm.slane %v703_v60, 0  ;;  %v700_v8 = vmul.f32 %v691_v58, %v638_v19 }
 0x102   : > { %v707_v9 = vadd.f32 %v705_v2, %v693_v61  ;;  %v708_v10 = vadd.f32 %v705_v2, %v694_v62  ;;  %v709_v11 = vadd.f32 %v705_v2, %v695_v0  ;;  %v710_v12 = vadd.f32 %v705_v2, %v696_v1 }
 0x103   : > { %v711_v47 = vadd.f32 %v705_v2, %v697_v3  ;;  %v712_v44 = vadd.f32 %v705_v2, %v698_v5  ;;  %v713_v14 = vadd.f32 %v705_v2, %v699_v7  ;;  %v714_v51 = vadd.f32 %v705_v2, %v700_v8 }
 0x104   : > { %v1009_v4 = vpack.c.bf16 %v708_v10, %v707_v9  ;;  %v1014_v15 = vpack.c.bf16 %v710_v12, %v709_v11 }
 0x105   : > { %v1019_v16 = vpack.c.bf16 %v712_v44, %v711_v47  ;;  %v1024_v63 = vpack.c.bf16 %v714_v51, %v713_v14 }
 0x106   : > { %1010 = vst [vmem:[%s388_s13] sm:$0xff] %v1009_v4  }
 0x107   : > { %1026 = vst [vmem:[%s388_s13 + $0x8] sm:$0xff] %v1014_v15  }
 0x108   : > { %1027 = vst [vmem:[%s388_s13 + $0x10] sm:$0xff] %v1019_v16  }
 0x109   : > { %1028 = vst [vmem:[%s388_s13 + $0x18] sm:$0xff] %v1024_v63  }
 0x10a PF: > { %s17_s26 = sadd.s32 1, %s1095_s26   ;;  %s1273_s24 = smov %s1091_s25 }
 0x10b   : > { %p14_p5 = scmp.ge.s32.totalorder %s17_s26, 4   ;;  %s1274_s25 = smov %s1276_s27 }
 0x10d   :  { %16 = sbr.rel (!%p14_p5) target bundleno = 2 (0x2), region = 96 }

// kernel: encoder_forward.4
= control target key start
LH: loop header
LB: loop body
LE: loop exit
PB: predicated region body
PF: predicated region fallthrough
CT: control target
= control target key end

     0   :  { %s2485_s24 = smov 0   ;;  %s2487_s25 = smov 0   ;;  %s2935_s0 = inlined_call_operand.vmem [shape: bf16[2,32,512], index: 0, kind: input, shape index: {}]   ;;  %s2936_s1 = inlined_call_operand.vmem [shape: bf16[9,128,128], index: 1, kind: input, shape index: {}]   ;;  %s2937_s2 = inlined_call_operand.vmem [shape: f32[1,128], index: 2, kind: input, shape index: {}]   ;;  %s2938_s3 = inlined_call_operand.vmem [shape: bf16[128,128], index: 3, kind: input, shape index: {}]   ;;  %s2939_s4 = inlined_call_operand.vmem [shape: f32[1,128], index: 4, kind: input, shape index: {}]   ;;  %s2940_s5 = inlined_call_operand.vmem [shape: f32[1,128], index: 5, kind: input, shape index: {}]   ;;  %s2941_s6 = inlined_call_operand.vmem [shape: f32[1,128], index: 6, kind: input, shape index: {}]   ;;  %s2942_s7 = inlined_call_operand.vmem [shape: bf16[2,20,128], index: 7, kind: output, shape index: {}]  }
   0x1   :  { %s2489_s26 = smov 0  }
   0x2 LB: > { %s26_s27 = sadd.s32 1, %s2437_s25  ;;  %p1789_p0 = scmp.ge.s32.totalorder %s2441_s26, 1  ;;  %s2441_s26 = sphi %s2489_s26, %s17_s26   ;;  %s2437_s25 = sphi %s2487_s25, %s2948_s25   ;;  %s2433_s24 = sphi %s2485_s24, %s2947_s24  }
   0x3   : > { %p27_p1 = scmp.ge.s32.totalorder %s26_s27, 2  ;;  %p301_p2 = scmp.lt.s32.totalorder %s2441_s26, 3 }
   0x5   : > { %s2950_s27 = smov (%p27_p1, %s26_s27), 0  ;;  %p302_p3 = pnand %p1789_p0, %p301_p2 }
   0x6   : > { %p356_p4 = scmp.lt.s32.totalorder (!%p302_p3), %s2433_s24, 1 }
   0x7   : > { %305 = sbr.rel (%p302_p3) target bundleno = 310 (0x136), region = 48 }
   0xc   : > { %v2296_v0 = vld [vmem:[%s2936_s1 + $0x78] sm:$0xff]  ;;  %v2295_v4 = vld [vmem:[%s2936_s1 + $0x70] sm:$0xff]  ;;  %s2952_s24 = smov (!%p356_p4, %s2433_s24), 1  ;;  %v2294_v8 = vld [vmem:[%s2936_s1 + $0x68] sm:$0xff]  ;;  %vm436_vm0 = vsmask.f32 7424 }
   0xd   : > { %v2287_v1 = vld [vmem:[%s2936_s1 + $0x38] sm:$0xff]  ;;  %502 = vmatpush.bf16.msra.mxu0 %v2296_v0  ;;  %v2286_v5 = vld [vmem:[%s2936_s1 + $0x30] sm:$0xff]  ;;  %s2278_s21 = sshll.u32 %s2952_s24, 6  ;;  %v2285_v9 = vld [vmem:[%s2936_s1 + $0x28] sm:$0xff]  ;;  %vm734_vm1 = vsmask.f32 5376 }
   0xe   : > { %v2304_v2 = vld [vmem:[%s2936_s1 + $0xb8] sm:$0xff]  ;;  %578 = vmatpush.bf16.msra.mxu1 %v2287_v1  ;;  %v2303_v6 = vld [vmem:[%s2936_s1 + $0xb0] sm:$0xff]  ;;  %v2302_v10 = vld [vmem:[%s2936_s1 + $0xa8] sm:$0xff]  ;;  %s2545_s13 = scalar_lea.vmem %s2935_s0, %s2278_s21  ;;  %vm973_vm2 = vcmask 1044480   ;;  %s2388_s12 = smul.u32 12, %s2952_s24 }
   0xf   : > { %v2313_v3 = vld [vmem:[%s2936_s1 + $0xf8] sm:$0xff]  ;;  %682 = vmatpush.bf16.msra.mxu2 %v2304_v2  ;;  %v2312_v7 = vld [vmem:[%s2936_s1 + $0xf0] sm:$0xff]  ;;  %v2311_v11 = vld [vmem:[%s2936_s1 + $0xe8] sm:$0xff] }
  0x10   : > { %802 = vmatpush.bf16.msra.mxu3 %v2313_v3  ;;  %v2293_v12 = vld [vmem:[%s2936_s1 + $0x60] sm:$0xff]  ;;  %v1811_v16 = vld [vmem:[%s2545_s13 + $0x8] sm:$0xf]  ;;  %v2288_v17 = vld [vmem:[%s2545_s13 + $0x14] sm:$0xf0]  ;;  %s388_s16 = scalar_lea.vmem %s2942_s7, %s2388_s12 }
  0x11   : > { %503 = vmatpush.bf16.msra.mxu0 %v2295_v4  ;;  %v2284_v13 = vld [vmem:[%s2936_s1 + $0x20] sm:$0xff]  ;;  %v410_v18 = vld [vmem:[%s2545_s13 + $0x28] sm:$0x7]  ;;  %v1847_v19 = vld [vmem:[%s2545_s13 + $0xc] sm:$0xf]  ;;  %v1812_v28 = vor.u32 %v2288_v17, %v1811_v16 }
  0x12   : > { %579 = vmatpush.bf16.msra.mxu1 %v2286_v5  ;;  %v2301_v14 = vld [vmem:[%s2936_s1 + $0xa0] sm:$0xff]  ;;  %v2279_v20 = vld [vmem:[%s2545_s13 + $0x18] sm:$0xf0]  ;;  %v596_v21 = vld [vmem:[%s2545_s13 + $0x2c] sm:$0x7]  ;;  %v433_v22 = vunpack.c.l.b16 %v410_v18 }
  0x13   : > { %683 = vmatpush.bf16.msra.mxu2 %v2303_v6  ;;  %v2310_v15 = vld [vmem:[%s2936_s1 + $0xe0] sm:$0xff]  ;;  %v2567_v24 = vld [vmem:[%s2545_s13 + $0x14] sm:$0xf]  ;;  %v2292_v26 = vld [vmem:[%s2936_s1 + $0x58] sm:$0xff]  ;;  %v2576_v29 = vor.u32 %v2279_v20, %v1847_v19  ;;  %v615_v30 = vunpack.c.l.b16 %v596_v21  ;;  %v440_v41 = vshll.u32 %v1812_v28, 16  ;;  %v438_v52 = vshrl.u32 %v1812_v28, 16 }
  0x14   : > { %803 = vmatpush.bf16.msra.mxu3 %v2312_v7  ;;  %v703_v23 = vld [vmem:[%s2545_s13 + $0x4] sm:$0xc]  ;;  %v2283_v27 = vld [vmem:[%s2936_s1 + $0x18] sm:$0xff]  ;;  %v2305_v31 = vld [vmem:[%s2545_s13 + $0x30] sm:$0x10]  ;;  %v729_v35 = vunpack.c.l.b16 %v2567_v24  ;;  %v2596_v40 = vpack.c.b16 %v433_v22, %v433_v22 }
  0x15   : > { %504 = vmatpush.bf16.msra.mxu0 %v2294_v8  ;;  %v1947_v25 = vld [vmem:[%s2545_s13 + $0x24] sm:$0xf]  ;;  %v728_v32 = vunpack.c.l.b16 %v703_v23  ;;  %v2300_v33 = vld [vmem:[%s2936_s1 + $0x98] sm:$0xff]  ;;  %v2291_v38 = vld [vmem:[%s2936_s1 + $0x50] sm:$0xff]  ;;  %v2598_v42 = vpack.c.b16 %v615_v30, %v615_v30  ;;  %v620_v43 = vshll.u32 %v2576_v29, 16  ;;  %v618_v53 = vshrl.u32 %v2576_v29, 16 }
  0x16   : > { %580 = vmatpush.bf16.msra.mxu1 %v2285_v9  ;;  %v2309_v34 = vld [vmem:[%s2936_s1 + $0xd8] sm:$0xff]  ;;  %v2586_v36 = vor.u32 %v2305_v31, %v1947_v25  ;;  %v2282_v39 = vld [vmem:[%s2936_s1 + $0x10] sm:$0xff]  ;;  %v2290_v50 = vld [vmem:[%s2936_s1 + $0x48] sm:$0xff]  ;;  %v442_v56 = vrot.slane %v440_v41, 1  ;;  %v445_v57 = vshll.u32 %v2596_v40, 16  ;;  %v449_v31 = vshrl.u32 %v2596_v40, 16 }
  0x17   : > { %684 = vmatpush.bf16.msra.mxu2 %v2302_v10  ;;  %v732_v37 = vpack.c.b16 %v729_v35, %v728_v32  ;;  %v2299_v44 = vld [vmem:[%s2936_s1 + $0x90] sm:$0xff]  ;;  %v2281_v51 = vld [vmem:[%s2936_s1 + $0x8] sm:$0xff]  ;;  %v622_v58 = vrot.slane %v620_v43, 1  ;;  %v625_v59 = vshll.u32 %v2598_v42, 16  ;;  %v2289_v0 = vld [vmem:[%s2936_s1 + $0x40] sm:$0xff] }
  0x18   : > { %804 = vmatpush.bf16.msra.mxu3 %v2311_v11  ;;  %v2308_v45 = vld [vmem:[%s2936_s1 + $0xd0] sm:$0xff]  ;;  %v744_v48 = vshrl.u32 %v2586_v36, 16  ;;  %v747_v49 = vshll.u32 %v2586_v36, 16  ;;  %v2298_v54 = vld [vmem:[%s2936_s1 + $0x88] sm:$0xff]  ;;  %v2280_v1 = vld [vmem:[%s2936_s1] sm:$0xff]  ;;  %v443_v2 = vor.u32 %v442_v56, %v438_v52  ;;  %v2630_v3 = vrot.slane %v445_v57, 1 }
  0x19   : > { %505 = vmatpush.bf16.msra.mxu0 %v2293_v12  ;;  %v736_v46 = vshrl.u32 %v732_v37, 16  ;;  %v739_v47 = vshll.u32 %v732_v37, 16  ;;  %v2307_v55 = vld [vmem:[%s2936_s1 + $0xc8] sm:$0xff]  ;;  %v2297_v4 = vld [vmem:[%s2936_s1 + $0x80] sm:$0xff]  ;;  %v623_v6 = vor.u32 %v622_v58, %v618_v53  ;;  %v627_v7 = vrot.slane %v625_v59, 1  ;;  %v2322_v10 = vld [vmem:[%s2936_s1 + $0x138] sm:$0xff] }
  0x1a   : > { %581 = vmatpush.bf16.msra.mxu1 %v2284_v13  ;;  %v746_v62 = vrot.slane %v744_v48, 2  ;;  %v749_v63 = vrot.slane %v747_v49, 3  ;;  %v2306_v5 = vld [vmem:[%s2936_s1 + $0xc0] sm:$0xff]  ;;  %v2332_v11 = vld [vmem:[%s2936_s1 + $0x178] sm:$0xff]  ;;  %v448_v12 = vsel %vm436_vm0, %v443_v2, %v2630_v3  ;;  %v2321_v17 = vld [vmem:[%s2936_s1 + $0x130] sm:$0xff] }
  0x1b   : > { %685 = vmatpush.bf16.msra.mxu2 %v2301_v14  ;;  %v738_v60 = vrot.slane %v736_v46, 2  ;;  %v741_v61 = vrot.slane %v739_v47, 3  ;;  %v628_v13 = vsel %vm436_vm0, %v623_v6, %v627_v7  ;;  %v2350_v16 = vld [vmem:[%s2936_s1 + $0x1f8] sm:$0xff]  ;;  %v2331_v18 = vld [vmem:[%s2936_s1 + $0x170] sm:$0xff]  ;;  %v2320_v21 = vld [vmem:[%s2936_s1 + $0x128] sm:$0xff] }
  0x1c   : > { %805 = vmatpush.bf16.msra.mxu3 %v2310_v15  ;;  %v2638_v9 = vor.u32 %v749_v63, %v746_v62  ;;  %v2340_v15 = vld [vmem:[%s2936_s1 + $0x1b8] sm:$0xff]  ;;  %v2339_v19 = vld [vmem:[%s2936_s1 + $0x1b0] sm:$0xff]  ;;  %v2330_v22 = vld [vmem:[%s2936_s1 + $0x168] sm:$0xff] }
  0x1d   : > { %506 = vmatpush.bf16.msra.mxu0 %v2292_v26  ;;  %v742_v8 = vor.u32 %v741_v61, %v738_v60  ;;  %v2349_v20 = vld [vmem:[%s2936_s1 + $0x1f0] sm:$0xff]  ;;  %v391_v23 = vld [vmem:[%s2545_s13 + $0x2c] sm:$0x3]  ;;  %v823_v25 = vld [vmem:[%s2545_s13 + $0xc] sm:$0xc] }
  0x1e   : > { %582 = vmatpush.bf16.msra.mxu1 %v2283_v27  ;;  %v2679_v26 = vld [vmem:[%s2545_s13 + $0x1c] sm:$0xf]  ;;  %v2338_v27 = vld [vmem:[%s2936_s1 + $0x1a8] sm:$0xff]  ;;  %v2329_v30 = vld [vmem:[%s2936_s1 + $0x160] sm:$0xff]  ;;  %v525_v32 = vunpack.c.l.b16 %v391_v23 }
  0x1f   : > { %686 = vmatpush.bf16.msra.mxu2 %v2300_v33  ;;  %v751_v14 = vsel %vm734_vm1, %v742_v8, %v2638_v9  ;;  %v2348_v28 = vld [vmem:[%s2936_s1 + $0x1e8] sm:$0xff]  ;;  %v848_v33 = vunpack.c.l.b16 %v823_v25  ;;  %v2337_v37 = vld [vmem:[%s2936_s1 + $0x1a0] sm:$0xff]  ;;  %v2314_v43 = vld [vmem:[%s2545_s13 + $0x38] sm:$0x10] }
  0x20   : > { %806 = vmatpush.bf16.msra.mxu3 %v2309_v34  ;;  %v849_v34 = vunpack.c.l.b16 %v2679_v26  ;;  %v1999_v41 = vld [vmem:[%s2545_s13 + $0x2c] sm:$0xf]  ;;  %v2318_v40 = vld [vmem:[%s2936_s1 + $0x118] sm:$0xff]  ;;  %v1048_v49 = vld [vmem:[%s2545_s13 + $0x4] sm:$0x8] }
  0x21   : > { %507 = vmatpush.bf16.msra.mxu0 %v2291_v38  ;;  %v629_v38 = vshrl.u32 %v2598_v42, 16  ;;  %v451_v42 = vor.u32 %v449_v31, %v2630_v3  ;;  %v2713_v48 = vor.u32 %v2314_v43, %v1999_v41  ;;  %v2317_v52 = vld [vmem:[%s2936_s1 + $0x110] sm:$0xff]  ;;  %v1067_v58 = vunpack.c.l.b16 %v1048_v49  ;;  %v2316_v59 = vld [vmem:[%s2936_s1 + $0x108] sm:$0xff]  ;;  %v2051_v63 = vld [vmem:[%s2545_s13] sm:$0x8] }
  0x22   : > { %583 = vmatpush.bf16.msra.mxu1 %v2282_v39  ;;  %v2347_v39 = vld [vmem:[%s2936_s1 + $0x1e0] sm:$0xff]  ;;  %v852_v46 = vpack.c.b16 %v849_v34, %v848_v33  ;;  %v2327_v53 = vld [vmem:[%s2936_s1 + $0x150] sm:$0xff]  ;;  %v2326_v60 = vld [vmem:[%s2936_s1 + $0x148] sm:$0xff] }
  0x23   : > { %687 = vmatpush.bf16.msra.mxu2 %v2299_v44  ;;  %v2328_v44 = vld [vmem:[%s2936_s1 + $0x158] sm:$0xff]  ;;  %v631_v47 = vor.u32 %v629_v38, %v627_v7  ;;  %v863_v61 = vshrl.u32 %v2713_v48, 16  ;;  %v866_v62 = vshll.u32 %v2713_v48, 16  ;;  %v2324_v2 = vld [vmem:[%s2545_s13 + $0x2c] sm:$0x10]  ;;  %v2315_v24 = vld [vmem:[%s2936_s1 + $0x100] sm:$0xff] }
  0x24   : > { %807 = vmatpush.bf16.msra.mxu3 %v2308_v45  ;;  %v527_v45 = vpack.c.b16 %v525_v32, %v525_v32  ;;  %v855_v56 = vshrl.u32 %v852_v46, 16  ;;  %v858_v57 = vshll.u32 %v852_v46, 16  ;;  %v2155_v3 = vld [vmem:[%s2545_s13 + $0x8] sm:$0x8]  ;;  %v2342_v6 = vld [vmem:[%s2545_s13 + $0x34] sm:$0x10] }
  0x25   : > { %508 = vmatpush.bf16.msra.mxu0 %v2290_v50  ;;  %v2336_v50 = vld [vmem:[%s2936_s1 + $0x198] sm:$0xff]  ;;  %v2356_v41 = vld [vmem:[%s2936_s1 + $0x228] sm:$0xff]  ;;  %v2353_v46 = vld [vmem:[%s2936_s1 + $0x210] sm:$0xff] }
  0x26   : > { %584 = vmatpush.bf16.msra.mxu1 %v2281_v51  ;;  %v2346_v51 = vld [vmem:[%s2936_s1 + $0x1d8] sm:$0xff]  ;;  %v857_v7 = vrot.slane %v855_v56, 2  ;;  %v860_v8 = vrot.slane %v858_v57, 3  ;;  %v2364_v43 = vld [vmem:[%s2938_s3 + $0x28] sm:$0xff]  ;;  %v1270_v57 = vrot.slane %v2713_v48, 3 }
  0x27   : > { %688 = vmatpush.bf16.msra.mxu2 %v2298_v54  ;;  %v2335_v54 = vld [vmem:[%s2936_s1 + $0x190] sm:$0xff]  ;;  %v1248_v49 = vld [vmem:[%s2545_s13 + $0xc] sm:$0x8] }
  0x28   : > { %808 = vmatpush.bf16.msra.mxu3 %v2307_v55  ;;  %v2345_v55 = vld [vmem:[%s2936_s1 + $0x1d0] sm:$0xff] }
  0x29   : > { %509 = vmatpush.bf16.msra.mxu0 %v2289_v0  ;;  %v2323_v0 = vld [vmem:[%s2545_s13 + $0xc] sm:$0xf0] }
  0x2a   : > { %585 = vmatpush.bf16.msra.mxu1 %v2280_v1  ;;  %v2055_v1 = vld [vmem:[%s2545_s13 + $0x20] sm:$0xf] }
  0x2b   : > { %689 = vmatpush.bf16.msra.mxu2 %v2297_v4  ;;  %v2341_v4 = vld [vmem:[%s2545_s13 + $0x14] sm:$0xf0] }
  0x2c   : > { %809 = vmatpush.bf16.msra.mxu3 %v2306_v5  ;;  %510 = vmatmul.bf16.vlgmr.msra.gmra.mxu0 %v448_v12  ;;  %v2159_v5 = vld [vmem:[%s2545_s13 + $0x28] sm:$0xf]  ;;  %v2052_v12 = vor.u32 %v2323_v0, %v2051_v63 }
  0x2d   : > { %921 = vmatpush.bf16.msrb.mxu0 %v2322_v10  ;;  %586 = vmatmul.bf16.vlgmr.msra.gmra.mxu1 %v2576_v29  ;;  %v2319_v29 = vld [vmem:[%s2936_s1 + $0x120] sm:$0xff]  ;;  %v865_v10 = vrot.slane %v863_v61, 2 }
  0x2e   : > { %1027 = vmatpush.bf16.msrb.mxu1 %v2332_v11  ;;  %690 = vmatmul.bf16.vlgmr.msra.gmra.mxu2 %v628_v13  ;;  %v868_v11 = vrot.slane %v866_v62, 3  ;;  %v2056_v13 = vor.u32 %v2324_v2, %v2055_v1  ;;  %v974_v23 = vrot.slane %v2052_v12, 3  ;;  %v1343_v62 = vlaneseq }
  0x2f   : > { %810 = vmatmul.bf16.vlgmr.msra.gmra.mxu3 %v751_v14  ;;  %1122 = vmatpush.bf16.msrb.mxu2 %v2340_v15  ;;  %v2334_v14 = vld [vmem:[%s2936_s1 + $0x188] sm:$0xff] }
  0x30   : > { %1227 = vmatpush.bf16.msrb.mxu3 %v2350_v16  ;;  %v2344_v15 = vld [vmem:[%s2936_s1 + $0x1c8] sm:$0xff]  ;;  %v2156_v16 = vor.u32 %v2341_v4, %v2155_v3  ;;  %v2771_v25 = vrot.slane %v2056_v13, 3  ;;  %v2858_v3 = vshrl.u32 %v1343_v62, 7 }
  0x31   : > { %922 = vmatpush.bf16.msrb.mxu0 %v2321_v17  ;;  %v2160_v17 = vor.u32 %v2342_v6, %v2159_v5 }
  0x32   : > { %1028 = vmatpush.bf16.msrb.mxu1 %v2331_v18  ;;  %v2783_v33 = vsel %vm973_vm2, %v974_v23, %v2771_v25  ;;  %v1350_v4 = vand.u32 65535, %v2858_v3  ;;  %v2862_v5 = vadd.s32 16, %v2858_v3 }
  0x33   : > { %1123 = vmatpush.bf16.msrb.mxu2 %v2339_v19  ;;  %v2358_v19 = vld [vmem:[%s2936_s1 + $0x238] sm:$0xff]  ;;  %v1175_v31 = vrot.slane %v2160_v17, 3 }
  0x34   : > { %1228 = vmatpush.bf16.msrb.mxu3 %v2349_v20  ;;  %v2366_v20 = vld [vmem:[%s2938_s3 + $0x38] sm:$0xff]  ;;  %v1408_v12 = vand.u32 65535, %v2862_v5  ;;  %v1409_v13 = vshrl.u32 %v2862_v5, 16 }
  0x35   : > { %923 = vmatpush.bf16.msrb.mxu0 %v2320_v21  ;;  %v861_v21 = vor.u32 %v860_v8, %v857_v7 }
  0x36   : > { %1029 = vmatpush.bf16.msrb.mxu1 %v2330_v22  ;;  %v869_v22 = vor.u32 %v868_v11, %v865_v10  ;;  %v1351_v10 = vshrl.u32 %v2858_v3, 16  ;;  %v1354_v11 = vmul.u32 52428, %v1350_v4 }
  0x37   : > { %1124 = vmatpush.bf16.msrb.mxu2 %v2338_v27  ;;  %v2333_v27 = vld [vmem:[%s2936_s1 + $0x180] sm:$0xff] }
  0x38   : > { %1229 = vmatpush.bf16.msrb.mxu3 %v2348_v28  ;;  %v2343_v28 = vld [vmem:[%s2936_s1 + $0x1c0] sm:$0xff]  ;;  %v870_v32 = vsel %vm734_vm1, %v861_v21, %v869_v22  ;;  %v2874_v17 = vmul.u32 52429, %v1351_v10 }
  0x39   : > { %924 = vmatpush.bf16.msrb.mxu0 %v2319_v29  ;;  %v1070_v29 = vrot.slane %v2586_v36, 3  ;;  %v2357_v36 = vld [vmem:[%s2936_s1 + $0x230] sm:$0xff] }
  0x3a   : > { %1030 = vmatpush.bf16.msrb.mxu1 %v2329_v30  ;;  %v1174_v30 = vrot.slane %v2156_v16, 3  ;;  %v1353_v16 = vmul.u32 52429, %v1350_v4 }
  0x3b   : > { %1125 = vmatpush.bf16.msrb.mxu2 %v2337_v37 }
  0x3c   : > { %1230 = vmatpush.bf16.msrb.mxu3 %v2347_v39  ;;  %515 = vmatmul.bf16.gmra.mxu0 %v451_v42  ;;  %v1176_v38 = vsel %vm973_vm2, %v1174_v30, %v1175_v31  ;;  %v2365_v39 = vld [vmem:[%s2938_s3 + $0x30] sm:$0xff]  ;;  %v2354_v42 = vld [vmem:[%s2936_s1 + $0x218] sm:$0xff] }
  0x3d   : > { %925 = vmatpush.bf16.msrb.mxu0 %v2318_v40  ;;  %591 = vmatmul.bf16.gmra.mxu1 %v527_v45  ;;  %v2355_v40 = vld [vmem:[%s2936_s1 + $0x220] sm:$0xff]  ;;  %v2362_v45 = vld [vmem:[%s2938_s3 + $0x18] sm:$0xff] }
  0x3e   : > { %1031 = vmatpush.bf16.msrb.mxu1 %v2328_v44  ;;  %695 = vmatmul.bf16.gmra.mxu2 %v631_v47  ;;  %v2363_v44 = vld [vmem:[%s2938_s3 + $0x20] sm:$0xff]  ;;  %v2361_v47 = vld [vmem:[%s2938_s3 + $0x10] sm:$0xff] }
  0x3f   : > { %815 = vmatmul.bf16.gmra.mxu3 %v2638_v9  ;;  %1126 = vmatpush.bf16.msrb.mxu2 %v2336_v50  ;;  %v1068_v9 = vpack.c.b16 %v729_v35, %v1067_v58  ;;  %v2325_v35 = vld [vmem:[%s2936_s1 + $0x140] sm:$0xff]  ;;  %v1267_v50 = vunpack.c.l.b16 %v1248_v49 }
  0x40   : > { %1231 = vmatpush.bf16.msrb.mxu3 %v2346_v51  ;;  %v2352_v51 = vld [vmem:[%s2936_s1 + $0x208] sm:$0xff] }
  0x41   : > { %926 = vmatpush.bf16.msrb.mxu0 %v2317_v52  ;;  %v1069_v18 = vrot.slane %v1068_v9, 3  ;;  %v2360_v52 = vld [vmem:[%s2938_s3 + $0x8] sm:$0xff] }
  0x42   : > { %1032 = vmatpush.bf16.msrb.mxu1 %v2327_v53  ;;  %v1268_v53 = vpack.c.b16 %v849_v34, %v1267_v50 }
  0x43   : > { %1127 = vmatpush.bf16.msrb.mxu2 %v2335_v54  ;;  %v1071_v37 = vsel %vm973_vm2, %v1069_v18, %v1070_v29  ;;  %v2351_v54 = vld [vmem:[%s2936_s1 + $0x200] sm:$0xff] }
  0x44   : > { %1232 = vmatpush.bf16.msrb.mxu3 %v2345_v55  ;;  %v2359_v55 = vld [vmem:[%s2938_s3] sm:$0xff]  ;;  %v1269_v56 = vrot.slane %v1268_v53, 3 }
  0x45   : > { %927 = vmatpush.bf16.msrb.mxu0 %v2316_v59 }
  0x46   : > { %1033 = vmatpush.bf16.msrb.mxu1 %v2326_v60  ;;  %v1271_v26 = vsel %vm973_vm2, %v1269_v56, %v1270_v57 }
  0x47   : > { %1128 = vmatpush.bf16.msrb.mxu2 %v2334_v14  ;;  %v2872_v14 = vadd.s32 8, %v2858_v3 }
  0x48   : > { %1233 = vmatpush.bf16.msrb.mxu3 %v2344_v15  ;;  %v1412_v15 = vmul.u32 52428, %v1408_v12 }
  0x49   : > { %928 = vmatpush.bf16.msrb.mxu0 %v2315_v24  ;;  %v1357_v24 = vshll.u32 %v1354_v11, 16  ;;  %v1380_v18 = vshrl.u32 %v2872_v14, 16 }
  0x4a   : > { %1034 = vmatpush.bf16.msrb.mxu1 %v2325_v35  ;;  %v1379_v35 = vand.u32 65535, %v2872_v14  ;;  %v1415_v21 = vshll.u32 %v1412_v15, 16  ;;  %v1416_v4 = vshrl.u32 %v1412_v15, 16 }
  0x4b   : > { %1129 = vmatpush.bf16.msrb.mxu2 %v2333_v27  ;;  %vm1361_vm3 = vc.u32 %v1353_v16, %v1357_v24 }
  0x4c   : > { %1234 = vmatpush.bf16.msrb.mxu3 %v2343_v28  ;;  %929 = vmatmul.bf16.vlgmr.msrb.gmra.mxu0 %v870_v32  ;;  %v1383_v27 = vmul.u32 52428, %v1379_v35  ;;  %v1384_v28 = vmul.u32 52429, %v1380_v18  ;;  %v1363_v32 = vadd.s32 %v1357_v24, %v1353_v16 }
  0x4d   : > { %1322 = vmatpush.bf16.msra.mxu0 %v2358_v19  ;;  %1035 = vmatmul.bf16.vlgmr.msrb.gmra.mxu1 %v2783_v33 }
  0x4e   : > { %1526 = vmatpush.bf16.msra.mxu1 %v2366_v20  ;;  %1130 = vmatmul.bf16.vlgmr.msrb.gmra.mxu2 %v1071_v37 }
  0x4f   : > { %2372 = vmatpush.bf16.msra.mxu2 %v2358_v19  ;;  %1235 = vmatmul.bf16.vlgmr.msrb.gmra.mxu3 %v1176_v38  ;;  %v1411_v19 = vmul.u32 52429, %v1408_v12  ;;  %v1386_v38 = vshll.u32 %v1383_v27, 16 }
  0x50   : > { %2380 = vmatpush.bf16.msra.mxu3 %v2366_v20  ;;  %v1413_v20 = vmul.u32 52429, %v1409_v13 }
  0x51   : > { %1323 = vmatpush.bf16.msra.mxu0 %v2357_v36  ;;  %vm1419_vm4 = vc.u32 %v1411_v19, %v1415_v21  ;;  %v1421_v37 = vadd.s32 %v1415_v21, %v1411_v19 }
  0x52   : > { %1527 = vmatpush.bf16.msra.mxu1 %v2365_v39  ;;  %v1418_v19 = vshrl.u32 %v1413_v20, 16 }
  0x53   : > { %2373 = vmatpush.bf16.msra.mxu2 %v2357_v36  ;;  %v1356_v36 = vmul.u32 52428, %v1351_v10 }
  0x54   : > { %2381 = vmatpush.bf16.msra.mxu3 %v2365_v39  ;;  %v1388_v39 = vshll.u32 %v1384_v28, 16 }
  0x55   : > { %1324 = vmatpush.bf16.msra.mxu0 %v2356_v41 }
  0x56   : > { %1528 = vmatpush.bf16.msra.mxu1 %v2364_v43 }
  0x57   : > { %2374 = vmatpush.bf16.msra.mxu2 %v2356_v41  ;;  %v2443_v41 = vmov 0  }
  0x58   : > { %2382 = vmatpush.bf16.msra.mxu3 %v2364_v43  ;;  %v1362_v43 = vsel %vm1361_vm3, 1, %v2443_v41 }
  0x59   : > { %1325 = vmatpush.bf16.msra.mxu0 %v2355_v40 }
  0x5a   : > { %1529 = vmatpush.bf16.msra.mxu1 %v2363_v44 }
  0x5b   : > { %2375 = vmatpush.bf16.msra.mxu2 %v2355_v40  ;;  %v1414_v40 = vmul.u32 52428, %v1409_v13  ;;  %v1360_v13 = vshrl.u32 %v2874_v17, 16 }
  0x5c   : > { %2383 = vmatpush.bf16.msra.mxu3 %v2363_v44  ;;  %934 = vmatmul.bf16.gmra.mxu0 %v869_v22  ;;  %v1420_v44 = vsel %vm1419_vm4, 1, %v2443_v41 }
  0x5d   : > { %1326 = vmatpush.bf16.msra.mxu0 %v2354_v42  ;;  %1040 = vmatmul.bf16.gmra.mxu1 %v2771_v25 }
  0x5e   : > { %1530 = vmatpush.bf16.msra.mxu1 %v2362_v45  ;;  %1135 = vmatmul.bf16.gmra.mxu2 %v1070_v29 }
  0x5f   : > { %2376 = vmatpush.bf16.msra.mxu2 %v2354_v42  ;;  %1240 = vmatmul.bf16.gmra.mxu3 %v1175_v31  ;;  %v1359_v31 = vshll.u32 %v2874_v17, 16  ;;  %v1385_v42 = vmul.u32 52428, %v1380_v18 }
  0x60   : > { %2384 = vmatpush.bf16.msra.mxu3 %v2362_v45 }
  0x61   : > { %1327 = vmatpush.bf16.msra.mxu0 %v2353_v46  ;;  %vm1365_vm6 = vc.u32 %v1363_v32, %v1359_v31 }
  0x62   : > { %1531 = vmatpush.bf16.msra.mxu1 %v2361_v47 }
  0x63   : > { %2377 = vmatpush.bf16.msra.mxu2 %v2353_v46 }
  0x64   : > { %2385 = vmatpush.bf16.msra.mxu3 %v2361_v47  ;;  %v1364_v47 = vadd.s32 %v1362_v43, %v1356_v36 }
  0x65   : > { %1328 = vmatpush.bf16.msra.mxu0 %v2352_v51 }
  0x66   : > { %1532 = vmatpush.bf16.msra.mxu1 %v2360_v52 }
  0x67   : > { %2378 = vmatpush.bf16.msra.mxu2 %v2352_v51  ;;  %v1366_v51 = vsel %vm1365_vm6, 1, %v2443_v41 }
  0x68   : > { %2386 = vmatpush.bf16.msra.mxu3 %v2360_v52  ;;  %v1422_v52 = vadd.s32 %v1420_v44, %v1414_v40  ;;  %v1368_v62 = vadd.s32 %v1366_v51, %v1364_v47 }
  0x69   : > { %1329 = vmatpush.bf16.msra.mxu0 %v2351_v54 }
  0x6a   : > { %1533 = vmatpush.bf16.msra.mxu1 %v2359_v55 }
  0x6b   : > { %2379 = vmatpush.bf16.msra.mxu2 %v2351_v54 }
  0x6c   : > { %2387 = vmatpush.bf16.msra.mxu3 %v2359_v55  ;;  %1330 = vmatmul.bf16.vlgmr.msra.gmra.mxu0 %v1271_v26  ;;  %v1358_v26 = vshrl.u32 %v1354_v11, 16  ;;  %v1389_v11 = vshrl.u32 %v1384_v28, 16 }
  0x6d   : > { %1534 = vmatmul.bf16.vlgmr.msra.gmra.mxu1 %v2783_v33  ;;  %v1417_v33 = vshll.u32 %v1413_v20, 16 }
  0x6e   : > { %1335 = vmatmul.bf16.vlgmr.msra.gmra.mxu2 %v1270_v57  ;;  %v1369_v16 = vadd.s32 %v1368_v62, %v1358_v26 }
  0x6f   : > { %1539 = vmatmul.bf16.vlgmr.msra.gmra.mxu3 %v2771_v25  ;;  %v1382_v25 = vmul.u32 52429, %v1379_v35  ;;  %vm1423_vm7 = vc.u32 %v1421_v37, %v1417_v33 }
  0x70   : > { %v1424_v55 = vsel %vm1423_vm7, 1, %v2443_v41  ;;  %v1370_v15 = vadd.s32 %v1369_v16, %v1360_v13  ;;  %v2416_v16 = vld [vmem:[%s2939_s4] ss:$0 sm:$0xff] }
  0x71   : > { %vm1390_vm5 = vc.u32 %v1382_v25, %v1386_v38  ;;  %v1392_v45 = vadd.s32 %v1386_v38, %v1382_v25 }
  0x72   : > { %v1391_v46 = vsel %vm1390_vm5, 1, %v2443_v41  ;;  %v1371_v20 = vshrl.u32 %v1370_v15, 2  ;;  %vm1564_vm5 = vcmask 1043456  }
  0x73   : > { %vm1394_vm8 = vc.u32 %v1392_v45, %v1388_v39  ;;  %v1393_v56 = vadd.s32 %v1391_v46, %v1385_v42  ;;  %v2415_v46 = vld [vmem:[%s2937_s2] ss:$0 sm:$0xff] }
  0x74   : > { %v1395_v57 = vsel %vm1394_vm8, 1, %v2443_v41 }
  0x75   : > { %v1397_v10 = vadd.s32 %v1395_v57, %v1393_v56 }
  0xa9   : > { %v2838_v34 = vpop.f32.mrf.mxu0 }
  0xaa   : > { %v2840_v58 = vpop.f32.mrf.mxu1 }
  0xab   : > { %v588_v12 = vadd.f32 %v2840_v58, %v2838_v34 }
  0xb1   : > { %v2842_v59 = vpop.f32.mrf.mxu2  ;;  %v2846_v48 = vpop.f32.mrf.mxu0 }
  0xb2   : > { %v2844_v60 = vpop.f32.mrf.mxu3  ;;  %v2848_v61 = vpop.f32.mrf.mxu1  ;;  %v700_v24 = vadd.f32 %v2842_v59, %v588_v12 }
  0xb3   : > { %v590_v17 = vadd.f32 %v2848_v61, %v2846_v48 }
  0xb9   : > { %v2850_v63 = vpop.f32.mrf.mxu2  ;;  %v2854_v1 = vpop.f32.mrf.mxu0 }
  0xba   : > { %v2852_v0 = vpop.f32.mrf.mxu3  ;;  %v2856_v2 = vpop.f32.mrf.mxu1  ;;  %v701_v33 = vadd.f32 %v2850_v63, %v590_v17 }
  0xbb   : > { %v593_v34 = vadd.f32 %v2856_v2, %v2854_v1  ;;  %v1372_v2 = vmul.u32 5, %v1371_v20 }
  0xbc   : > { %v821_v43 = vadd.f32 %v2852_v0, %v701_v33 }
  0xbd   : > { %v1373_v63 = vsub.s32 %v2858_v3, %v1372_v2 }
  0xbf   : > { %vm1434_vm9 = vcmp.ne.s32.totalorder %v1373_v63, 0  ;;  %vm1437_vm10 = vcmp.lt.s32.totalorder %v1373_v63, 0 }
  0xc0   : > { %vm2901_vm15 = vmand %vm1437_vm10, %vm1434_vm9 }
  0xc1   : > { %v2864_v6 = vpop.f32.mrf.mxu2  ;;  %v518_v8 = vpop.f32.mrf.mxu0 }
  0xc2   : > { %v2866_v7 = vpop.f32.mrf.mxu3  ;;  %v594_v9 = vpop.f32.mrf.mxu1  ;;  %v1426_v8 = vadd.s32 %v1424_v55, %v1422_v52  ;;  %v702_v32 = vadd.f32 %v2864_v6, %v593_v34 }
  0xc3   : > { %v1387_v9 = vshrl.u32 %v1383_v27, 16  ;;  %v820_v27 = vadd.f32 %v2844_v60, %v700_v24 }
  0xc4   : > { %v1427_v21 = vadd.s32 %v1426_v8, %v1416_v4  ;;  %v822_v1 = vadd.f32 %v2866_v7, %v702_v32 }
  0xc5   : > { %v1398_v25 = vadd.s32 %v1397_v10, %v1387_v9 }
  0xc6   : > { %v1428_v31 = vadd.s32 %v1427_v21, %v1418_v19 }
  0xc7   : > { %v1399_v58 = vadd.s32 %v1398_v25, %v1389_v11  ;;  %v2444_v25 = vmov 0.0  }
  0xc8   : > { %v1429_v38 = vshrl.u32 %v1428_v31, 2 }
  0xc9   : > { %v698_v22 = vpop.f32.mrf.mxu2  ;;  %v930_v29 = vpop.f32.mrf.mxu0  ;;  %v1400_v60 = vshrl.u32 %v1399_v58, 2 }
  0xca   : > { %v818_v23 = vpop.f32.mrf.mxu3  ;;  %v2878_v30 = vpop.f32.mrf.mxu1  ;;  %v939_v59 = vadd.f32 %v930_v29, %v820_v27  ;;  %v1430_v61 = vmul.u32 5, %v1429_v38 }
  0xcb   : > { %v1401_v6 = vmul.u32 5, %v1400_v60 }
  0xcc   : > { %v1045_v41 = vadd.f32 %v2878_v30, %v939_v59  ;;  %v1431_v30 = vsub.s32 %v2862_v5, %v1430_v61 }
  0xcd   : > { %v1402_v0 = vsub.s32 %v2872_v14, %v1401_v6 }
  0xce   : > { %vm1436_vm11 = vcmp.ne.s32.totalorder %v1431_v30, 0  ;;  %vm1439_vm12 = vcmp.lt.s32.totalorder %v1431_v30, 0  ;;  %v1445_v57 = vadd.s32 5, %v1431_v30 }
  0xcf   : > { %vm1435_vm13 = vcmp.ne.s32.totalorder %v1402_v0, 0  ;;  %vm1438_vm14 = vcmp.lt.s32.totalorder %v1402_v0, 0  ;;  %vm2905_vm0 = vmand %vm1439_vm12, %vm1436_vm11  ;;  %v1444_v26 = vadd.s32 5, %v1402_v0 }
  0xd0   : > { %vm1441_vm1 = vmand %vm1438_vm14, %vm1435_vm13  ;;  %v1448_v24 = vsel %vm2905_vm0, %v1445_v57, %v1431_v30 }
  0xd1   : > { %v1131_v49 = vpop.f32.mrf.mxu2  ;;  %v932_v53 = vpop.f32.mrf.mxu0  ;;  %v1447_v21 = vsel %vm1441_vm1, %v1444_v26, %v1402_v0  ;;  %vm1451_vm3 = vcmp.ne.s32.totalorder %v1448_v24, 4 }
  0xd2   : > { %v1236_v50 = vpop.f32.mrf.mxu3  ;;  %v1038_v54 = vpop.f32.mrf.mxu1  ;;  %v1140_v48 = vadd.f32 %v1131_v49, %v1045_v41  ;;  %v940_v40 = vadd.f32 %v932_v53, %v821_v43  ;;  %vm1450_vm4 = vcmp.ne.s32.totalorder %v1447_v21, 4  ;;  %v2275_v34 = vsel %vm1451_vm3, 1.0, %v2444_v25 }
  0xd3   : > { %v2274_v20 = vsel %vm1450_vm4, 1.0, %v2444_v25 }
  0xd4   : > { %v1245_v44 = vadd.f32 %v1236_v50, %v1140_v48  ;;  %v1046_v49 = vadd.f32 %v1038_v54, %v940_v40  ;;  %v1443_v50 = vadd.s32 5, %v1373_v63 }
  0xd6   : > { %v1446_v9 = vsel %vm2901_vm15, %v1443_v50, %v1373_v63 }
  0xd7   : > { %vm1449_vm2 = vcmp.ne.s32.totalorder %v1446_v9, 4 }
  0xd8   : > { %v2273_v15 = vsel %vm1449_vm2, 1.0, %v2444_v25 }
  0xd9   : > { %v1133_v35 = vpop.f32.mrf.mxu2  ;;  %v935_v22 = vpop.f32.mrf.mxu0 }
  0xda   : > { %v1238_v18 = vpop.f32.mrf.mxu3  ;;  %v1041_v23 = vpop.f32.mrf.mxu1  ;;  %v941_v29 = vadd.f32 %v935_v22, %v822_v1  ;;  %v1141_v53 = vadd.f32 %v1133_v35, %v1046_v49 }
  0xdc   : > { %v1047_v7 = vadd.f32 %v1041_v23, %v941_v29  ;;  %v1246_v62 = vadd.f32 %v1238_v18, %v1141_v53 }
  0xe1   : > { %v1136_v37 = vpop.f32.mrf.mxu2  ;;  %v937_v36 = vpop.f32.mrf.mxu0 }
  0xe2   : > { %v1241_v28 = vpop.f32.mrf.mxu3  ;;  %v1043_v39 = vpop.f32.mrf.mxu1  ;;  %v1142_v52 = vadd.f32 %v1136_v37, %v1047_v7 }
  0xe4   : > { %v1247_v14 = vadd.f32 %v1241_v28, %v1142_v52 }
  0xe9   : > { %v1138_v42 = vpop.f32.mrf.mxu2  ;;  %v1331_v47 = vpop.f32.mrf.mxu0 }
  0xea   : > { %v1243_v45 = vpop.f32.mrf.mxu3  ;;  %v1340_v51 = vadd.f32 %v1331_v47, %v1245_v44  ;;  %v1535_v55 = vpop.f32.mrf.mxu1 }
  0xec   : > { %v1456_v3 = vadd.f32 %v2415_v46, %v1340_v51 }
  0xee   : > { %v1459_v5 = vmax.f32 %v1456_v3, 0.0 }
  0xf0   : > { %v1544_v13 = vadd.f32 %v1535_v55, %v1459_v5 }
  0xf1   : > { %v1336_v4 = vpop.f32.mrf.mxu2  ;;  %v1333_v12 = vpop.f32.mrf.mxu0 }
  0xf2   : > { %v1540_v8 = vpop.f32.mrf.mxu3  ;;  %v1342_v10 = vadd.f32 %v1336_v4, %v1247_v14  ;;  %v1341_v35 = vadd.f32 %v1333_v12, %v1246_v62  ;;  %v1551_v23 = vadd.f32 %v2416_v16, %v1544_v13  ;;  %v1537_v31 = vpop.f32.mrf.mxu1  ;;  %v1589_v14 = vld [vmem:[%s2940_s5] sm:$0x1] }
  0xf3   : > { %v1608_v4 = vld [vmem:[%s2941_s6] sm:$0x1] }
  0xf4   : > { %v1458_v19 = vadd.f32 %v2415_v46, %v1342_v10  ;;  %v1457_v18 = vadd.f32 %v2415_v46, %v1341_v35  ;;  %v1560_v33 = vmul.f32 %v2273_v15, %v1551_v23 }
  0xf6   : > { %v1461_v22 = vmax.f32 %v1458_v19, 0.0  ;;  %v1460_v11 = vmax.f32 %v1457_v18, 0.0  ;;  %v1573_v39 = vmul.f32 %v1560_v33, %v1551_v23 }
  0xf8   : > { %v1546_v27 = vadd.f32 %v1540_v8, %v1461_v22  ;;  %v1545_v58 = vadd.f32 %v1537_v31, %v1460_v11 }
  0xf9   : > { %v1338_v17 = vpop.f32.mrf.mxu2 }
  0xfa   : > { %v1542_v59 = vpop.f32.mrf.mxu3  ;;  %v1553_v32 = vadd.f32 %v2416_v16, %v1546_v27  ;;  %v1552_v37 = vadd.f32 %v2416_v16, %v1545_v58 }
  0xfc   : > { %v1562_v28 = vmul.f32 %v2275_v34, %v1553_v32  ;;  %v1561_v38 = vmul.f32 %v2274_v20, %v1552_v37 }
  0xfe   : > { %v1575_v36 = vmul.f32 %v1562_v28, %v1553_v32  ;;  %v1563_v60 = vadd.f32 %v1561_v38, %v1560_v33  ;;  %v1574_v41 = vmul.f32 %v1561_v38, %v1552_v37  ;;  %v1565_v1 = vsel %vm1564_vm5, %v1562_v28, 0.0 }
 0x100   : > { %v1566_v2 = vadd.f32 %v1565_v1, %v1563_v60  ;;  %v1576_v43 = vadd.f32 %v1574_v41, %v1573_v39  ;;  %v1577_v48 = vsel %vm1564_vm5, %v1575_v36, 0.0 }
 0x102   : > { %v1567_v61 = vrot.slane %v1566_v2, 4  ;;  %v1578_v29 = vadd.f32 %v1577_v48, %v1576_v43 }
 0x104   : > { %v1568_v6 = vadd.f32 %v1567_v61, %v1566_v2  ;;  %v1579_v40 = vrot.slane %v1578_v29, 4 }
 0x106   : > { %v1569_v63 = vrot.slane %v1568_v6, 2  ;;  %v1580_v44 = vadd.f32 %v1579_v40, %v1578_v29 }
 0x108   : > { %v1570_v42 = vadd.f32 %v1569_v63, %v1568_v6  ;;  %v1581_v45 = vrot.slane %v1580_v44, 2 }
 0x10a   : > { %v1571_v46 = vrot.slane %v1570_v42, 1  ;;  %v1582_v30 = vadd.f32 %v1581_v45, %v1580_v44 }
 0x10c   : > { %v1572_v7 = vadd.f32 %v1571_v46, %v1570_v42  ;;  %v1583_v47 = vrot.slane %v1582_v30, 1 }
 0x10e   : > { %v1584_v0 = vadd.f32 %v1583_v47, %v1582_v30  ;;  %v1585_v49 = vmul.f32 0.0625, %v1572_v7 }
 0x110   : > { %v1586_v51 = vmul.f32 0.0625, %v1584_v0  ;;  %v1587_v52 = vmul.f32 %v1585_v49, %v1585_v49 }
 0x112   : > { %v1588_v53 = vsub.f32 %v1586_v51, %v1587_v52 }
 0x114   : > { %v1590_v3 = vadd.f32 1e-05, %v1588_v53 }
 0x116   : > { %2417 = vrsqrt.f32 %v1590_v3  ;;  %vm1597_vm7 = vweird.f32 %v1590_v3 }
 0x11c   : > { %v2418_v50 = vpop.eup %2417 }
 0x11d   : > { %v1592_v55 = vmul.f32 %v2418_v50, %v1590_v3  ;;  %vm1598_vm6 = vweird.f32 %v2418_v50 }
 0x11e   : > { %vm1599_vm8 = vmor %vm1597_vm7, %vm1598_vm6 }
 0x11f   : > { %v1593_v56 = vmul.f32 %v2418_v50, %v1592_v55 }
 0x121   : > { %v1594_v5 = vmul.f32 0.5, %v1593_v56 }
 0x123   : > { %v1595_v57 = vsub.f32 1.5, %v1594_v5 }
 0x125   : > { %v1596_v54 = vmul.f32 %v2418_v50, %v1595_v57 }
 0x127   : > { %v1600_v26 = vsel %vm1599_vm8, %v2418_v50, %v1596_v54 }
 0x128   : > { %v1601_v62 = vmul.f32 %v1600_v26, %v1589_v14 }
 0x12a   : > { %v1603_v8 = vperm.slane %v1601_v62, 0  ;;  %v1609_v9 = vmul.f32 %v1601_v62, %v1585_v49 }
 0x12c   : > { %v1610_v10 = vsub.f32 %v1608_v4, %v1609_v9  ;;  %v1605_v12 = vmul.f32 %v1603_v8, %v1551_v23  ;;  %v1606_v13 = vmul.f32 %v1603_v8, %v1552_v37  ;;  %v1607_v16 = vmul.f32 %v1603_v8, %v1553_v32 }
 0x12e   : > { %v1612_v24 = vperm.slane %v1610_v10, 0 }
 0x130   : > { %v1614_v35 = vadd.f32 %v1612_v24, %v1605_v12  ;;  %v1615_v19 = vadd.f32 %v1612_v24, %v1606_v13  ;;  %v1616_v21 = vadd.f32 %v1612_v24, %v1607_v16 }
 0x132   : > { %v1619_v18 = vpack.c.bf16 %v1616_v21, %v1616_v21  ;;  %v2370_v22 = vpack.c.bf16 %v1615_v19, %v1614_v35 }
 0x134   : > { %2371 = vst [vmem:[%s388_s16] sm:$0xff] %v2370_v22  }
 0x135   : > { %1622 = vst [vmem:[%s388_s16 + $0x8] sm:$0x3] %v1619_v18 }
 0x136 PF: > { %s17_s26 = sadd.s32 1, %s2441_s26   ;;  %s2947_s24 = smov %s2437_s25 }
 0x137   : > { %p14_p5 = scmp.ge.s32.totalorder %s17_s26, 4   ;;  %s2948_s25 = smov %s2950_s27 }
 0x139   :  { %16 = sbr.rel (!%p14_p5) target bundleno = 2 (0x2), region = 104 }

// kernel: encoder_forward.5
= control target key start
LH: loop header
LB: loop body
LE: loop exit
PB: predicated region body
PF: predicated region fallthrough
CT: control target
= control target key end

     0   :  { %s3920_s0 = inlined_call_operand.vmem [shape: bf16[2,16,512], index: 0, kind: input, shape index: {}]   ;;  %s3921_s1 = inlined_call_operand.vmem [shape: bf16[9,128,256], index: 1, kind: input, shape index: {}]   ;;  %s3922_s2 = inlined_call_operand.vmem [shape: f32[1,256], index: 2, kind: input, shape index: {}]   ;;  %s3923_s3 = inlined_call_operand.vmem [shape: bf16[128,256], index: 3, kind: input, shape index: {}]   ;;  %s3924_s4 = inlined_call_operand.vmem [shape: f32[1,256], index: 4, kind: input, shape index: {}]   ;;  %s3925_s5 = inlined_call_operand.vmem [shape: f32[1,256], index: 5, kind: input, shape index: {}]   ;;  %s3926_s6 = inlined_call_operand.vmem [shape: f32[1,256], index: 6, kind: input, shape index: {}]   ;;  %s3927_s7 = inlined_call_operand.vmem [shape: bf16[256,128], index: 7, kind: input, shape index: {}]   ;;  %s3928_s8 = inlined_call_operand.vmem [shape: f32[1,128], index: 8, kind: input, shape index: {}]   ;;  %s3929_s9 = inlined_call_operand.hbm [shape: f32[2,1,128], index: 9, kind: output, shape index: {}]  }
   0x1   :  { %3933 = sst [smem:[#allocation11_spill]] %s3920_s0 }
   0x2   :  { %3934 = sst [smem:[#allocation12_spill]] %s3921_s1 }
   0x3   :  { %3935 = sst [smem:[#allocation13_spill]] %s3922_s2 }
   0x4   :  { %14 = vsyncpa [#allocation6], 0 }
   0x5   :  { %16 = vsyncpa [#allocation6 + $0x1], 0  ;;  %s3268_s30 = smov 0   ;;  %s3270_s10 = smov 0  }
   0x6   :  { %s3272_s11 = smov 0   ;;  %s3274_s12 = smov 0  }
   0x7   :  { %s3276_s13 = smov 0   ;;  %s3278_s14 = smov 0  }
   0x8   :  { %s3280_s15 = smov 0   ;;  %s3282_s16 = smov 0  }
   0x9   :  { %s3284_s17 = smov 0   ;;  %s3286_s18 = smov 0  }
   0xa LB: > { %3936 = sst [smem:[#allocation8_spill]] %s3210_s17  ;;  %s2412_s19 = sadd.s32 4294967295, %s3214_s18   ;;  %s3214_s18 = sphi %s3286_s18, %s22_s18   ;;  %s3210_s17 = sphi %s3284_s17, %s3949_s17   ;;  %s3206_s16 = sphi %s3282_s16, %s3956_s16   ;;  %s3202_s15 = sphi %s3280_s15, %s3947_s15   ;;  %s3198_s14 = sphi %s3278_s14, %s3955_s14   ;;  %s3194_s13 = sphi %s3276_s13, %s3954_s13   ;;  %s3190_s12 = sphi %s3274_s12, %s3953_s12   ;;  %s3186_s11 = sphi %s3272_s11, %s3952_s11   ;;  %s3182_s10 = sphi %s3270_s10, %s3951_s10   ;;  %s3178_s30 = sphi %s3268_s30, %s3950_s30  }
   0xb   : > { %s2413_s20 = sadd.s32 4294967294, %s3214_s18   ;;  %s31_s21 = sadd.s32 1, %s3206_s16 }
   0xc   : > { %s34_s22 = sadd.s32 1, %s3210_s17  ;;  %p32_p0 = scmp.ge.s32.totalorder %s31_s21, 2 }
   0xd   : > { %s67_s23 = sadd.s32 1, %s3194_s13  ;;  %p74_p1 = scmp.ne.s32.totalorder %s3194_s13, %s3190_s12 }
   0xe   : > { %p75_p2 = scmp.eq.s32.totalorder %s3214_s18, 0  ;;  %s3958_s21 = smov (%p32_p0, %s31_s21), 0 }
   0xf   : > { %3937 = sst [smem:[#allocation9_spill]] %s3958_s21  ;;  %s3960_s22 = smov (!%p32_p0, %s34_s22), %s3210_s17 }
  0x10   : > { %s64_s24 = ssub.s32 %s3206_s16, %s3958_s21  ;;  %p3331_p3 = por %p75_p2, %p74_p1 }
  0x11   : > { %p36_p4 = scmp.ge.s32.totalorder %s3960_s22, 2  ;;  %p65_p5 = scmp.eq.s32.totalorder %s64_s24, 0 }
  0x12   : > { %s270_s26 = sadd.s32 1, %s3186_s11  ;;  %p280_p6 = scmp.ne.s32.totalorder %s3186_s11, %s3182_s10 }
  0x13   : > { %s3962_s22 = smov (%p36_p4, %s3960_s22), 0  ;;  %p281_p7 = scmp.eq.s32.totalorder %s2412_s19, 3 }
  0x14   : > { %3939 = sst [smem:[#allocation10_spill]] %s3962_s22  ;;  %s267_s28 = ssub.s32 %s3210_s17, %s3962_s22 }
  0x15   : > { %s3341_s27 = scalar_select %p65_p5, %s3194_s13, %s67_s23  }
  0x16   : > { %p268_p8 = scmp.eq.s32.totalorder %s267_s28, 0  ;;  %p286_p9 = scmp.ne.s32.totalorder %s3182_s10, %s3178_s30 }
  0x17   : > { %p3347_p10 = por %p281_p7, %p280_p6  ;;  %p287_p11 = scmp.eq.s32.totalorder %s2413_s20, 3 }
  0x18   : > { %s3352_s21 = scalar_select %p268_p8, %s3186_s11, %s270_s26  }
  0x19   : > { %p3354_p12 = por %p287_p11, %p286_p9  ;;  %p2415_p13 = scmp.ge.s32.totalorder %s3214_s18, 4 }
  0x1b   : > { %306 = sbr.rel (%p2415_p13) target bundleno = 206 (0xce), region = 20 }
  0x20   : > { %317 = sbr.rel (!%p3331_p3) target bundleno = 186 (0xba), region = 28  ;;  %s319_s19 = sand.u32 (%p3331_p3), 1, %s3194_s13  }
  0x21   : > { %s2416_s23 = sshll.u32 (%p3331_p3), %s3206_s16, 2  ;;  %s3009_s28 = smul.u32 (%p3331_p3), 576, %s319_s19 }
  0x22   : > { %s3942_s1 = sld [smem:[#allocation12_spill]] (%p3331_p3) }
  0x23   : > { %s3371_s26 = scalar_lea.vmem (%p3331_p3), [#allocation3], %s3009_s28 }
  0x28   : > { %s3366_s20 = scalar_lea.vmem %s3942_s1, %s2416_s23 }
  0x29   : > { %v340_v0 = vld [vmem:[%s3366_s20] sm:$0xf]  ;;  %v342_v1 = vld [vmem:[%s3366_s20 + $0x8] sm:$0xf]  ;;  %v344_v2 = vld [vmem:[%s3366_s20 + $0x10] sm:$0xf] }
  0x2a   : > { %341 = vst [vmem:[%s3371_s26] sm:$0xf] %v340_v0  ;;  %v346_v3 = vld [vmem:[%s3366_s20 + $0x18] sm:$0xf]  ;;  %v348_v4 = vld [vmem:[%s3366_s20 + $0x20] sm:$0xf] }
  0x2b   : > { %343 = vst [vmem:[%s3371_s26 + $0x4] sm:$0xf] %v342_v1  ;;  %v350_v5 = vld [vmem:[%s3366_s20 + $0x28] sm:$0xf]  ;;  %v352_v6 = vld [vmem:[%s3366_s20 + $0x30] sm:$0xf] }
  0x2c   : > { %345 = vst [vmem:[%s3371_s26 + $0x8] sm:$0xf] %v344_v2  ;;  %v354_v7 = vld [vmem:[%s3366_s20 + $0x38] sm:$0xf]  ;;  %v356_v8 = vld [vmem:[%s3366_s20 + $0x40] sm:$0xf] }
  0x2d   : > { %347 = vst [vmem:[%s3371_s26 + $0xc] sm:$0xf] %v346_v3  ;;  %v358_v9 = vld [vmem:[%s3366_s20 + $0x48] sm:$0xf]  ;;  %v360_v10 = vld [vmem:[%s3366_s20 + $0x50] sm:$0xf] }
  0x2e   : > { %349 = vst [vmem:[%s3371_s26 + $0x10] sm:$0xf] %v348_v4  ;;  %v362_v11 = vld [vmem:[%s3366_s20 + $0x58] sm:$0xf]  ;;  %v364_v12 = vld [vmem:[%s3366_s20 + $0x60] sm:$0xf] }
  0x2f   : > { %351 = vst [vmem:[%s3371_s26 + $0x14] sm:$0xf] %v350_v5  ;;  %v366_v13 = vld [vmem:[%s3366_s20 + $0x68] sm:$0xf]  ;;  %v368_v14 = vld [vmem:[%s3366_s20 + $0x70] sm:$0xf] }
  0x30   : > { %353 = vst [vmem:[%s3371_s26 + $0x18] sm:$0xf] %v352_v6  ;;  %v370_v15 = vld [vmem:[%s3366_s20 + $0x78] sm:$0xf]  ;;  %v372_v16 = vld [vmem:[%s3366_s20 + $0x80] sm:$0xf] }
  0x31   : > { %355 = vst [vmem:[%s3371_s26 + $0x1c] sm:$0xf] %v354_v7  ;;  %v374_v17 = vld [vmem:[%s3366_s20 + $0x88] sm:$0xf]  ;;  %v376_v18 = vld [vmem:[%s3366_s20 + $0x90] sm:$0xf] }
  0x32   : > { %357 = vst [vmem:[%s3371_s26 + $0x20] sm:$0xf] %v356_v8  ;;  %v378_v19 = vld [vmem:[%s3366_s20 + $0x98] sm:$0xf]  ;;  %v380_v20 = vld [vmem:[%s3366_s20 + $0xa0] sm:$0xf] }
  0x33   : > { %359 = vst [vmem:[%s3371_s26 + $0x24] sm:$0xf] %v358_v9  ;;  %v382_v21 = vld [vmem:[%s3366_s20 + $0xa8] sm:$0xf]  ;;  %v384_v22 = vld [vmem:[%s3366_s20 + $0xb0] sm:$0xf] }
  0x34   : > { %361 = vst [vmem:[%s3371_s26 + $0x28] sm:$0xf] %v360_v10  ;;  %v386_v23 = vld [vmem:[%s3366_s20 + $0xb8] sm:$0xf]  ;;  %v388_v24 = vld [vmem:[%s3366_s20 + $0xc0] sm:$0xf] }
  0x35   : > { %363 = vst [vmem:[%s3371_s26 + $0x2c] sm:$0xf] %v362_v11  ;;  %v390_v25 = vld [vmem:[%s3366_s20 + $0xc8] sm:$0xf]  ;;  %v392_v26 = vld [vmem:[%s3366_s20 + $0xd0] sm:$0xf] }
  0x36   : > { %365 = vst [vmem:[%s3371_s26 + $0x30] sm:$0xf] %v364_v12  ;;  %v394_v27 = vld [vmem:[%s3366_s20 + $0xd8] sm:$0xf]  ;;  %v396_v28 = vld [vmem:[%s3366_s20 + $0xe0] sm:$0xf] }
  0x37   : > { %367 = vst [vmem:[%s3371_s26 + $0x34] sm:$0xf] %v366_v13  ;;  %v398_v29 = vld [vmem:[%s3366_s20 + $0xe8] sm:$0xf]  ;;  %v400_v30 = vld [vmem:[%s3366_s20 + $0xf0] sm:$0xf] }
  0x38   : > { %369 = vst [vmem:[%s3371_s26 + $0x38] sm:$0xf] %v368_v14  ;;  %v402_v31 = vld [vmem:[%s3366_s20 + $0xf8] sm:$0xf]  ;;  %v404_v32 = vld [vmem:[%s3366_s20 + $0x100] sm:$0xf] }
  0x39   : > { %371 = vst [vmem:[%s3371_s26 + $0x3c] sm:$0xf] %v370_v15  ;;  %v406_v33 = vld [vmem:[%s3366_s20 + $0x108] sm:$0xf]  ;;  %v408_v34 = vld [vmem:[%s3366_s20 + $0x110] sm:$0xf] }
  0x3a   : > { %373 = vst [vmem:[%s3371_s26 + $0x40] sm:$0xf] %v372_v16  ;;  %v410_v35 = vld [vmem:[%s3366_s20 + $0x118] sm:$0xf]  ;;  %v412_v36 = vld [vmem:[%s3366_s20 + $0x120] sm:$0xf] }
  0x3b   : > { %375 = vst [vmem:[%s3371_s26 + $0x44] sm:$0xf] %v374_v17  ;;  %v414_v37 = vld [vmem:[%s3366_s20 + $0x128] sm:$0xf]  ;;  %v416_v38 = vld [vmem:[%s3366_s20 + $0x130] sm:$0xf] }
  0x3c   : > { %377 = vst [vmem:[%s3371_s26 + $0x48] sm:$0xf] %v376_v18  ;;  %v418_v39 = vld [vmem:[%s3366_s20 + $0x138] sm:$0xf]  ;;  %v420_v40 = vld [vmem:[%s3366_s20 + $0x140] sm:$0xf] }
  0x3d   : > { %379 = vst [vmem:[%s3371_s26 + $0x4c] sm:$0xf] %v378_v19  ;;  %v422_v41 = vld [vmem:[%s3366_s20 + $0x148] sm:$0xf]  ;;  %v424_v42 = vld [vmem:[%s3366_s20 + $0x150] sm:$0xf] }
  0x3e   : > { %381 = vst [vmem:[%s3371_s26 + $0x50] sm:$0xf] %v380_v20  ;;  %v426_v43 = vld [vmem:[%s3366_s20 + $0x158] sm:$0xf]  ;;  %v428_v44 = vld [vmem:[%s3366_s20 + $0x160] sm:$0xf] }
  0x3f   : > { %383 = vst [vmem:[%s3371_s26 + $0x54] sm:$0xf] %v382_v21  ;;  %v430_v45 = vld [vmem:[%s3366_s20 + $0x168] sm:$0xf]  ;;  %v432_v46 = vld [vmem:[%s3366_s20 + $0x170] sm:$0xf] }
  0x40   : > { %385 = vst [vmem:[%s3371_s26 + $0x58] sm:$0xf] %v384_v22  ;;  %v434_v47 = vld [vmem:[%s3366_s20 + $0x178] sm:$0xf]  ;;  %v436_v48 = vld [vmem:[%s3366_s20 + $0x180] sm:$0xf] }
  0x41   : > { %387 = vst [vmem:[%s3371_s26 + $0x5c] sm:$0xf] %v386_v23  ;;  %v438_v49 = vld [vmem:[%s3366_s20 + $0x188] sm:$0xf]  ;;  %v440_v50 = vld [vmem:[%s3366_s20 + $0x190] sm:$0xf] }
  0x42   : > { %389 = vst [vmem:[%s3371_s26 + $0x60] sm:$0xf] %v388_v24  ;;  %v442_v51 = vld [vmem:[%s3366_s20 + $0x198] sm:$0xf]  ;;  %v444_v52 = vld [vmem:[%s3366_s20 + $0x1a0] sm:$0xf] }
  0x43   : > { %391 = vst [vmem:[%s3371_s26 + $0x64] sm:$0xf] %v390_v25  ;;  %v446_v53 = vld [vmem:[%s3366_s20 + $0x1a8] sm:$0xf]  ;;  %v448_v54 = vld [vmem:[%s3366_s20 + $0x1b0] sm:$0xf] }
  0x44   : > { %393 = vst [vmem:[%s3371_s26 + $0x68] sm:$0xf] %v392_v26  ;;  %v450_v55 = vld [vmem:[%s3366_s20 + $0x1b8] sm:$0xf]  ;;  %v452_v56 = vld [vmem:[%s3366_s20 + $0x1c0] sm:$0xf] }
  0x45   : > { %395 = vst [vmem:[%s3371_s26 + $0x6c] sm:$0xf] %v394_v27  ;;  %v454_v57 = vld [vmem:[%s3366_s20 + $0x1c8] sm:$0xf]  ;;  %v456_v58 = vld [vmem:[%s3366_s20 + $0x1d0] sm:$0xf] }
  0x46   : > { %397 = vst [vmem:[%s3371_s26 + $0x70] sm:$0xf] %v396_v28  ;;  %v458_v59 = vld [vmem:[%s3366_s20 + $0x1d8] sm:$0xf]  ;;  %v460_v60 = vld [vmem:[%s3366_s20 + $0x1e0] sm:$0xf] }
  0x47   : > { %399 = vst [vmem:[%s3371_s26 + $0x74] sm:$0xf] %v398_v29  ;;  %v462_v61 = vld [vmem:[%s3366_s20 + $0x1e8] sm:$0xf]  ;;  %v464_v62 = vld [vmem:[%s3366_s20 + $0x1f0] sm:$0xf] }
  0x48   : > { %401 = vst [vmem:[%s3371_s26 + $0x78] sm:$0xf] %v400_v30  ;;  %v466_v63 = vld [vmem:[%s3366_s20 + $0x1f8] sm:$0xf]  ;;  %v468_v0 = vld [vmem:[%s3366_s20 + $0x200] sm:$0xf] }
  0x49   : > { %403 = vst [vmem:[%s3371_s26 + $0x7c] sm:$0xf] %v402_v31  ;;  %v470_v1 = vld [vmem:[%s3366_s20 + $0x208] sm:$0xf]  ;;  %v472_v2 = vld [vmem:[%s3366_s20 + $0x210] sm:$0xf] }
  0x4a   : > { %405 = vst [vmem:[%s3371_s26 + $0x80] sm:$0xf] %v404_v32  ;;  %v474_v3 = vld [vmem:[%s3366_s20 + $0x218] sm:$0xf]  ;;  %v476_v4 = vld [vmem:[%s3366_s20 + $0x220] sm:$0xf] }
  0x4b   : > { %407 = vst [vmem:[%s3371_s26 + $0x84] sm:$0xf] %v406_v33  ;;  %v478_v5 = vld [vmem:[%s3366_s20 + $0x228] sm:$0xf]  ;;  %v480_v6 = vld [vmem:[%s3366_s20 + $0x230] sm:$0xf] }
  0x4c   : > { %409 = vst [vmem:[%s3371_s26 + $0x88] sm:$0xf] %v408_v34  ;;  %v482_v7 = vld [vmem:[%s3366_s20 + $0x238] sm:$0xf]  ;;  %v484_v8 = vld [vmem:[%s3366_s20 + $0x240] sm:$0xf] }
  0x4d   : > { %411 = vst [vmem:[%s3371_s26 + $0x8c] sm:$0xf] %v410_v35  ;;  %v486_v9 = vld [vmem:[%s3366_s20 + $0x248] sm:$0xf]  ;;  %v488_v10 = vld [vmem:[%s3366_s20 + $0x250] sm:$0xf] }
  0x4e   : > { %413 = vst [vmem:[%s3371_s26 + $0x90] sm:$0xf] %v412_v36  ;;  %v490_v11 = vld [vmem:[%s3366_s20 + $0x258] sm:$0xf]  ;;  %v492_v12 = vld [vmem:[%s3366_s20 + $0x260] sm:$0xf] }
  0x4f   : > { %415 = vst [vmem:[%s3371_s26 + $0x94] sm:$0xf] %v414_v37  ;;  %v494_v13 = vld [vmem:[%s3366_s20 + $0x268] sm:$0xf]  ;;  %v496_v14 = vld [vmem:[%s3366_s20 + $0x270] sm:$0xf] }
  0x50   : > { %417 = vst [vmem:[%s3371_s26 + $0x98] sm:$0xf] %v416_v38  ;;  %v498_v15 = vld [vmem:[%s3366_s20 + $0x278] sm:$0xf]  ;;  %v500_v16 = vld [vmem:[%s3366_s20 + $0x280] sm:$0xf] }
  0x51   : > { %419 = vst [vmem:[%s3371_s26 + $0x9c] sm:$0xf] %v418_v39  ;;  %v502_v17 = vld [vmem:[%s3366_s20 + $0x288] sm:$0xf]  ;;  %v504_v18 = vld [vmem:[%s3366_s20 + $0x290] sm:$0xf] }
  0x52   : > { %421 = vst [vmem:[%s3371_s26 + $0xa0] sm:$0xf] %v420_v40  ;;  %v506_v19 = vld [vmem:[%s3366_s20 + $0x298] sm:$0xf]  ;;  %v508_v20 = vld [vmem:[%s3366_s20 + $0x2a0] sm:$0xf] }
  0x53   : > { %423 = vst [vmem:[%s3371_s26 + $0xa4] sm:$0xf] %v422_v41  ;;  %v510_v21 = vld [vmem:[%s3366_s20 + $0x2a8] sm:$0xf]  ;;  %v512_v22 = vld [vmem:[%s3366_s20 + $0x2b0] sm:$0xf] }
  0x54   : > { %425 = vst [vmem:[%s3371_s26 + $0xa8] sm:$0xf] %v424_v42  ;;  %v514_v23 = vld [vmem:[%s3366_s20 + $0x2b8] sm:$0xf]  ;;  %v516_v24 = vld [vmem:[%s3366_s20 + $0x2c0] sm:$0xf] }
  0x55   : > { %427 = vst [vmem:[%s3371_s26 + $0xac] sm:$0xf] %v426_v43  ;;  %v518_v25 = vld [vmem:[%s3366_s20 + $0x2c8] sm:$0xf]  ;;  %v520_v26 = vld [vmem:[%s3366_s20 + $0x2d0] sm:$0xf] }
  0x56   : > { %429 = vst [vmem:[%s3371_s26 + $0xb0] sm:$0xf] %v428_v44  ;;  %v522_v27 = vld [vmem:[%s3366_s20 + $0x2d8] sm:$0xf]  ;;  %v524_v28 = vld [vmem:[%s3366_s20 + $0x2e0] sm:$0xf] }
  0x57   : > { %431 = vst [vmem:[%s3371_s26 + $0xb4] sm:$0xf] %v430_v45  ;;  %v526_v29 = vld [vmem:[%s3366_s20 + $0x2e8] sm:$0xf]  ;;  %v528_v30 = vld [vmem:[%s3366_s20 + $0x2f0] sm:$0xf] }
  0x58   : > { %433 = vst [vmem:[%s3371_s26 + $0xb8] sm:$0xf] %v432_v46  ;;  %v530_v31 = vld [vmem:[%s3366_s20 + $0x2f8] sm:$0xf]  ;;  %v532_v32 = vld [vmem:[%s3366_s20 + $0x300] sm:$0xf] }
  0x59   : > { %435 = vst [vmem:[%s3371_s26 + $0xbc] sm:$0xf] %v434_v47  ;;  %v534_v33 = vld [vmem:[%s3366_s20 + $0x308] sm:$0xf]  ;;  %v536_v34 = vld [vmem:[%s3366_s20 + $0x310] sm:$0xf] }
  0x5a   : > { %437 = vst [vmem:[%s3371_s26 + $0xc0] sm:$0xf] %v436_v48  ;;  %v538_v35 = vld [vmem:[%s3366_s20 + $0x318] sm:$0xf]  ;;  %v540_v36 = vld [vmem:[%s3366_s20 + $0x320] sm:$0xf] }
  0x5b   : > { %439 = vst [vmem:[%s3371_s26 + $0xc4] sm:$0xf] %v438_v49  ;;  %v542_v37 = vld [vmem:[%s3366_s20 + $0x328] sm:$0xf]  ;;  %v544_v38 = vld [vmem:[%s3366_s20 + $0x330] sm:$0xf] }
  0x5c   : > { %441 = vst [vmem:[%s3371_s26 + $0xc8] sm:$0xf] %v440_v50  ;;  %v546_v39 = vld [vmem:[%s3366_s20 + $0x338] sm:$0xf]  ;;  %v548_v40 = vld [vmem:[%s3366_s20 + $0x340] sm:$0xf] }
  0x5d   : > { %443 = vst [vmem:[%s3371_s26 + $0xcc] sm:$0xf] %v442_v51  ;;  %v550_v41 = vld [vmem:[%s3366_s20 + $0x348] sm:$0xf]  ;;  %v552_v42 = vld [vmem:[%s3366_s20 + $0x350] sm:$0xf] }
  0x5e   : > { %445 = vst [vmem:[%s3371_s26 + $0xd0] sm:$0xf] %v444_v52  ;;  %v554_v43 = vld [vmem:[%s3366_s20 + $0x358] sm:$0xf]  ;;  %v556_v44 = vld [vmem:[%s3366_s20 + $0x360] sm:$0xf] }
  0x5f   : > { %447 = vst [vmem:[%s3371_s26 + $0xd4] sm:$0xf] %v446_v53  ;;  %v558_v45 = vld [vmem:[%s3366_s20 + $0x368] sm:$0xf]  ;;  %v560_v46 = vld [vmem:[%s3366_s20 + $0x370] sm:$0xf] }
  0x60   : > { %449 = vst [vmem:[%s3371_s26 + $0xd8] sm:$0xf] %v448_v54  ;;  %v562_v47 = vld [vmem:[%s3366_s20 + $0x378] sm:$0xf]  ;;  %v564_v48 = vld [vmem:[%s3366_s20 + $0x380] sm:$0xf] }
  0x61   : > { %451 = vst [vmem:[%s3371_s26 + $0xdc] sm:$0xf] %v450_v55  ;;  %v566_v49 = vld [vmem:[%s3366_s20 + $0x388] sm:$0xf]  ;;  %v568_v50 = vld [vmem:[%s3366_s20 + $0x390] sm:$0xf] }
  0x62   : > { %453 = vst [vmem:[%s3371_s26 + $0xe0] sm:$0xf] %v452_v56  ;;  %v570_v51 = vld [vmem:[%s3366_s20 + $0x398] sm:$0xf]  ;;  %v572_v52 = vld [vmem:[%s3366_s20 + $0x3a0] sm:$0xf] }
  0x63   : > { %455 = vst [vmem:[%s3371_s26 + $0xe4] sm:$0xf] %v454_v57  ;;  %v574_v53 = vld [vmem:[%s3366_s20 + $0x3a8] sm:$0xf]  ;;  %v576_v54 = vld [vmem:[%s3366_s20 + $0x3b0] sm:$0xf] }
  0x64   : > { %457 = vst [vmem:[%s3371_s26 + $0xe8] sm:$0xf] %v456_v58  ;;  %v578_v55 = vld [vmem:[%s3366_s20 + $0x3b8] sm:$0xf]  ;;  %v580_v56 = vld [vmem:[%s3366_s20 + $0x3c0] sm:$0xf] }
  0x65   : > { %459 = vst [vmem:[%s3371_s26 + $0xec] sm:$0xf] %v458_v59  ;;  %v582_v57 = vld [vmem:[%s3366_s20 + $0x3c8] sm:$0xf]  ;;  %v584_v58 = vld [vmem:[%s3366_s20 + $0x3d0] sm:$0xf] }
  0x66   : > { %461 = vst [vmem:[%s3371_s26 + $0xf0] sm:$0xf] %v460_v60  ;;  %v586_v59 = vld [vmem:[%s3366_s20 + $0x3d8] sm:$0xf]  ;;  %v588_v60 = vld [vmem:[%s3366_s20 + $0x3e0] sm:$0xf] }
  0x67   : > { %463 = vst [vmem:[%s3371_s26 + $0xf4] sm:$0xf] %v462_v61  ;;  %v590_v61 = vld [vmem:[%s3366_s20 + $0x3e8] sm:$0xf] }
  0x68   : > { %465 = vst [vmem:[%s3371_s26 + $0xf8] sm:$0xf] %v464_v62  ;;  %v592_v62 = vld [vmem:[%s3366_s20 + $0x3f0] sm:$0xf] }
  0x69   : > { %467 = vst [vmem:[%s3371_s26 + $0xfc] sm:$0xf] %v466_v63  ;;  %v594_v63 = vld [vmem:[%s3366_s20 + $0x3f8] sm:$0xf] }
  0x6a   : > { %469 = vst [vmem:[%s3371_s26 + $0x100] sm:$0xf] %v468_v0  ;;  %v596_v0 = vld [vmem:[%s3366_s20 + $0x400] sm:$0xf] }
  0x6b   : > { %471 = vst [vmem:[%s3371_s26 + $0x104] sm:$0xf] %v470_v1  ;;  %v598_v1 = vld [vmem:[%s3366_s20 + $0x408] sm:$0xf] }
  0x6c   : > { %473 = vst [vmem:[%s3371_s26 + $0x108] sm:$0xf] %v472_v2  ;;  %v600_v2 = vld [vmem:[%s3366_s20 + $0x410] sm:$0xf] }
  0x6d   : > { %475 = vst [vmem:[%s3371_s26 + $0x10c] sm:$0xf] %v474_v3  ;;  %v602_v3 = vld [vmem:[%s3366_s20 + $0x418] sm:$0xf] }
  0x6e   : > { %477 = vst [vmem:[%s3371_s26 + $0x110] sm:$0xf] %v476_v4  ;;  %v604_v4 = vld [vmem:[%s3366_s20 + $0x420] sm:$0xf] }
  0x6f   : > { %479 = vst [vmem:[%s3371_s26 + $0x114] sm:$0xf] %v478_v5  ;;  %v606_v5 = vld [vmem:[%s3366_s20 + $0x428] sm:$0xf] }
  0x70   : > { %481 = vst [vmem:[%s3371_s26 + $0x118] sm:$0xf] %v480_v6  ;;  %v608_v6 = vld [vmem:[%s3366_s20 + $0x430] sm:$0xf] }
  0x71   : > { %483 = vst [vmem:[%s3371_s26 + $0x11c] sm:$0xf] %v482_v7  ;;  %v610_v7 = vld [vmem:[%s3366_s20 + $0x438] sm:$0xf] }
  0x72   : > { %485 = vst [vmem:[%s3371_s26 + $0x120] sm:$0xf] %v484_v8  ;;  %v612_v8 = vld [vmem:[%s3366_s20 + $0x440] sm:$0xf] }
  0x73   : > { %487 = vst [vmem:[%s3371_s26 + $0x124] sm:$0xf] %v486_v9  ;;  %v614_v9 = vld [vmem:[%s3366_s20 + $0x448] sm:$0xf] }
  0x74   : > { %489 = vst [vmem:[%s3371_s26 + $0x128] sm:$0xf] %v488_v10  ;;  %v616_v10 = vld [vmem:[%s3366_s20 + $0x450] sm:$0xf] }
  0x75   : > { %491 = vst [vmem:[%s3371_s26 + $0x12c] sm:$0xf] %v490_v11  ;;  %v618_v11 = vld [vmem:[%s3366_s20 + $0x458] sm:$0xf] }
  0x76   : > { %493 = vst [vmem:[%s3371_s26 + $0x130] sm:$0xf] %v492_v12  ;;  %v620_v12 = vld [vmem:[%s3366_s20 + $0x460] sm:$0xf] }
  0x77   : > { %495 = vst [vmem:[%s3371_s26 + $0x134] sm:$0xf] %v494_v13  ;;  %v622_v13 = vld [vmem:[%s3366_s20 + $0x468] sm:$0xf] }
  0x78   : > { %497 = vst [vmem:[%s3371_s26 + $0x138] sm:$0xf] %v496_v14  ;;  %v624_v14 = vld [vmem:[%s3366_s20 + $0x470] sm:$0xf] }
  0x79   : > { %499 = vst [vmem:[%s3371_s26 + $0x13c] sm:$0xf] %v498_v15  ;;  %v626_v15 = vld [vmem:[%s3366_s20 + $0x478] sm:$0xf] }
  0x7a   : > { %501 = vst [vmem:[%s3371_s26 + $0x140] sm:$0xf] %v500_v16 }
  0x7b   : > { %503 = vst [vmem:[%s3371_s26 + $0x144] sm:$0xf] %v502_v17 }
  0x7c   : > { %505 = vst [vmem:[%s3371_s26 + $0x148] sm:$0xf] %v504_v18 }
  0x7d   : > { %507 = vst [vmem:[%s3371_s26 + $0x14c] sm:$0xf] %v506_v19 }
  0x7e   : > { %509 = vst [vmem:[%s3371_s26 + $0x150] sm:$0xf] %v508_v20 }
  0x7f   : > { %511 = vst [vmem:[%s3371_s26 + $0x154] sm:$0xf] %v510_v21 }
  0x80   : > { %513 = vst [vmem:[%s3371_s26 + $0x158] sm:$0xf] %v512_v22 }
  0x81   : > { %515 = vst [vmem:[%s3371_s26 + $0x15c] sm:$0xf] %v514_v23 }
  0x82   : > { %517 = vst [vmem:[%s3371_s26 + $0x160] sm:$0xf] %v516_v24 }
  0x83   : > { %519 = vst [vmem:[%s3371_s26 + $0x164] sm:$0xf] %v518_v25 }
  0x84   : > { %521 = vst [vmem:[%s3371_s26 + $0x168] sm:$0xf] %v520_v26 }
  0x85   : > { %523 = vst [vmem:[%s3371_s26 + $0x16c] sm:$0xf] %v522_v27 }
  0x86   : > { %525 = vst [vmem:[%s3371_s26 + $0x170] sm:$0xf] %v524_v28 }
  0x87   : > { %527 = vst [vmem:[%s3371_s26 + $0x174] sm:$0xf] %v526_v29 }
  0x88   : > { %529 = vst [vmem:[%s3371_s26 + $0x178] sm:$0xf] %v528_v30 }
  0x89   : > { %531 = vst [vmem:[%s3371_s26 + $0x17c] sm:$0xf] %v530_v31 }
  0x8a   : > { %533 = vst [vmem:[%s3371_s26 + $0x180] sm:$0xf] %v532_v32 }
  0x8b   : > { %535 = vst [vmem:[%s3371_s26 + $0x184] sm:$0xf] %v534_v33 }
  0x8c   : > { %537 = vst [vmem:[%s3371_s26 + $0x188] sm:$0xf] %v536_v34 }
  0x8d   : > { %539 = vst [vmem:[%s3371_s26 + $0x18c] sm:$0xf] %v538_v35 }
  0x8e   : > { %541 = vst [vmem:[%s3371_s26 + $0x190] sm:$0xf] %v540_v36 }
  0x8f   : > { %543 = vst [vmem:[%s3371_s26 + $0x194] sm:$0xf] %v542_v37 }
  0x90   : > { %545 = vst [vmem:[%s3371_s26 + $0x198] sm:$0xf] %v544_v38 }
  0x91   : > { %547 = vst [vmem:[%s3371_s26 + $0x19c] sm:$0xf] %v546_v39 }
  0x92   : > { %549 = vst [vmem:[%s3371_s26 + $0x1a0] sm:$0xf] %v548_v40 }
  0x93   : > { %551 = vst [vmem:[%s3371_s26 + $0x1a4] sm:$0xf] %v550_v41 }
  0x94   : > { %553 = vst [vmem:[%s3371_s26 + $0x1a8] sm:$0xf] %v552_v42 }
  0x95   : > { %555 = vst [vmem:[%s3371_s26 + $0x1ac] sm:$0xf] %v554_v43 }
  0x96   : > { %557 = vst [vmem:[%s3371_s26 + $0x1b0] sm:$0xf] %v556_v44 }
  0x97   : > { %559 = vst [vmem:[%s3371_s26 + $0x1b4] sm:$0xf] %v558_v45 }
  0x98   : > { %561 = vst [vmem:[%s3371_s26 + $0x1b8] sm:$0xf] %v560_v46 }
  0x99   : > { %563 = vst [vmem:[%s3371_s26 + $0x1bc] sm:$0xf] %v562_v47 }
  0x9a   : > { %565 = vst [vmem:[%s3371_s26 + $0x1c0] sm:$0xf] %v564_v48 }
  0x9b   : > { %567 = vst [vmem:[%s3371_s26 + $0x1c4] sm:$0xf] %v566_v49 }
  0x9c   : > { %569 = vst [vmem:[%s3371_s26 + $0x1c8] sm:$0xf] %v568_v50 }
  0x9d   : > { %571 = vst [vmem:[%s3371_s26 + $0x1cc] sm:$0xf] %v570_v51 }
  0x9e   : > { %573 = vst [vmem:[%s3371_s26 + $0x1d0] sm:$0xf] %v572_v52 }
  0x9f   : > { %575 = vst [vmem:[%s3371_s26 + $0x1d4] sm:$0xf] %v574_v53 }
  0xa0   : > { %577 = vst [vmem:[%s3371_s26 + $0x1d8] sm:$0xf] %v576_v54 }
  0xa1   : > { %579 = vst [vmem:[%s3371_s26 + $0x1dc] sm:$0xf] %v578_v55 }
  0xa2   : > { %581 = vst [vmem:[%s3371_s26 + $0x1e0] sm:$0xf] %v580_v56 }
  0xa3   : > { %583 = vst [vmem:[%s3371_s26 + $0x1e4] sm:$0xf] %v582_v57 }
  0xa4   : > { %585 = vst [vmem:[%s3371_s26 + $0x1e8] sm:$0xf] %v584_v58 }
  0xa5   : > { %587 = vst [vmem:[%s3371_s26 + $0x1ec] sm:$0xf] %v586_v59 }
  0xa6   : > { %589 = vst [vmem:[%s3371_s26 + $0x1f0] sm:$0xf] %v588_v60 }
  0xa7   : > { %591 = vst [vmem:[%s3371_s26 + $0x1f4] sm:$0xf] %v590_v61 }
  0xa8   : > { %593 = vst [vmem:[%s3371_s26 + $0x1f8] sm:$0xf] %v592_v62 }
  0xa9   : > { %595 = vst [vmem:[%s3371_s26 + $0x1fc] sm:$0xf] %v594_v63 }
  0xaa   : > { %597 = vst [vmem:[%s3371_s26 + $0x200] sm:$0xf] %v596_v0 }
  0xab   : > { %599 = vst [vmem:[%s3371_s26 + $0x204] sm:$0xf] %v598_v1 }
  0xac   : > { %601 = vst [vmem:[%s3371_s26 + $0x208] sm:$0xf] %v600_v2 }
  0xad   : > { %603 = vst [vmem:[%s3371_s26 + $0x20c] sm:$0xf] %v602_v3 }
  0xae   : > { %605 = vst [vmem:[%s3371_s26 + $0x210] sm:$0xf] %v604_v4 }
  0xaf   : > { %607 = vst [vmem:[%s3371_s26 + $0x214] sm:$0xf] %v606_v5 }
  0xb0   : > { %609 = vst [vmem:[%s3371_s26 + $0x218] sm:$0xf] %v608_v6 }
  0xb1   : > { %611 = vst [vmem:[%s3371_s26 + $0x21c] sm:$0xf] %v610_v7 }
  0xb2   : > { %613 = vst [vmem:[%s3371_s26 + $0x220] sm:$0xf] %v612_v8 }
  0xb3   : > { %615 = vst [vmem:[%s3371_s26 + $0x224] sm:$0xf] %v614_v9 }
  0xb4   : > { %617 = vst [vmem:[%s3371_s26 + $0x228] sm:$0xf] %v616_v10 }
  0xb5   : > { %619 = vst [vmem:[%s3371_s26 + $0x22c] sm:$0xf] %v618_v11 }
  0xb6   : > { %621 = vst [vmem:[%s3371_s26 + $0x230] sm:$0xf] %v620_v12 }
  0xb7   : > { %623 = vst [vmem:[%s3371_s26 + $0x234] sm:$0xf] %v622_v13 }
  0xb8   : > { %625 = vst [vmem:[%s3371_s26 + $0x238] sm:$0xf] %v624_v14 }
  0xb9   : > { %627 = vst [vmem:[%s3371_s26 + $0x23c] sm:$0xf] %v626_v15 }
  0xba PF: > { %945 = sbr.rel (!%p3331_p3) target bundleno = 206 (0xce), region = 73  ;;  %s947_s17 = sand.u32 (%p3331_p3), 1, %s3194_s13  }
  0xbb   : > { %s2418_s22 = sshll.u32 (%p3331_p3), %s3206_s16, 2  ;;  %s2417_s19 = sshll.u32 (%p3331_p3), %s947_s17, 6 }
  0xbc   : > { %s3665_s1 = scalar_lea.vmem (%p3331_p3), %s3923_s3, %s2418_s22  ;;  %s949_s25 = scalar_lea.vmem (%p3331_p3), [#allocation4], %s2417_s19 }
  0xbd   : > { %v968_v16 = vld [vmem:[%s3665_s1] sm:$0xf] (%p3331_p3)  ;;  %v970_v17 = vld [vmem:[%s3665_s1 + $0x8] sm:$0xf] (%p3331_p3)  ;;  %v972_v18 = vld [vmem:[%s3665_s1 + $0x10] sm:$0xf] (%p3331_p3) }
  0xbe   : > { %969 = vst [vmem:[%s949_s25] sm:$0xf] (%p3331_p3), %v968_v16  ;;  %v974_v19 = vld [vmem:[%s3665_s1 + $0x18] sm:$0xf] (%p3331_p3)  ;;  %v976_v20 = vld [vmem:[%s3665_s1 + $0x20] sm:$0xf] (%p3331_p3) }
  0xbf   : > { %971 = vst [vmem:[%s949_s25 + $0x4] sm:$0xf] %v970_v17  ;;  %v978_v21 = vld [vmem:[%s3665_s1 + $0x28] sm:$0xf]  ;;  %v980_v22 = vld [vmem:[%s3665_s1 + $0x30] sm:$0xf] }
  0xc0   : > { %973 = vst [vmem:[%s949_s25 + $0x8] sm:$0xf] %v972_v18  ;;  %v982_v23 = vld [vmem:[%s3665_s1 + $0x38] sm:$0xf]  ;;  %v984_v24 = vld [vmem:[%s3665_s1 + $0x40] sm:$0xf] }
  0xc1   : > { %975 = vst [vmem:[%s949_s25 + $0xc] sm:$0xf] %v974_v19  ;;  %v986_v25 = vld [vmem:[%s3665_s1 + $0x48] sm:$0xf]  ;;  %v988_v26 = vld [vmem:[%s3665_s1 + $0x50] sm:$0xf] }
  0xc2   : > { %977 = vst [vmem:[%s949_s25 + $0x10] sm:$0xf] %v976_v20  ;;  %v990_v27 = vld [vmem:[%s3665_s1 + $0x58] sm:$0xf]  ;;  %v992_v28 = vld [vmem:[%s3665_s1 + $0x60] sm:$0xf] }
  0xc3   : > { %979 = vst [vmem:[%s949_s25 + $0x14] sm:$0xf] %v978_v21  ;;  %v994_v29 = vld [vmem:[%s3665_s1 + $0x68] sm:$0xf]  ;;  %v996_v30 = vld [vmem:[%s3665_s1 + $0x70] sm:$0xf] }
  0xc4   : > { %981 = vst [vmem:[%s949_s25 + $0x18] sm:$0xf] %v980_v22  ;;  %v998_v31 = vld [vmem:[%s3665_s1 + $0x78] sm:$0xf] }
  0xc5   : > { %983 = vst [vmem:[%s949_s25 + $0x1c] sm:$0xf] %v982_v23 }
  0xc6   : > { %985 = vst [vmem:[%s949_s25 + $0x20] sm:$0xf] %v984_v24 }
  0xc7   : > { %987 = vst [vmem:[%s949_s25 + $0x24] sm:$0xf] %v986_v25 }
  0xc8   : > { %989 = vst [vmem:[%s949_s25 + $0x28] sm:$0xf] %v988_v26 }
  0xc9   : > { %991 = vst [vmem:[%s949_s25 + $0x2c] sm:$0xf] %v990_v27 }
  0xca   : > { %993 = vst [vmem:[%s949_s25 + $0x30] sm:$0xf] %v992_v28 }
  0xcb   : > { %995 = vst [vmem:[%s949_s25 + $0x34] sm:$0xf] %v994_v29 }
  0xcc   : > { %997 = vst [vmem:[%s949_s25 + $0x38] sm:$0xf] %v996_v30 }
  0xcd   : > { %999 = vst [vmem:[%s949_s25 + $0x3c] sm:$0xf] %v998_v31 }
  0xce PF: > { %p2419_p0 = scmp.ge.s32.totalorder %s3214_s18, 1  ;;  %p1081_p1 = scmp.lt.s32.totalorder %s3214_s18, 5 }
  0xd0   : > { %p1082_p2 = pnand %p2419_p0, %p1081_p1 }
  0xd1   : > { %s1088_s20 = sand.u32 (!%p1082_p2), 1, %s3190_s12   ;;  %s1153_s26 = sand.u32 (!%p1082_p2), 1, %s3182_s10  }
  0xd2   : > { %1085 = sbr.rel (%p1082_p2) target bundleno = 690 (0x2b2), region = 130  ;;  %p1155_p3 = scmp.lt.s32.totalorder (!%p1082_p2), %s3202_s15, 1 }
  0xd3   : > { %s3010_s17 = smul.u32 (!%p1082_p2), 576, %s1088_s20  ;;  %s3943_s0 = sld [smem:[#allocation11_spill]] (!%p1082_p2) }
  0xd4   : > { %p1160_p4 = scmp.lt.s32.totalorder (!%p1082_p2), %s3198_s14, 1  ;;  %s3944_s2 = sld [smem:[#allocation13_spill]] (!%p1082_p2) }
  0xd5   : > { %s3689_s1 = scalar_lea.vmem (!%p1082_p2), [#allocation3], %s3010_s17  ;;  %s2420_s17 = sshll.u32 (!%p1082_p2), %s1088_s20, 6 }
  0xd6   : > { %s3787_s12 = scalar_lea.vmem (!%p1082_p2), [#allocation4], %s2420_s17  ;;  %p2914_p6 = scmp.ne.s32.totalorder (!%p1082_p2), %s3198_s14, 0 }
  0xd7   : > { %v2934_v32 = vld [vmem:[%s3689_s1 + $0x78] sm:$0xff]  ;;  %v2933_v36 = vld [vmem:[%s3689_s1 + $0x70] sm:$0xff]  ;;  %v2932_v40 = vld [vmem:[%s3689_s1 + $0x68] sm:$0xff]  ;;  %s1156_s22 = scalar_select %p1155_p3, %s3202_s15, 1  ;;  %vm2102_vm6 = vcmask 1045504  }
  0xd8   : > { %v2926_v33 = vld [vmem:[%s3689_s1 + $0x38] sm:$0xff]  ;;  %1272 = vmatpush.bf16.msra.mxu0 %v2934_v32  ;;  %v2925_v37 = vld [vmem:[%s3689_s1 + $0x30] sm:$0xff]  ;;  %v2924_v41 = vld [vmem:[%s3689_s1 + $0x28] sm:$0xff]  ;;  %s3804_s20 = scalar_select %p1160_p4, %s3198_s14, 1 }
  0xd9   : > { %v2942_v34 = vld [vmem:[%s3689_s1 + $0xb8] sm:$0xff]  ;;  %1333 = vmatpush.bf16.msra.mxu1 %v2926_v33  ;;  %v2941_v38 = vld [vmem:[%s3689_s1 + $0xb0] sm:$0xff]  ;;  %v2940_v42 = vld [vmem:[%s3689_s1 + $0xa8] sm:$0xff]  ;;  %s2918_s19 = sshll.u32 %s1156_s22, 5 }
  0xda   : > { %v2950_v35 = vld [vmem:[%s3689_s1 + $0xf8] sm:$0xff]  ;;  %1423 = vmatpush.bf16.msra.mxu2 %v2942_v34  ;;  %v2949_v39 = vld [vmem:[%s3689_s1 + $0xf0] sm:$0xff]  ;;  %v2948_v43 = vld [vmem:[%s3689_s1 + $0xe8] sm:$0xff]  ;;  %s3712_s25 = scalar_lea.vmem %s3943_s0, %s2918_s19  ;;  %s1162_s23 = scalar_lea.vmem %s3944_s2, %s3804_s20 }
  0xdb   : > { %1518 = vmatpush.bf16.msra.mxu3 %v2950_v35  ;;  %v2931_v44 = vld [vmem:[%s3689_s1 + $0x60] sm:$0xff]  ;;  %v2930_v48 = vld [vmem:[%s3689_s1 + $0x58] sm:$0xff]  ;;  %v3721_v56 = vld [vmem:[%s3712_s25 + $0x14] sm:$0x1]  ;;  %s1165_s17 = scalar_lea.vmem %s3924_s4, %s3804_s20  ;;  %s1168_s19 = scalar_lea.vmem %s3925_s5, %s3804_s20 }
  0xdc   : > { %1273 = vmatpush.bf16.msra.mxu0 %v2933_v36  ;;  %v2923_v45 = vld [vmem:[%s3689_s1 + $0x20] sm:$0xff]  ;;  %v2922_v49 = vld [vmem:[%s3689_s1 + $0x18] sm:$0xff]  ;;  %v2929_v57 = vld [vmem:[%s3689_s1 + $0x50] sm:$0xff]  ;;  %v1459_v60 = vunpack.c.l.b16 %v3721_v56 }
  0xdd   : > { %1334 = vmatpush.bf16.msra.mxu1 %v2925_v37  ;;  %v2939_v46 = vld [vmem:[%s3689_s1 + $0xa0] sm:$0xff]  ;;  %v2938_v50 = vld [vmem:[%s3689_s1 + $0x98] sm:$0xff]  ;;  %v2921_v58 = vld [vmem:[%s3689_s1 + $0x10] sm:$0xff] }
  0xde   : > { %1424 = vmatpush.bf16.msra.mxu2 %v2941_v38  ;;  %v2947_v47 = vld [vmem:[%s3689_s1 + $0xe0] sm:$0xff]  ;;  %v2946_v51 = vld [vmem:[%s3689_s1 + $0xd8] sm:$0xff]  ;;  %v2937_v61 = vld [vmem:[%s3689_s1 + $0x90] sm:$0xff] }
  0xdf   : > { %1519 = vmatpush.bf16.msra.mxu3 %v2949_v39  ;;  %v1346_v52 = vld [vmem:[%s3712_s25 + $0x8] sm:$0xff]   ;;  %v1437_v55 = vld [vmem:[%s3712_s25 + $0x4] sm:$0xe]  ;;  %v2945_v62 = vld [vmem:[%s3689_s1 + $0xd0] sm:$0xff] }
  0xe0   : > { %1274 = vmatpush.bf16.msra.mxu0 %v2932_v40  ;;  %v1365_v53 = vunpack.c.h.b16 %v1346_v52  ;;  %v1214_v54 = vunpack.c.l.b16 %v1346_v52  ;;  %v1458_v59 = vunpack.c.l.b16 %v1437_v55  ;;  %v2928_v3 = vld [vmem:[%s3689_s1 + $0x48] sm:$0xff]  ;;  %v2927_v12 = vld [vmem:[%s3689_s1 + $0x40] sm:$0xff]  ;;  %v2958_v17 = vld [vmem:[%s3689_s1 + $0x138] sm:$0xff] }
  0xe1   : > { %1335 = vmatpush.bf16.msra.mxu1 %v2924_v41  ;;  %v2920_v4 = vld [vmem:[%s3689_s1 + $0x8] sm:$0xff]  ;;  %v2919_v13 = vld [vmem:[%s3689_s1] sm:$0xff]  ;;  %v2967_v18 = vld [vmem:[%s3689_s1 + $0x178] sm:$0xff] }
  0xe2   : > { %1425 = vmatpush.bf16.msra.mxu2 %v2940_v42  ;;  %v1366_v63 = vpack.c.b16 %v1365_v53, %v1365_v53  ;;  %v1215_v0 = vpack.c.b16 %v1214_v54, %v1214_v54  ;;  %v1460_v2 = vpack.c.b16 %v1459_v60, %v1458_v59  ;;  %v2936_v6 = vld [vmem:[%s3689_s1 + $0x88] sm:$0xff]  ;;  %v2935_v16 = vld [vmem:[%s3689_s1 + $0x80] sm:$0xff]  ;;  %v2975_v19 = vld [vmem:[%s3689_s1 + $0x1b8] sm:$0xff] }
  0xe3   : > { %1520 = vmatpush.bf16.msra.mxu3 %v2948_v43  ;;  %v2944_v7 = vld [vmem:[%s3689_s1 + $0xc8] sm:$0xff]  ;;  %v2943_v20 = vld [vmem:[%s3689_s1 + $0xc0] sm:$0xff]  ;;  %v2984_v24 = vld [vmem:[%s3689_s1 + $0x1f8] sm:$0xff] }
  0xe4   : > { %1275 = vmatpush.bf16.msra.mxu0 %v2931_v44  ;;  %v1219_v1 = vshll.u32 %v1215_v0, 16  ;;  %v1370_v5 = vshll.u32 %v1366_v63, 16  ;;  %v1217_v8 = vshrl.u32 %v1215_v0, 16  ;;  %v1462_v10 = vshrl.u32 %v1460_v2, 16  ;;  %v2957_v26 = vld [vmem:[%s3689_s1 + $0x130] sm:$0xff]  ;;  %v2956_v32 = vld [vmem:[%s3689_s1 + $0x128] sm:$0xff] }
  0xe5   : > { %1336 = vmatpush.bf16.msra.mxu1 %v2923_v45  ;;  %v1465_v11 = vshll.u32 %v1460_v2, 16  ;;  %v1368_v14 = vshrl.u32 %v1366_v63, 16  ;;  %v2966_v27 = vld [vmem:[%s3689_s1 + $0x170] sm:$0xff]  ;;  %v1178_v29 = vld [vmem:[%s3712_s25 + $0xc] sm:$0x7]  ;;  %v2955_v36 = vld [vmem:[%s3689_s1 + $0x120] sm:$0xff] }
  0xe6   : > { %1426 = vmatpush.bf16.msra.mxu2 %v2939_v46  ;;  %v1221_v9 = vrot.slane %v1219_v1, 1  ;;  %v1372_v15 = vrot.slane %v1370_v5, 1  ;;  %v1464_v22 = vrot.slane %v1462_v10, 1  ;;  %v2974_v28 = vld [vmem:[%s3689_s1 + $0x1b0] sm:$0xff]  ;;  %v2965_v33 = vld [vmem:[%s3689_s1 + $0x168] sm:$0xff]  ;;  %v2964_v39 = vld [vmem:[%s3689_s1 + $0x160] sm:$0xff] }
  0xe7   : > { %1521 = vmatpush.bf16.msra.mxu3 %v2947_v47  ;;  %v1467_v23 = vrot.slane %v1465_v11, 2  ;;  %v2983_v31 = vld [vmem:[%s3689_s1 + $0x1f0] sm:$0xff]  ;;  %v2973_v34 = vld [vmem:[%s3689_s1 + $0x1a8] sm:$0xff]  ;;  %v3754_v38 = vld [vmem:[%s3712_s25 + $0x1c] sm:$0x1] }
  0xe8   : > { %1276 = vmatpush.bf16.msra.mxu0 %v2930_v48  ;;  %v1222_v21 = vor.u32 %v1221_v9, %v1217_v8  ;;  %v1373_v25 = vor.u32 %v1372_v15, %v1368_v14  ;;  %v2982_v35 = vld [vmem:[%s3689_s1 + $0x1e8] sm:$0xff]  ;;  %v2972_v40 = vld [vmem:[%s3689_s1 + $0x1a0] sm:$0xff]  ;;  %v1554_v43 = vunpack.c.l.b16 %v3754_v38  ;;  %v2954_v44 = vld [vmem:[%s3689_s1 + $0x118] sm:$0xff] }
  0xe9   : > { %1337 = vmatpush.bf16.msra.mxu1 %v2922_v49  ;;  %v1468_v30 = vor.u32 %v1467_v23, %v1464_v22  ;;  %v1532_v37 = vld [vmem:[%s3712_s25 + $0xc] sm:$0xe]  ;;  %v2981_v41 = vld [vmem:[%s3689_s1 + $0x1e0] sm:$0xff]  ;;  %v2963_v45 = vld [vmem:[%s3689_s1 + $0x158] sm:$0xff] }
  0xea   : > { %1427 = vmatpush.bf16.msra.mxu2 %v2938_v50  ;;  %v1553_v42 = vunpack.c.l.b16 %v1532_v37  ;;  %v2971_v46 = vld [vmem:[%s3689_s1 + $0x198] sm:$0xff]  ;;  %v2953_v49 = vld [vmem:[%s3689_s1 + $0x110] sm:$0xff]  ;;  %v1715_v52 = vld [vmem:[%s3712_s25 + $0x4] sm:$0xc]  ;;  %v1973_v37 = vlaneseq }
  0xeb   : > { %1522 = vmatpush.bf16.msra.mxu3 %v2946_v51  ;;  %v2980_v47 = vld [vmem:[%s3689_s1 + $0x1d8] sm:$0xff]  ;;  %v2962_v50 = vld [vmem:[%s3689_s1 + $0x150] sm:$0xff]  ;;  %v1734_v59 = vunpack.c.l.b16 %v1715_v52  ;;  %v2959_v63 = vld [vmem:[%s3712_s25 + $0xc] sm:$0x10] }
  0xec   : > { %1277 = vmatpush.bf16.msra.mxu0 %v2929_v57  ;;  %v1555_v48 = vpack.c.b16 %v1554_v43, %v1553_v42  ;;  %v2970_v51 = vld [vmem:[%s3689_s1 + $0x190] sm:$0xff]  ;;  %v2952_v57 = vld [vmem:[%s3689_s1 + $0x108] sm:$0xff]  ;;  %v2960_v8 = vld [vmem:[%s3689_s1 + $0x140] sm:$0xff]  ;;  %v1974_v38 = vshrl.u32 %v1973_v37, 7 }
  0xed   : > { %1338 = vmatpush.bf16.msra.mxu1 %v2921_v58  ;;  %v2979_v53 = vld [vmem:[%s3689_s1 + $0x1d0] sm:$0xff]  ;;  %v2961_v58 = vld [vmem:[%s3689_s1 + $0x148] sm:$0xff]  ;;  %v2968_v9 = vld [vmem:[%s3689_s1 + $0x180] sm:$0xff] }
  0xee   : > { %1428 = vmatpush.bf16.msra.mxu2 %v2937_v61  ;;  %v1557_v54 = vshrl.u32 %v1555_v48, 16  ;;  %v1560_v55 = vshll.u32 %v1555_v48, 16  ;;  %v2969_v61 = vld [vmem:[%s3689_s1 + $0x188] sm:$0xff]  ;;  %v2992_v10 = vld [vmem:[%s3689_s1 + $0x238] sm:$0xff]  ;;  %v2991_v15 = vld [vmem:[%s3689_s1 + $0x230] sm:$0xff]  ;;  %v1978_v42 = vand.u32 65535, %v1974_v38 }
  0xef   : > { %1523 = vmatpush.bf16.msra.mxu3 %v2945_v62  ;;  %v2667_v62 = vld [vmem:[%s3712_s25] sm:$0xc]  ;;  %v2978_v0 = vld [vmem:[%s3689_s1 + $0x1c8] sm:$0xff]  ;;  %v3000_v11 = vld [vmem:[%s3787_s12 + $0x38] sm:$0xff] }
  0xf0   : > { %1278 = vmatpush.bf16.msra.mxu0 %v2928_v3  ;;  %v1559_v1 = vrot.slane %v1557_v54, 1  ;;  %v1562_v2 = vrot.slane %v1560_v55, 2  ;;  %v2951_v3 = vld [vmem:[%s3689_s1 + $0x100] sm:$0xff]  ;;  %v2767_v5 = vld [vmem:[%s3712_s25 + $0x8] sm:$0xc]  ;;  %v2988_v22 = vld [vmem:[%s3689_s1 + $0x218] sm:$0xff] }
  0xf1   : > { %1339 = vmatpush.bf16.msra.mxu1 %v2920_v4  ;;  %v1735_v4 = vpack.c.b16 %v1459_v60, %v1734_v59  ;;  %v2996_v23 = vld [vmem:[%s3787_s12 + $0x18] sm:$0xff] }
  0xf2   : > { %1429 = vmatpush.bf16.msra.mxu2 %v2936_v6  ;;  %v2976_v6 = vld [vmem:[%s3712_s25 + $0x14] sm:$0x10] }
  0xf3   : > { %1524 = vmatpush.bf16.msra.mxu3 %v2944_v7  ;;  %v2668_v7 = vor.u32 %v2959_v63, %v2667_v62  ;;  %v2768_v14 = vor.u32 %v2976_v6, %v2767_v5  ;;  %v1736_v56 = vrot.slane %v1735_v4, 2 }
  0xf4   : > { %1279 = vmatpush.bf16.msra.mxu0 %v2927_v12  ;;  %v2977_v12 = vld [vmem:[%s3689_s1 + $0x1c0] sm:$0xff] }
  0xf5   : > { %1340 = vmatpush.bf16.msra.mxu1 %v2919_v13  ;;  %v1563_v13 = vor.u32 %v1562_v2, %v1559_v1  ;;  %v1651_v60 = vrot.slane %v2668_v7, 2 }
  0xf6   : > { %1430 = vmatpush.bf16.msra.mxu2 %v2935_v16  ;;  %v2999_v16 = vld [vmem:[%s3787_s12 + $0x30] sm:$0xff] }
  0xf7   : > { %1525 = vmatpush.bf16.msra.mxu3 %v2943_v20  ;;  %1280 = vmatmul.bf16.vlgmr.msra.gmra.mxu0 %v1222_v21  ;;  %v2989_v20 = vld [vmem:[%s3689_s1 + $0x220] sm:$0xff] }
  0xf8   : > { %1613 = vmatpush.bf16.msrb.mxu0 %v2958_v17  ;;  %1341 = vmatmul.bf16.vlgmr.msra.gmra.mxu1 %v1178_v29  ;;  %v1824_v17 = vrot.slane %v2768_v14, 2  ;;  %v2997_v21 = vld [vmem:[%s3787_s12 + $0x20] sm:$0xff]  ;;  %v2994_v29 = vld [vmem:[%s3787_s12 + $0x8] sm:$0xff] }
  0xf9   : > { %1701 = vmatpush.bf16.msrb.mxu1 %v2967_v18  ;;  %1431 = vmatmul.bf16.vlgmr.msra.gmra.mxu2 %v1373_v25  ;;  %v2990_v18 = vld [vmem:[%s3689_s1 + $0x228] sm:$0xff]  ;;  %v2995_v25 = vld [vmem:[%s3787_s12 + $0x10] sm:$0xff] }
  0xfa   : > { %1786 = vmatpush.bf16.msrb.mxu2 %v2975_v19  ;;  %1526 = vmatmul.bf16.vlgmr.msra.gmra.mxu3 %v1468_v30  ;;  %v2998_v19 = vld [vmem:[%s3787_s12 + $0x28] sm:$0xff] }
  0xfb   : > { %1874 = vmatpush.bf16.msrb.mxu3 %v2984_v24  ;;  %v2987_v24 = vld [vmem:[%s3689_s1 + $0x210] sm:$0xff] }
  0xfc   : > { %1614 = vmatpush.bf16.msrb.mxu0 %v2957_v26  ;;  %v1888_v26 = vld [vmem:[%s3712_s25 + $0xc] sm:$0xc]  ;;  %s1171_s25 = scalar_lea.vmem %s3926_s6, %s3804_s20  ;;  %s1154_s20 = scalar_lea.vmem [#allocation5], %s1153_s26 }
  0xfd   : > { %1702 = vmatpush.bf16.msrb.mxu1 %v2966_v27  ;;  %v1907_v27 = vunpack.c.l.b16 %v1888_v26 }
  0xfe   : > { %1787 = vmatpush.bf16.msrb.mxu2 %v2974_v28  ;;  %v2986_v28 = vld [vmem:[%s3689_s1 + $0x208] sm:$0xff] }
  0xff   : > { %1875 = vmatpush.bf16.msrb.mxu3 %v2983_v31  ;;  %v1908_v30 = vpack.c.b16 %v1554_v43, %v1907_v27  ;;  %v2985_v31 = vld [vmem:[%s3689_s1 + $0x200] sm:$0xff]  ;;  %v1979_v43 = vshrl.u32 %v1974_v38, 16  ;;  %s2423_s1 = sshll.u32 %s3198_s14, 4  ;;  %v3217_v27 = vmov 0.0  }
 0x100   : > { %1615 = vmatpush.bf16.msrb.mxu0 %v2956_v32  ;;  %v2993_v32 = vld [vmem:[%s3787_s12] sm:$0xff]  ;;  %p1173_p5 = scmp.lt.s32.totalorder %s2423_s1, 31 }
 0x101   : > { %1703 = vmatpush.bf16.msrb.mxu1 %v2965_v33  ;;  %v1909_v33 = vrot.slane %v1908_v30, 2  ;;  %v1984_v52 = vmul.u32 43690, %v1979_v43 }
 0x102   : > { %1788 = vmatpush.bf16.msrb.mxu2 %v2973_v34  ;;  %s3964_s1 = smov (!%p1173_p5, %s2423_s1), 31 }
 0x103   : > { %1876 = vmatpush.bf16.msrb.mxu3 %v2982_v35 }
 0x104   : > { %1616 = vmatpush.bf16.msrb.mxu0 %v2955_v36 }
 0x105   : > { %1704 = vmatpush.bf16.msrb.mxu1 %v2964_v39 }
 0x106   : > { %1789 = vmatpush.bf16.msrb.mxu2 %v2972_v40 }
 0x107   : > { %1877 = vmatpush.bf16.msrb.mxu3 %v2981_v41 }
 0x108   : > { %1617 = vmatpush.bf16.msrb.mxu0 %v2954_v44  ;;  %v1982_v44 = vmul.u32 43690, %v1978_v42 }
 0x109   : > { %1705 = vmatpush.bf16.msrb.mxu1 %v2963_v45 }
 0x10a   : > { %1790 = vmatpush.bf16.msrb.mxu2 %v2971_v46  ;;  %v1981_v46 = vmul.u32 43691, %v1978_v42  ;;  %v1985_v48 = vshll.u32 %v1982_v44, 16 }
 0x10b   : > { %1878 = vmatpush.bf16.msrb.mxu3 %v2980_v47  ;;  %v1983_v47 = vmul.u32 43691, %v1979_v43 }
 0x10c   : > { %1618 = vmatpush.bf16.msrb.mxu0 %v2953_v49  ;;  %vm1989_vm0 = vc.u32 %v1981_v46, %v1985_v48 }
 0x10d   : > { %1706 = vmatpush.bf16.msrb.mxu1 %v2962_v50  ;;  %v1987_v50 = vshll.u32 %v1983_v47, 16 }
 0x10e   : > { %1791 = vmatpush.bf16.msrb.mxu2 %v2970_v51  ;;  %v1991_v51 = vadd.s32 %v1985_v48, %v1981_v46 }
 0x10f   : > { %1879 = vmatpush.bf16.msrb.mxu3 %v2979_v53  ;;  %v3216_v53 = vmov 0  }
 0x110   : > { %1619 = vmatpush.bf16.msrb.mxu0 %v2952_v57  ;;  %v1990_v54 = vsel %vm1989_vm0, 1, %v3216_v53  ;;  %vm1993_vm1 = vc.u32 %v1991_v51, %v1987_v50 }
 0x111   : > { %1707 = vmatpush.bf16.msrb.mxu1 %v2961_v58  ;;  %v1992_v55 = vadd.s32 %v1990_v54, %v1984_v52  ;;  %v1994_v57 = vsel %vm1993_vm1, 1, %v3216_v53 }
 0x112   : > { %1792 = vmatpush.bf16.msrb.mxu2 %v2969_v61  ;;  %v1986_v61 = vshrl.u32 %v1982_v44, 16 }
 0x113   : > { %1880 = vmatpush.bf16.msrb.mxu3 %v2978_v0  ;;  %v1996_v62 = vadd.s32 %v1994_v57, %v1992_v55  ;;  %v1988_v0 = vshrl.u32 %v1983_v47, 16 }
 0x114   : > { %1620 = vmatpush.bf16.msrb.mxu0 %v2951_v3 }
 0x115   : > { %1708 = vmatpush.bf16.msrb.mxu1 %v2960_v8  ;;  %v1997_v1 = vadd.s32 %v1996_v62, %v1986_v61 }
 0x116   : > { %1793 = vmatpush.bf16.msrb.mxu2 %v2968_v9 }
 0x117   : > { %1881 = vmatpush.bf16.msrb.mxu3 %v2977_v12  ;;  %1621 = vmatmul.bf16.vlgmr.msrb.gmra.mxu0 %v1563_v13  ;;  %v1998_v7 = vadd.s32 %v1997_v1, %v1988_v0 }
 0x118   : > { %1959 = vmatpush.bf16.msra.mxu0 %v2992_v10  ;;  %1709 = vmatmul.bf16.vlgmr.msrb.gmra.mxu1 %v1651_v60 }
 0x119   : > { %2080 = vmatpush.bf16.msra.mxu1 %v3000_v11  ;;  %1794 = vmatmul.bf16.vlgmr.msrb.gmra.mxu2 %v1736_v56  ;;  %v1999_v9 = vshrl.u32 %v1998_v7, 1 }
 0x11a   : > { %1882 = vmatmul.bf16.vlgmr.msrb.gmra.mxu3 %v1824_v17  ;;  %v3100_v17 = vld [vmem:[%s1162_s23] ss:$0 sm:$0xff]  ;;  %s2424_s23 = sshll.u32 %s3964_s1, 2 }
 0x11b   : > { %v2000_v13 = vmul.u32 3, %v1999_v9  ;;  %s3840_s22 = scalar_lea.vmem %s3927_s7, %s2424_s23 }
 0x11c   : > { %1960 = vmatpush.bf16.msra.mxu0 %v2991_v15  ;;  %v3008_v37 = vld [vmem:[%s3840_s22 + $0x38] sm:$0xff]  ;;  %v3007_v42 = vld [vmem:[%s3840_s22 + $0x30] sm:$0xff]  ;;  %v3006_v47 = vld [vmem:[%s3840_s22 + $0x28] sm:$0xff] }
 0x11d   : > { %2081 = vmatpush.bf16.msra.mxu1 %v2999_v16  ;;  %v2001_v56 = vsub.s32 %v1974_v38, %v2000_v13  ;;  %2221 = vmatpush.bf16.msra.mxu2 %v3008_v37  ;;  %v3005_v52 = vld [vmem:[%s3840_s22 + $0x20] sm:$0xff]  ;;  %v3004_v57 = vld [vmem:[%s3840_s22 + $0x18] sm:$0xff]  ;;  %v3002_v61 = vld [vmem:[%s3840_s22 + $0x8] sm:$0xff] }
 0x11e   : > { %v3001_v0 = vld [vmem:[%s3840_s22] sm:$0xff] }
 0x11f   : > { %vm2004_vm2 = vcmp.ne.s32.totalorder %v2001_v56, 0  ;;  %vm2005_vm3 = vcmp.lt.s32.totalorder %v2001_v56, 0  ;;  %v2007_v15 = vadd.s32 3, %v2001_v56 }
 0x120   : > { %1961 = vmatpush.bf16.msra.mxu0 %v2990_v18  ;;  %vm2006_vm4 = vmand %vm2005_vm3, %vm2004_vm2 }
 0x121   : > { %2082 = vmatpush.bf16.msra.mxu1 %v2998_v19  ;;  %2222 = vmatpush.bf16.msra.mxu2 %v3007_v42 }
 0x124   : > { %1962 = vmatpush.bf16.msra.mxu0 %v2989_v20 }
 0x125   : > { %2083 = vmatpush.bf16.msra.mxu1 %v2997_v21  ;;  %v2008_v21 = vsel %vm2006_vm4, %v2007_v15, %v2001_v56  ;;  %2223 = vmatpush.bf16.msra.mxu2 %v3006_v47 }
 0x126   : > { %vm3826_vm5 = vcmp.ne.s32.totalorder %v2008_v21, 2 }
 0x128   : > { %1963 = vmatpush.bf16.msra.mxu0 %v2988_v22 }
 0x129   : > { %2084 = vmatpush.bf16.msra.mxu1 %v2996_v23  ;;  %2224 = vmatpush.bf16.msra.mxu2 %v3005_v52 }
 0x12c   : > { %1964 = vmatpush.bf16.msra.mxu0 %v2987_v24 }
 0x12d   : > { %2085 = vmatpush.bf16.msra.mxu1 %v2995_v25  ;;  %v3101_v25 = vld [vmem:[%s1165_s17] ss:$0 sm:$0xff]  ;;  %2225 = vmatpush.bf16.msra.mxu2 %v3004_v57 }
 0x130   : > { %1965 = vmatpush.bf16.msra.mxu0 %v2986_v28  ;;  %v2881_v28 = vsel %vm3826_vm5, 1.0, %v3217_v27 }
 0x131   : > { %2086 = vmatpush.bf16.msra.mxu1 %v2994_v29 }
 0x134   : > { %1966 = vmatpush.bf16.msra.mxu0 %v2985_v31 }
 0x135   : > { %2087 = vmatpush.bf16.msra.mxu1 %v2993_v32 }
 0x137   : > { %1967 = vmatmul.bf16.vlgmr.msra.gmra.mxu0 %v1909_v33 }
 0x138   : > { %2088 = vmatmul.bf16.vlgmr.msra.gmra.mxu1 %v1651_v60 }
 0x174   : > { %v1281_v34 = vpop.f32.mrf.mxu0 }
 0x175   : > { %v1342_v35 = vpop.f32.mrf.mxu1 }
 0x176   : > { %v1343_v63 = vadd.f32 %v1342_v35, %v1281_v34 }
 0x17c   : > { %v1432_v36 = vpop.f32.mrf.mxu2  ;;  %v1283_v39 = vpop.f32.mrf.mxu0 }
 0x17d   : > { %v1527_v40 = vpop.f32.mrf.mxu3  ;;  %v1344_v41 = vpop.f32.mrf.mxu1  ;;  %v1436_v4 = vadd.f32 %v1432_v36, %v1343_v63 }
 0x17f   : > { %v1531_v8 = vadd.f32 %v1527_v40, %v1436_v4  ;;  %v2122_v4 = vld [vmem:[%s1168_s19] sm:$0x1] }
 0x184   : > { %v1434_v45 = vpop.f32.mrf.mxu2 }
 0x185   : > { %v1529_v49 = vpop.f32.mrf.mxu3 }
 0x194   : > { %v1622_v58 = vpop.f32.mrf.mxu0 }
 0x195   : > { %v1710_v59 = vpop.f32.mrf.mxu1  ;;  %v1626_v11 = vadd.f32 %v1622_v58, %v1531_v8  ;;  %v2139_v8 = vld [vmem:[%s1171_s25] sm:$0x1] }
 0x197   : > { %v1714_v14 = vadd.f32 %v1710_v59, %v1626_v11  ;;  %v3003_v59 = vld [vmem:[%s3840_s22 + $0x10] sm:$0xff] }
 0x198   : > { %2226 = vmatpush.bf16.msra.mxu2 %v3003_v59 }
 0x19c   : > { %v1795_v2 = vpop.f32.mrf.mxu2  ;;  %v1624_v3 = vpop.f32.mrf.mxu0  ;;  %2227 = vmatpush.bf16.msra.mxu2 %v3002_v61 }
 0x19d   : > { %v1712_v5 = vpop.f32.mrf.mxu1  ;;  %v1883_v6 = vpop.f32.mrf.mxu3  ;;  %v1799_v60 = vadd.f32 %v1795_v2, %v1714_v14 }
 0x19f   : > { %v1887_v16 = vadd.f32 %v1883_v6, %v1799_v60 }
 0x1a0   : > { %2228 = vmatpush.bf16.msra.mxu2 %v3001_v0 }
 0x1a4   : > { %v1797_v10 = vpop.f32.mrf.mxu2 }
 0x1a5   : > { %v1885_v12 = vpop.f32.mrf.mxu3 }
 0x1b4   : > { %v1968_v18 = vpop.f32.mrf.mxu0 }
 0x1b5   : > { %v2089_v19 = vpop.f32.mrf.mxu1  ;;  %v1972_v20 = vadd.f32 %v1968_v18, %v1887_v16 }
 0x1b7   : > { %v2014_v22 = vadd.f32 %v3100_v17, %v1972_v20 }
 0x1b9   : > { %v2015_v24 = vmax.f32 %v2014_v22, 0.0 }
 0x1bb   : > { %v2093_v26 = vadd.f32 %v2089_v19, %v2015_v24 }
 0x1bc   : > { %v1970_v29 = vpop.f32.mrf.mxu0 }
 0x1bd   : > { %v2091_v30 = vpop.f32.mrf.mxu1  ;;  %v2098_v31 = vadd.f32 %v3101_v25, %v2093_v26 }
 0x1bf   : > { %v2101_v32 = vmul.f32 %v2881_v28, %v2098_v31 }
 0x1c1   : > { %v2103_v33 = vsel %vm2102_vm6, %v2101_v32, 0.0  ;;  %v2110_v34 = vmul.f32 %v2101_v32, %v2098_v31 }
 0x1c2   : > { %v2104_v35 = vrot.slane %v2103_v33, 4 }
 0x1c3   : > { %v2111_v36 = vsel %vm2102_vm6, %v2110_v34, 0.0 }
 0x1c4   : > { %v2105_v39 = vadd.f32 %v2104_v35, %v2103_v33  ;;  %v2112_v38 = vrot.slane %v2111_v36, 4 }
 0x1c6   : > { %v2106_v40 = vrot.slane %v2105_v39, 2  ;;  %v2113_v41 = vadd.f32 %v2112_v38, %v2111_v36 }
 0x1c8   : > { %v2107_v43 = vadd.f32 %v2106_v40, %v2105_v39  ;;  %v2114_v44 = vrot.slane %v2113_v41, 2 }
 0x1ca   : > { %v2108_v45 = vrot.slane %v2107_v43, 1  ;;  %v2115_v46 = vadd.f32 %v2114_v44, %v2113_v41 }
 0x1cc   : > { %v2109_v48 = vadd.f32 %v2108_v45, %v2107_v43  ;;  %v2116_v49 = vrot.slane %v2115_v46, 1 }
 0x1ce   : > { %v2117_v50 = vadd.f32 %v2116_v49, %v2115_v46  ;;  %v2118_v51 = vmul.f32 0.25, %v2109_v48 }
 0x1d0   : > { %v2119_v53 = vmul.f32 0.25, %v2117_v50  ;;  %v2120_v54 = vmul.f32 %v2118_v51, %v2118_v51 }
 0x1d2   : > { %v2121_v55 = vsub.f32 %v2119_v53, %v2120_v54 }
 0x1d4   : > { %v2123_v58 = vadd.f32 1e-05, %v2121_v55 }
 0x1d6   : > { %3102 = vrsqrt.f32 %v2123_v58  ;;  %vm2130_vm8 = vweird.f32 %v2123_v58 }
 0x1dc   : > { %v3103_v62 = vpop.eup %3102 }
 0x1dd   : > { %v2125_v63 = vmul.f32 %v3103_v62, %v2123_v58  ;;  %vm2131_vm7 = vweird.f32 %v3103_v62 }
 0x1de   : > { %vm2132_vm9 = vmor %vm2130_vm8, %vm2131_vm7 }
 0x1df   : > { %v2126_v1 = vmul.f32 %v3103_v62, %v2125_v63 }
 0x1e1   : > { %v2127_v2 = vmul.f32 0.5, %v2126_v1 }
 0x1e3   : > { %v2128_v3 = vsub.f32 1.5, %v2127_v2 }
 0x1e5   : > { %v2129_v5 = vmul.f32 %v3103_v62, %v2128_v3 }
 0x1e7   : > { %v2133_v6 = vsel %vm2132_vm9, %v3103_v62, %v2129_v5 }
 0x1e8   : > { %v2134_v7 = vmul.f32 %v2133_v6, %v2122_v4 }
 0x1ea   : > { %v2136_v9 = vperm.slane %v2134_v7, 0  ;;  %v2140_v10 = vmul.f32 %v2134_v7, %v2118_v51 }
 0x1ec   : > { %v2141_v11 = vsub.f32 %v2139_v8, %v2140_v10  ;;  %v2138_v12 = vmul.f32 %v2136_v9, %v2098_v31 }
 0x1ee   : > { %v2143_v13 = vperm.slane %v2141_v11, 0 }
 0x1f0   : > { %v2145_v14 = vadd.f32 %v2143_v13, %v2138_v12 }
 0x1f2   : > { %v2147_v56 = vsel %vm3826_vm5, %v2145_v14, -1e+30 }
 0x1f3   : > { %v2148_v60 = vsel %vm2102_vm6, %v2147_v56, -inf }
 0x1f4   : > { %v2149_v15 = vrot.slane %v2148_v60, 4 }
 0x1f6   : > { %v2150_v16 = vmax.f32 %v2148_v60, %v2149_v15 }
 0x1f8   : > { %v2151_v17 = vrot.slane %v2150_v16, 2 }
 0x1fa   : > { %v2152_v18 = vmax.f32 %v2150_v16, %v2151_v17 }
 0x1fc   : > { %v2153_v19 = vrot.slane %v2152_v18, 1 }
 0x1fe   : > { %v2154_v20 = vmax.f32 %v2152_v18, %v2153_v19 }
 0x200   : > { %v2155_v21 = vmax.f32 %v2154_v20, 0.0 }
 0x202   : > { %v2156_v22 = vpack.c.bf16 %v2155_v21, %v2155_v21 }
 0x204   : > { %2229 = vmatmul.bf16.vlgmr.msra.gmra.mxu2 %v2156_v22 }
 0x287   : > { %v2230_v24 = vpop.f32.mrf.mxu2 }
 0x28b   : > { %2237 = sbr.rel (%p2914_p6) target bundleno = 658 (0x292), region = 142 }
 0x28f   : > { %v2232_v25 = vpop.f32.mrf.mxu2 }
 0x290   : > { %v2238_v23 = vld [vmem:[%s3928_s8] sm:$0x1] }
 0x291   : > { %2239 = vst [vmem:[#allocation2] sm:$0x1] %v2238_v23 }
 0x292 PF: > { %p2915_p7 = scmp.ne.s32.totalorder %s3198_s14, 1 }
 0x297   : > { %2246 = sbr.rel (%p2915_p7) target bundleno = 676 (0x2a4), region = 146 }
 0x298   : > { %v2240_v26 = vld [vmem:[#allocation2] sm:$0x1] }
 0x299   : > { %v2241_v27 = vadd.f32 %v2240_v26, %v2230_v24 }
 0x29b   : > { %2242 = vst [vmem:[#allocation2] sm:$0x1] %v2241_v27 }
 0x2a2   : > { %v2247_v28 = vld [vmem:[#allocation2] sm:$0x1] }
 0x2a3   : > { %2248 = vst [vmem:[%s1154_s20] sm:$0x1] %v2247_v28 }
 0x2a4 PF: > { %s2258_s19 = scalar_lea.hbm %s3929_s9, %s3202_s15  ;;  %s2260_s28 = sshll.u32 %s1154_s20, 4  ;;  %s2261_s28 = int_to_ptr.vmem [resolvable:$true] %s2260_s28 }
 0x2a5   : > { %s2262_s23 = sshll.u32 %s2258_s19, 4  ;;  %s2250_s25 = scalar_lea.sflag [#allocation6], %s1153_s26  ;;  %s2263_s23 = int_to_ptr.hbm [resolvable:$true] %s2262_s23 }
 0x2a6   : > { %s3118_s12 = sshra.s32 %s2263_s23, 4  ;;  %s3124_s17 = scalar_lea.hbm %s3929_s9, 2  ;;  %s3119_s12 = int_to_ptr.hbm [resolvable:$true] %s3118_s12 }
 0x2a7   : > { %s3120_s14 = scalar_lea.hbm %s3119_s12, 1  ;;  %p3125_p13 = scmp.lt.s32.totalorder %s3119_s12, %s3929_s9 }
 0x2a8   : > { %p3121_p8 = scmp.ne.s32.totalorder %s3119_s12, %s3120_s14  ;;  %p3126_p0 = scmp.lt.s32.totalorder %s3124_s17, %s3120_s14 }
 0x2aa   : > { %p3122_p9 = pnand %p3121_p8, %p3347_p10  ;;  %p3127_p1 = por %p3126_p0, %p3125_p13 }
 0x2ac   : > { %p3123_p11 = pneg %p3122_p9 }
 0x2ae   : > { %p3128_p2 = pnand %p3127_p1, %p3123_p11 }
 0x2b0   : > { %3131 = shalt.err (!%p3128_p2)
}
 0x2b1   : > { %3011 = dma.vmem_to_hbm [thread:$0]  (%p3347_p10), %s2261_s28, 16, %s2263_s23, %s2250_s25  }
 0x2b2 PF: > { %p3017_p3 = scmp.ge.s32.totalorder %s3214_s18, 2  ;;  %s2274_s15 = sand.u32 1, %s3178_s30  }
 0x2b3   : > { %s2275_s0 = scalar_lea.sflag [#allocation6], %s2274_s15 }
 0x2b4   : > { %p3014_p4 = pnand %p3017_p3, %p3354_p12 }
 0x2b6   : > { %p3015_p5 = pneg %p3014_p4 }
 0x2b8   : > { %3173 = dma.done.wait (%p3015_p5), %s2275_s0, 16  }
 0x2b9   : > { %3175 = vsyncadd (%p3015_p5), %s2275_s0, 4294967280  ;;  %s22_s18 = sadd.s32 1, %s3214_s18   ;;  %s3947_s15 = sld [smem:[#allocation8_spill]] }
 0x2ba   : > { %p19_p6 = scmp.ge.s32.totalorder %s22_s18, 6   ;;  %s3948_s2 = sld [smem:[#allocation9_spill]] }
 0x2bb   : > { %s3949_s17 = sld [smem:[#allocation10_spill]]  ;;  %s3950_s30 = smov %s3182_s10 }
 0x2bc   : > { %s3951_s10 = smov %s3186_s11  ;;  %s3952_s11 = smov %s3352_s21 }
 0x2bd   : > { %s3953_s12 = smov %s3194_s13  ;;  %s3954_s13 = smov %s3341_s27 }
 0x2be   : > { %s3955_s14 = smov %s3206_s16  ;;  %21 = sbr.rel (!%p19_p6) target bundleno = 10 (0xa), region = 220 }
 0x2c0   : > { %s3956_s16 = smov %s3948_s2 }
 0x2c3   :  { %2280 = vsyncpa [#allocation6], 1 }
 0x2c4   :  { %2282 = vsyncpa [#allocation6 + $0x1], 1 }

</bundles_post_ra>
